<compile_context>
chip_gen: v7x
topology: tpu7x:2x2x1
jax: 0.10.0
libtpu: 0.0.40
codegen_flags: <defaults>
</compile_context>

<pallas_src>
import math

import jax
import jax.numpy as jnp
from jax.experimental import pallas as pl
from jax.experimental.pallas import tpu as pltpu

NEG_SLOPE = 0.01          # F.leaky_relu default negative slope
NORM_EPS = 1e-12          # F.normalize default eps
LANE = 128                # TPU lane width


def _ceil_to(n, m=LANE):
    return ((n + m - 1) // m) * m


def _leaky(x):
    return jnp.where(x >= 0, x, NEG_SLOPE * x)


def _l2_normalize(x):
    # F.normalize(x, p=2, dim=1): x / max(||x||, eps)  ==  x * rsqrt(max(ss, eps^2))
    ss = jnp.sum(x * x, axis=1, keepdims=True)
    return x * jax.lax.rsqrt(jnp.maximum(ss, NORM_EPS * NORM_EPS))


# ------------------------------ fused kernel -------------------------------

def _modality_chain(refs, adj_bf, id_emb, has_mlp):
    """One GCN modality: (MLP?) -> concat -> normalize -> 3 GCN layers."""
    it = iter(refs)
    feat = next(it)[...]                    # f32 [num_item, Fpad]
    pref = next(it)[...]                    # f32 [num_user, D0pad]
    if has_mlp:
        mlp_w = next(it)[...]               # bf16 [Fpad, Dlat]
        mlp_b = next(it)[...]               # f32  [1, Dlat]
        temp = jnp.dot(feat.astype(jnp.bfloat16), mlp_w,
                       preferred_element_type=jnp.float32) + mlp_b
    else:
        temp = feat

    # F.normalize is row-wise, so normalizing the two halves before the
    # concat is identical to normalizing the concatenated tensor.
    x = jnp.concatenate([_l2_normalize(pref), _l2_normalize(temp)], axis=0)

    for _ in range(3):                      # forward() always runs 3 layers
        wconv = next(it)[...]               # bf16 [Din, Din]
        wlin = next(it)[...]                # bf16 [Din, Dout]
        blin = next(it)[...]                # f32  [1, Dout]
        wg = next(it)[...]                  # bf16 [Din, Dout]
        bg = next(it)[...]                  # f32  [1, Dout]

        x_bf = x.astype(jnp.bfloat16)
        xw = jnp.dot(x_bf, wconv, preferred_element_type=jnp.float32)
        h = _leaky(jnp.dot(adj_bf, xw.astype(jnp.bfloat16),
                           preferred_element_type=jnp.float32))
        x_hat = _leaky(jnp.dot(x_bf, wlin,
                               preferred_element_type=jnp.float32) + blin) + id_emb
        x = _leaky(jnp.dot(h.astype(jnp.bfloat16), wg,
                           preferred_element_type=jnp.float32) + bg + x_hat)
    return x


def _make_net_kernel(has_mlp_flags):
    """Builds the fused whole-forward kernel for a static tuple of MLP flags."""
    counts = tuple(19 if f else 17 for f in has_mlp_flags)

    def kernel(*refs):
        adj_ref, id_ref = refs[0], refs[1]
        out_ref = refs[-1]
        in_refs = refs[2:-1]

        adj_bf = adj_ref[...]               # bf16 [N, N], loaded ONCE
        id_emb = id_ref[...]                # f32  [N, Dpad]

        acc = None
        idx = 0
        for has_mlp, n in zip(has_mlp_flags, counts):
            rep = _modality_chain(in_refs[idx:idx + n], adj_bf, id_emb, has_mlp)
            acc = rep if acc is None else acc + rep
            idx += n
        out_ref[...] = acc * (1.0 / 3.0)    # (v_rep + a_rep + t_rep) / 3

    return kernel


# ------------------------------ host wrappers ------------------------------

_VMEM_SPEC = pl.BlockSpec(memory_space=pltpu.MemorySpace.VMEM)


def _flatten_modality(params, feat):
    args = [feat, params["preference"]]
    if "mlp_w" in params:
        args += [params["mlp_w"], params["mlp_b"]]
    for layer in params["layers"]:
        args += [layer["wconv"], layer["wlin"], layer["blin"],
                 layer["wg"], layer["bg"]]
    return args


@jax.jit
def net_forward(v_params, a_params, t_params,
                v_feat, a_feat, t_feat, id_embedding, adj):
    # static (pytree-structure) check — no tracer bool conversion.
    flags = tuple("mlp_w" in p for p in (v_params, a_params, t_params))

    args = [adj, id_embedding]
    for p, f in ((v_params, v_feat), (a_params, a_feat), (t_params, t_feat)):
        args += _flatten_modality(p, f)

    n_nodes, d_pad = id_embedding.shape
    return pl.pallas_call(
        _make_net_kernel(flags),
        out_shape=jax.ShapeDtypeStruct((n_nodes, d_pad), jnp.float32),
        in_specs=[_VMEM_SPEC] * len(args),
        out_specs=_VMEM_SPEC,
    )(*args)


# --------------------- pure-JAX reference (for checking) -------------------

def _reference_modality(params, feat, id_emb, adj_bf):
    if "mlp_w" in params:
        temp = jnp.dot(feat.astype(jnp.bfloat16), params["mlp_w"],
                       preferred_element_type=jnp.float32) + params["mlp_b"]
    else:
        temp = feat
    x = jnp.concatenate(
        [_l2_normalize(params["preference"]), _l2_normalize(temp)], axis=0)
    for layer in params["layers"]:
        x_bf = x.astype(jnp.bfloat16)
        xw = jnp.dot(x_bf, layer["wconv"], preferred_element_type=jnp.float32)
        h = _leaky(jnp.dot(adj_bf, xw.astype(jnp.bfloat16),
                           preferred_element_type=jnp.float32))
        x_hat = _leaky(jnp.dot(x_bf, layer["wlin"],
                               preferred_element_type=jnp.float32)
                       + layer["blin"]) + id_emb
        x = _leaky(jnp.dot(h.astype(jnp.bfloat16), layer["wg"],
                           preferred_element_type=jnp.float32)
                   + layer["bg"] + x_hat)
    return x


def reference_forward(v_params, a_params, t_params,
                      v_feat, a_feat, t_feat, id_embedding, adj):
    reps = [_reference_modality(p, f, id_embedding, adj)
            for p, f in ((v_params, v_feat), (a_params, a_feat),
                         (t_params, t_feat))]
    return (reps[0] + reps[1] + reps[2]) / 3.0


# ------------------------------ parameter init -----------------------------

def xavier_normal(key, shape):
    # std = sqrt(2/(fan_in+fan_out)) — symmetric, so [in,out] layout is fine.
    fan_a, fan_b = shape[0], shape[1]
    std = math.sqrt(2.0 / (fan_a + fan_b))
    return std * jax.random.normal(key, shape, dtype=jnp.float32)


def uniform_bias(key, out_dim, fan_in):
    bound = 1.0 / math.sqrt(fan_in)
    return jax.random.uniform(key, (out_dim,), jnp.float32, -bound, bound)


def _pad_to(x, rows, cols):
    out = jnp.zeros((rows, cols), x.dtype)
    return out.at[: x.shape[0], : x.shape[1]].set(x)


def make_gcn_params(key, num_user, dim_feat, dim_id, dim_latent=None):
    """Weights generated at true sizes, then zero-padded to 128 lanes and
    stored pre-transposed [in, out] in bf16 (biases / preference stay f32)."""
    ks = iter(jax.random.split(key, 32))
    d0 = dim_latent if dim_latent else dim_feat
    d0p, fp = _ceil_to(d0), _ceil_to(dim_feat)

    p = {"preference": _pad_to(xavier_normal(next(ks), (num_user, d0)),
                               num_user, d0p)}
    if dim_latent:
        dlp = _ceil_to(dim_latent)
        p["mlp_w"] = _pad_to(xavier_normal(next(ks), (dim_feat, dim_latent)),
                             fp, dlp).astype(jnp.bfloat16)
        p["mlp_b"] = _pad_to(uniform_bias(next(ks), dim_latent,
                                          dim_feat).reshape(1, -1), 1, dlp)

    layer_dims = [(d0, dim_id), (dim_id, dim_id), (dim_id, dim_id)]
    layers = []
    for din, dout in layer_dims:
        dinp, doutp = _ceil_to(din), _ceil_to(dout)
        layers.append({
            "wconv": _pad_to(xavier_normal(next(ks), (din, din)),
                             dinp, dinp).astype(jnp.bfloat16),
            "wlin":  _pad_to(xavier_normal(next(ks), (din, dout)),
                             dinp, doutp).astype(jnp.bfloat16),
            "blin":  _pad_to(uniform_bias(next(ks), dout, din).reshape(1, -1),
                             1, doutp),
            "wg":    _pad_to(xavier_normal(next(ks), (din, dout)),
                             dinp, doutp).astype(jnp.bfloat16),
            "bg":    _pad_to(uniform_bias(next(ks), dout, din).reshape(1, -1),
                             1, doutp),
        })
    p["layers"] = layers
    return p


def build_adjacency(edge_index, n_nodes, aggr="add"):
    # dense adjacency replacing the PyG scatter aggregation:
    # out[i] = sum_{(j->i) in E} msg[j]   (source_to_target flow)
    src, dst = edge_index
    adj = jnp.zeros((n_nodes, n_nodes), jnp.float32).at[dst, src].add(1.0)
    if aggr == "mean":
        deg = adj.sum(axis=1, keepdims=True)
        adj = adj / jnp.maximum(deg, 1.0)
    return adj.astype(jnp.bfloat16)   # small integer counts -> exact in bf16


# --------------------------------- driver ----------------------------------

if __name__ == "__main__":
    key = jax.random.PRNGKey(0)
    (k_edge_u, k_edge_i, k_vfeat, k_afeat, k_tfeat,
     k_id, k_vgcn, k_agcn, k_tgcn) = jax.random.split(key, 9)

    num_user, num_item = 8, 8
    n_nodes = num_user + num_item
    dim_x = 32                    # dim_id
    v_dim, a_dim, t_dim = 64, 48, 40
    dim_latent = 256              # only the visual GCN uses a latent MLP
    n_interactions = 24

    # synthetic user-item interaction graph (bidirectional, like Net.__init__)
    users = jax.random.randint(k_edge_u, (n_interactions,), 0, num_user)
    items = jax.random.randint(k_edge_i, (n_interactions,), 0, num_item) + num_user
    edge_index = jnp.stack([jnp.concatenate([users, items]),
                            jnp.concatenate([items, users])])
    adj = build_adjacency(edge_index, n_nodes, aggr="add")

    # synthetic modality features (per item) and id embedding (per node),
    # zero-padded host-side to 128 lanes (exact; padded lanes stay zero).
    v_feat = _pad_to(jax.random.normal(k_vfeat, (num_item, v_dim), jnp.float32),
                     num_item, _ceil_to(v_dim))
    a_feat = _pad_to(jax.random.normal(k_afeat, (num_item, a_dim), jnp.float32),
                     num_item, _ceil_to(a_dim))
    t_feat = _pad_to(jax.random.normal(k_tfeat, (num_item, t_dim), jnp.float32),
                     num_item, _ceil_to(t_dim))
    id_embedding = _pad_to(xavier_normal(k_id, (n_nodes, dim_x)),
                           n_nodes, _ceil_to(dim_x))

    v_params = make_gcn_params(k_vgcn, num_user, v_dim, dim_x, dim_latent=dim_latent)
    a_params = make_gcn_params(k_agcn, num_user, a_dim, dim_x)
    t_params = make_gcn_params(k_tgcn, num_user, t_dim, dim_x)

    rep_padded = net_forward(v_params, a_params, t_params,
                             v_feat, a_feat, t_feat, id_embedding, adj)
    jax.block_until_ready(rep_padded)

    representation = rep_padded[:, :dim_x]   # drop the zero lane padding
    jax.block_until_ready(representation)

    # correctness check against a pure-JAX reference of the same forward
    ref = reference_forward(v_params, a_params, t_params,
                            v_feat, a_feat, t_feat, id_embedding, adj)
    ref = jax.block_until_ready(ref)[:, :dim_x]

    assert representation.shape == (n_nodes, dim_x)
    assert bool(jnp.all(jnp.isfinite(representation)))
    assert bool(jnp.allclose(representation, ref, rtol=5e-2, atol=5e-2))

    print("KERNEL_OK")
</pallas_src>

<mosaic_0001>
module attributes {stable_mosaic.version = 11 : i64} {
  func.func @kernel(%arg0: memref<16x16xbf16, #tpu.memory_space<vmem>>, %arg1: memref<16x128xf32, #tpu.memory_space<vmem>>, %arg2: memref<8x128xf32, #tpu.memory_space<vmem>>, %arg3: memref<8x256xf32, #tpu.memory_space<vmem>>, %arg4: memref<128x256xbf16, #tpu.memory_space<vmem>>, %arg5: memref<1x256xf32, #tpu.memory_space<vmem>>, %arg6: memref<256x256xbf16, #tpu.memory_space<vmem>>, %arg7: memref<256x128xbf16, #tpu.memory_space<vmem>>, %arg8: memref<1x128xf32, #tpu.memory_space<vmem>>, %arg9: memref<256x128xbf16, #tpu.memory_space<vmem>>, %arg10: memref<1x128xf32, #tpu.memory_space<vmem>>, %arg11: memref<128x128xbf16, #tpu.memory_space<vmem>>, %arg12: memref<128x128xbf16, #tpu.memory_space<vmem>>, %arg13: memref<1x128xf32, #tpu.memory_space<vmem>>, %arg14: memref<128x128xbf16, #tpu.memory_space<vmem>>, %arg15: memref<1x128xf32, #tpu.memory_space<vmem>>, %arg16: memref<128x128xbf16, #tpu.memory_space<vmem>>, %arg17: memref<128x128xbf16, #tpu.memory_space<vmem>>, %arg18: memref<1x128xf32, #tpu.memory_space<vmem>>, %arg19: memref<128x128xbf16, #tpu.memory_space<vmem>>, %arg20: memref<1x128xf32, #tpu.memory_space<vmem>>, %arg21: memref<8x128xf32, #tpu.memory_space<vmem>>, %arg22: memref<8x128xf32, #tpu.memory_space<vmem>>, %arg23: memref<128x128xbf16, #tpu.memory_space<vmem>>, %arg24: memref<128x128xbf16, #tpu.memory_space<vmem>>, %arg25: memref<1x128xf32, #tpu.memory_space<vmem>>, %arg26: memref<128x128xbf16, #tpu.memory_space<vmem>>, %arg27: memref<1x128xf32, #tpu.memory_space<vmem>>, %arg28: memref<128x128xbf16, #tpu.memory_space<vmem>>, %arg29: memref<128x128xbf16, #tpu.memory_space<vmem>>, %arg30: memref<1x128xf32, #tpu.memory_space<vmem>>, %arg31: memref<128x128xbf16, #tpu.memory_space<vmem>>, %arg32: memref<1x128xf32, #tpu.memory_space<vmem>>, %arg33: memref<128x128xbf16, #tpu.memory_space<vmem>>, %arg34: memref<128x128xbf16, #tpu.memory_space<vmem>>, %arg35: memref<1x128xf32, #tpu.memory_space<vmem>>, %arg36: memref<128x128xbf16, #tpu.memory_space<vmem>>, %arg37: memref<1x128xf32, #tpu.memory_space<vmem>>, %arg38: memref<8x128xf32, #tpu.memory_space<vmem>>, %arg39: memref<8x128xf32, #tpu.memory_space<vmem>>, %arg40: memref<128x128xbf16, #tpu.memory_space<vmem>>, %arg41: memref<128x128xbf16, #tpu.memory_space<vmem>>, %arg42: memref<1x128xf32, #tpu.memory_space<vmem>>, %arg43: memref<128x128xbf16, #tpu.memory_space<vmem>>, %arg44: memref<1x128xf32, #tpu.memory_space<vmem>>, %arg45: memref<128x128xbf16, #tpu.memory_space<vmem>>, %arg46: memref<128x128xbf16, #tpu.memory_space<vmem>>, %arg47: memref<1x128xf32, #tpu.memory_space<vmem>>, %arg48: memref<128x128xbf16, #tpu.memory_space<vmem>>, %arg49: memref<1x128xf32, #tpu.memory_space<vmem>>, %arg50: memref<128x128xbf16, #tpu.memory_space<vmem>>, %arg51: memref<128x128xbf16, #tpu.memory_space<vmem>>, %arg52: memref<1x128xf32, #tpu.memory_space<vmem>>, %arg53: memref<128x128xbf16, #tpu.memory_space<vmem>>, %arg54: memref<1x128xf32, #tpu.memory_space<vmem>>, %arg55: memref<16x128xf32, #tpu.memory_space<vmem>>) attributes {dimension_semantics = [], scalar_prefetch = 0 : i64, scratch_operands = 0 : i64, tpu.core_type = #tpu.core_type<tc>} {
    %c0 = arith.constant 0 : index
    %c0_0 = arith.constant 0 : index
    %0 = vector.load %arg0[%c0, %c0_0] : memref<16x16xbf16, #tpu.memory_space<vmem>>, vector<16x16xbf16>
    %c0_1 = arith.constant 0 : index
    %c0_2 = arith.constant 0 : index
    %1 = vector.load %arg1[%c0_1, %c0_2] : memref<16x128xf32, #tpu.memory_space<vmem>>, vector<16x128xf32>
    %c0_3 = arith.constant 0 : index
    %c0_4 = arith.constant 0 : index
    %2 = vector.load %arg2[%c0_3, %c0_4] : memref<8x128xf32, #tpu.memory_space<vmem>>, vector<8x128xf32>
    %c0_5 = arith.constant 0 : index
    %c0_6 = arith.constant 0 : index
    %3 = vector.load %arg3[%c0_5, %c0_6] : memref<8x256xf32, #tpu.memory_space<vmem>>, vector<8x256xf32>
    %c0_7 = arith.constant 0 : index
    %c0_8 = arith.constant 0 : index
    %4 = vector.load %arg4[%c0_7, %c0_8] : memref<128x256xbf16, #tpu.memory_space<vmem>>, vector<128x256xbf16>
    %c0_9 = arith.constant 0 : index
    %c0_10 = arith.constant 0 : index
    %5 = vector.load %arg5[%c0_9, %c0_10] : memref<1x256xf32, #tpu.memory_space<vmem>>, vector<1x256xf32>
    %6 = arith.truncf %2 : vector<8x128xf32> to vector<8x128xbf16>
    %cst = arith.constant dense<0.000000e+00> : vector<8x256xf32>
    %7 = tpu.matmul %6, %4, %cst {dimension_numbers = #tpu.dot_dimension_numbers<[1], [0], [0], [1], [0, 0, 1, 1], [], []>} : vector<8x128xbf16>, vector<128x256xbf16>, vector<8x256xf32> -> vector<8x256xf32>
    %8 = vector.broadcast %5 : vector<1x256xf32> to vector<8x256xf32>
    %9 = arith.addf %7, %8 : vector<8x256xf32>
    %10 = arith.mulf %3, %3 : vector<8x256xf32>
    %cst_11 = arith.constant dense<0.000000e+00> : vector<8xf32>
    %11 = vector.multi_reduction <add>, %10, %cst_11 [1] : vector<8x256xf32> to vector<8xf32>
    %12 = vector.shape_cast %11 : vector<8xf32> to vector<8x1xf32>
    %cst_12 = arith.constant 1.000000e-24 : f32
    %13 = vector.broadcast %cst_12 : f32 to vector<8x1xf32>
    %14 = arith.maximumf %12, %13 : vector<8x1xf32>
    %15 = math.rsqrt %14 : vector<8x1xf32>
    %16 = vector.broadcast %15 : vector<8x1xf32> to vector<8x256xf32>
    %17 = arith.mulf %3, %16 : vector<8x256xf32>
    %18 = arith.mulf %9, %9 : vector<8x256xf32>
    %cst_13 = arith.constant dense<0.000000e+00> : vector<8xf32>
    %19 = vector.multi_reduction <add>, %18, %cst_13 [1] : vector<8x256xf32> to vector<8xf32>
    %20 = vector.shape_cast %19 : vector<8xf32> to vector<8x1xf32>
    %cst_14 = arith.constant 1.000000e-24 : f32
    %21 = vector.broadcast %cst_14 : f32 to vector<8x1xf32>
    %22 = arith.maximumf %20, %21 : vector<8x1xf32>
    %23 = math.rsqrt %22 : vector<8x1xf32>
    %24 = vector.broadcast %23 : vector<8x1xf32> to vector<8x256xf32>
    %25 = arith.mulf %9, %24 : vector<8x256xf32>
    %26 = tpu.concatenate %17, %25 in 0 : vector<8x256xf32>, vector<8x256xf32> -> vector<16x256xf32>
    %c0_15 = arith.constant 0 : index
    %c0_16 = arith.constant 0 : index
    %27 = vector.load %arg6[%c0_15, %c0_16] : memref<256x256xbf16, #tpu.memory_space<vmem>>, vector<256x256xbf16>
    %c0_17 = arith.constant 0 : index
    %c0_18 = arith.constant 0 : index
    %28 = vector.load %arg7[%c0_17, %c0_18] : memref<256x128xbf16, #tpu.memory_space<vmem>>, vector<256x128xbf16>
    %c0_19 = arith.constant 0 : index
    %c0_20 = arith.constant 0 : index
    %29 = vector.load %arg8[%c0_19, %c0_20] : memref<1x128xf32, #tpu.memory_space<vmem>>, vector<1x128xf32>
    %c0_21 = arith.constant 0 : index
    %c0_22 = arith.constant 0 : index
    %30 = vector.load %arg9[%c0_21, %c0_22] : memref<256x128xbf16, #tpu.memory_space<vmem>>, vector<256x128xbf16>
    %c0_23 = arith.constant 0 : index
    %c0_24 = arith.constant 0 : index
    %31 = vector.load %arg10[%c0_23, %c0_24] : memref<1x128xf32, #tpu.memory_space<vmem>>, vector<1x128xf32>
    %32 = arith.truncf %26 : vector<16x256xf32> to vector<16x256xbf16>
    %cst_25 = arith.constant dense<0.000000e+00> : vector<16x256xf32>
    %33 = tpu.matmul %32, %27, %cst_25 {dimension_numbers = #tpu.dot_dimension_numbers<[1], [0], [0], [1], [0, 0, 1, 1], [], []>} : vector<16x256xbf16>, vector<256x256xbf16>, vector<16x256xf32> -> vector<16x256xf32>
    %34 = arith.truncf %33 : vector<16x256xf32> to vector<16x256xbf16>
    %cst_26 = arith.constant dense<0.000000e+00> : vector<16x256xf32>
    %35 = tpu.matmul %0, %34, %cst_26 {dimension_numbers = #tpu.dot_dimension_numbers<[1], [0], [0], [1], [0, 0, 1, 1], [], []>} : vector<16x16xbf16>, vector<16x256xbf16>, vector<16x256xf32> -> vector<16x256xf32>
    %cst_27 = arith.constant 0.000000e+00 : f32
    %36 = vector.broadcast %cst_27 : f32 to vector<16x256xf32>
    %37 = arith.cmpf oge, %35, %36 : vector<16x256xf32>
    %cst_28 = arith.constant 0.00999999977 : f32
    %38 = vector.broadcast %cst_28 : f32 to vector<16x256xf32>
    %39 = arith.mulf %38, %35 : vector<16x256xf32>
    %40 = arith.select %37, %35, %39 : vector<16x256xi1>, vector<16x256xf32>
    %cst_29 = arith.constant dense<0.000000e+00> : vector<16x128xf32>
    %41 = tpu.matmul %32, %28, %cst_29 {dimension_numbers = #tpu.dot_dimension_numbers<[1], [0], [0], [1], [0, 0, 1, 1], [], []>} : vector<16x256xbf16>, vector<256x128xbf16>, vector<16x128xf32> -> vector<16x128xf32>
    %42 = vector.broadcast %29 : vector<1x128xf32> to vector<16x128xf32>
    %43 = arith.addf %41, %42 : vector<16x128xf32>
    %cst_30 = arith.constant 0.000000e+00 : f32
    %44 = vector.broadcast %cst_30 : f32 to vector<16x128xf32>
    %45 = arith.cmpf oge, %43, %44 : vector<16x128xf32>
    %cst_31 = arith.constant 0.00999999977 : f32
    %46 = vector.broadcast %cst_31 : f32 to vector<16x128xf32>
    %47 = arith.mulf %46, %43 : vector<16x128xf32>
    %48 = arith.select %45, %43, %47 : vector<16x128xi1>, vector<16x128xf32>
    %49 = arith.addf %48, %1 : vector<16x128xf32>
    %50 = arith.truncf %40 : vector<16x256xf32> to vector<16x256xbf16>
    %cst_32 = arith.constant dense<0.000000e+00> : vector<16x128xf32>
    %51 = tpu.matmul %50, %30, %cst_32 {dimension_numbers = #tpu.dot_dimension_numbers<[1], [0], [0], [1], [0, 0, 1, 1], [], []>} : vector<16x256xbf16>, vector<256x128xbf16>, vector<16x128xf32> -> vector<16x128xf32>
    %52 = vector.broadcast %31 : vector<1x128xf32> to vector<16x128xf32>
    %53 = arith.addf %51, %52 : vector<16x128xf32>
    %54 = arith.addf %53, %49 : vector<16x128xf32>
    %cst_33 = arith.constant 0.000000e+00 : f32
    %55 = vector.broadcast %cst_33 : f32 to vector<16x128xf32>
    %56 = arith.cmpf oge, %54, %55 : vector<16x128xf32>
    %cst_34 = arith.constant 0.00999999977 : f32
    %57 = vector.broadcast %cst_34 : f32 to vector<16x128xf32>
    %58 = arith.mulf %57, %54 : vector<16x128xf32>
    %59 = arith.select %56, %54, %58 : vector<16x128xi1>, vector<16x128xf32>
    %c0_35 = arith.constant 0 : index
    %c0_36 = arith.constant 0 : index
    %60 = vector.load %arg11[%c0_35, %c0_36] : memref<128x128xbf16, #tpu.memory_space<vmem>>, vector<128x128xbf16>
    %c0_37 = arith.constant 0 : index
    %c0_38 = arith.constant 0 : index
    %61 = vector.load %arg12[%c0_37, %c0_38] : memref<128x128xbf16, #tpu.memory_space<vmem>>, vector<128x128xbf16>
    %c0_39 = arith.constant 0 : index
    %c0_40 = arith.constant 0 : index
    %62 = vector.load %arg13[%c0_39, %c0_40] : memref<1x128xf32, #tpu.memory_space<vmem>>, vector<1x128xf32>
    %c0_41 = arith.constant 0 : index
    %c0_42 = arith.constant 0 : index
    %63 = vector.load %arg14[%c0_41, %c0_42] : memref<128x128xbf16, #tpu.memory_space<vmem>>, vector<128x128xbf16>
    %c0_43 = arith.constant 0 : index
    %c0_44 = arith.constant 0 : index
    %64 = vector.load %arg15[%c0_43, %c0_44] : memref<1x128xf32, #tpu.memory_space<vmem>>, vector<1x128xf32>
    %65 = arith.truncf %59 : vector<16x128xf32> to vector<16x128xbf16>
    %cst_45 = arith.constant dense<0.000000e+00> : vector<16x128xf32>
    %66 = tpu.matmul %65, %60, %cst_45 {dimension_numbers = #tpu.dot_dimension_numbers<[1], [0], [0], [1], [0, 0, 1, 1], [], []>} : vector<16x128xbf16>, vector<128x128xbf16>, vector<16x128xf32> -> vector<16x128xf32>
    %67 = arith.truncf %66 : vector<16x128xf32> to vector<16x128xbf16>
    %cst_46 = arith.constant dense<0.000000e+00> : vector<16x128xf32>
    %68 = tpu.matmul %0, %67, %cst_46 {dimension_numbers = #tpu.dot_dimension_numbers<[1], [0], [0], [1], [0, 0, 1, 1], [], []>} : vector<16x16xbf16>, vector<16x128xbf16>, vector<16x128xf32> -> vector<16x128xf32>
    %cst_47 = arith.constant 0.000000e+00 : f32
    %69 = vector.broadcast %cst_47 : f32 to vector<16x128xf32>
    %70 = arith.cmpf oge, %68, %69 : vector<16x128xf32>
    %cst_48 = arith.constant 0.00999999977 : f32
    %71 = vector.broadcast %cst_48 : f32 to vector<16x128xf32>
    %72 = arith.mulf %71, %68 : vector<16x128xf32>
    %73 = arith.select %70, %68, %72 : vector<16x128xi1>, vector<16x128xf32>
    %cst_49 = arith.constant dense<0.000000e+00> : vector<16x128xf32>
    %74 = tpu.matmul %65, %61, %cst_49 {dimension_numbers = #tpu.dot_dimension_numbers<[1], [0], [0], [1], [0, 0, 1, 1], [], []>} : vector<16x128xbf16>, vector<128x128xbf16>, vector<16x128xf32> -> vector<16x128xf32>
    %75 = vector.broadcast %62 : vector<1x128xf32> to vector<16x128xf32>
    %76 = arith.addf %74, %75 : vector<16x128xf32>
    %cst_50 = arith.constant 0.000000e+00 : f32
    %77 = vector.broadcast %cst_50 : f32 to vector<16x128xf32>
    %78 = arith.cmpf oge, %76, %77 : vector<16x128xf32>
    %cst_51 = arith.constant 0.00999999977 : f32
    %79 = vector.broadcast %cst_51 : f32 to vector<16x128xf32>
    %80 = arith.mulf %79, %76 : vector<16x128xf32>
    %81 = arith.select %78, %76, %80 : vector<16x128xi1>, vector<16x128xf32>
    %82 = arith.addf %81, %1 : vector<16x128xf32>
    %83 = arith.truncf %73 : vector<16x128xf32> to vector<16x128xbf16>
    %cst_52 = arith.constant dense<0.000000e+00> : vector<16x128xf32>
    %84 = tpu.matmul %83, %63, %cst_52 {dimension_numbers = #tpu.dot_dimension_numbers<[1], [0], [0], [1], [0, 0, 1, 1], [], []>} : vector<16x128xbf16>, vector<128x128xbf16>, vector<16x128xf32> -> vector<16x128xf32>
    %85 = vector.broadcast %64 : vector<1x128xf32> to vector<16x128xf32>
    %86 = arith.addf %84, %85 : vector<16x128xf32>
    %87 = arith.addf %86, %82 : vector<16x128xf32>
    %cst_53 = arith.constant 0.000000e+00 : f32
    %88 = vector.broadcast %cst_53 : f32 to vector<16x128xf32>
    %89 = arith.cmpf oge, %87, %88 : vector<16x128xf32>
    %cst_54 = arith.constant 0.00999999977 : f32
    %90 = vector.broadcast %cst_54 : f32 to vector<16x128xf32>
    %91 = arith.mulf %90, %87 : vector<16x128xf32>
    %92 = arith.select %89, %87, %91 : vector<16x128xi1>, vector<16x128xf32>
    %c0_55 = arith.constant 0 : index
    %c0_56 = arith.constant 0 : index
    %93 = vector.load %arg16[%c0_55, %c0_56] : memref<128x128xbf16, #tpu.memory_space<vmem>>, vector<128x128xbf16>
    %c0_57 = arith.constant 0 : index
    %c0_58 = arith.constant 0 : index
    %94 = vector.load %arg17[%c0_57, %c0_58] : memref<128x128xbf16, #tpu.memory_space<vmem>>, vector<128x128xbf16>
    %c0_59 = arith.constant 0 : index
    %c0_60 = arith.constant 0 : index
    %95 = vector.load %arg18[%c0_59, %c0_60] : memref<1x128xf32, #tpu.memory_space<vmem>>, vector<1x128xf32>
    %c0_61 = arith.constant 0 : index
    %c0_62 = arith.constant 0 : index
    %96 = vector.load %arg19[%c0_61, %c0_62] : memref<128x128xbf16, #tpu.memory_space<vmem>>, vector<128x128xbf16>
    %c0_63 = arith.constant 0 : index
    %c0_64 = arith.constant 0 : index
    %97 = vector.load %arg20[%c0_63, %c0_64] : memref<1x128xf32, #tpu.memory_space<vmem>>, vector<1x128xf32>
    %98 = arith.truncf %92 : vector<16x128xf32> to vector<16x128xbf16>
    %cst_65 = arith.constant dense<0.000000e+00> : vector<16x128xf32>
    %99 = tpu.matmul %98, %93, %cst_65 {dimension_numbers = #tpu.dot_dimension_numbers<[1], [0], [0], [1], [0, 0, 1, 1], [], []>} : vector<16x128xbf16>, vector<128x128xbf16>, vector<16x128xf32> -> vector<16x128xf32>
    %100 = arith.truncf %99 : vector<16x128xf32> to vector<16x128xbf16>
    %cst_66 = arith.constant dense<0.000000e+00> : vector<16x128xf32>
    %101 = tpu.matmul %0, %100, %cst_66 {dimension_numbers = #tpu.dot_dimension_numbers<[1], [0], [0], [1], [0, 0, 1, 1], [], []>} : vector<16x16xbf16>, vector<16x128xbf16>, vector<16x128xf32> -> vector<16x128xf32>
    %cst_67 = arith.constant 0.000000e+00 : f32
    %102 = vector.broadcast %cst_67 : f32 to vector<16x128xf32>
    %103 = arith.cmpf oge, %101, %102 : vector<16x128xf32>
    %cst_68 = arith.constant 0.00999999977 : f32
    %104 = vector.broadcast %cst_68 : f32 to vector<16x128xf32>
    %105 = arith.mulf %104, %101 : vector<16x128xf32>
    %106 = arith.select %103, %101, %105 : vector<16x128xi1>, vector<16x128xf32>
    %cst_69 = arith.constant dense<0.000000e+00> : vector<16x128xf32>
    %107 = tpu.matmul %98, %94, %cst_69 {dimension_numbers = #tpu.dot_dimension_numbers<[1], [0], [0], [1], [0, 0, 1, 1], [], []>} : vector<16x128xbf16>, vector<128x128xbf16>, vector<16x128xf32> -> vector<16x128xf32>
    %108 = vector.broadcast %95 : vector<1x128xf32> to vector<16x128xf32>
    %109 = arith.addf %107, %108 : vector<16x128xf32>
    %cst_70 = arith.constant 0.000000e+00 : f32
    %110 = vector.broadcast %cst_70 : f32 to vector<16x128xf32>
    %111 = arith.cmpf oge, %109, %110 : vector<16x128xf32>
    %cst_71 = arith.constant 0.00999999977 : f32
    %112 = vector.broadcast %cst_71 : f32 to vector<16x128xf32>
    %113 = arith.mulf %112, %109 : vector<16x128xf32>
    %114 = arith.select %111, %109, %113 : vector<16x128xi1>, vector<16x128xf32>
    %115 = arith.addf %114, %1 : vector<16x128xf32>
    %116 = arith.truncf %106 : vector<16x128xf32> to vector<16x128xbf16>
    %cst_72 = arith.constant dense<0.000000e+00> : vector<16x128xf32>
    %117 = tpu.matmul %116, %96, %cst_72 {dimension_numbers = #tpu.dot_dimension_numbers<[1], [0], [0], [1], [0, 0, 1, 1], [], []>} : vector<16x128xbf16>, vector<128x128xbf16>, vector<16x128xf32> -> vector<16x128xf32>
    %118 = vector.broadcast %97 : vector<1x128xf32> to vector<16x128xf32>
    %119 = arith.addf %117, %118 : vector<16x128xf32>
    %120 = arith.addf %119, %115 : vector<16x128xf32>
    %cst_73 = arith.constant 0.000000e+00 : f32
    %121 = vector.broadcast %cst_73 : f32 to vector<16x128xf32>
    %122 = arith.cmpf oge, %120, %121 : vector<16x128xf32>
    %cst_74 = arith.constant 0.00999999977 : f32
    %123 = vector.broadcast %cst_74 : f32 to vector<16x128xf32>
    %124 = arith.mulf %123, %120 : vector<16x128xf32>
    %125 = arith.select %122, %120, %124 : vector<16x128xi1>, vector<16x128xf32>
    %c0_75 = arith.constant 0 : index
    %c0_76 = arith.constant 0 : index
    %126 = vector.load %arg21[%c0_75, %c0_76] : memref<8x128xf32, #tpu.memory_space<vmem>>, vector<8x128xf32>
    %c0_77 = arith.constant 0 : index
    %c0_78 = arith.constant 0 : index
    %127 = vector.load %arg22[%c0_77, %c0_78] : memref<8x128xf32, #tpu.memory_space<vmem>>, vector<8x128xf32>
    %128 = arith.mulf %127, %127 : vector<8x128xf32>
    %cst_79 = arith.constant dense<0.000000e+00> : vector<8xf32>
    %129 = vector.multi_reduction <add>, %128, %cst_79 [1] : vector<8x128xf32> to vector<8xf32>
    %130 = vector.shape_cast %129 : vector<8xf32> to vector<8x1xf32>
    %cst_80 = arith.constant 1.000000e-24 : f32
    %131 = vector.broadcast %cst_80 : f32 to vector<8x1xf32>
    %132 = arith.maximumf %130, %131 : vector<8x1xf32>
    %133 = math.rsqrt %132 : vector<8x1xf32>
    %134 = vector.broadcast %133 : vector<8x1xf32> to vector<8x128xf32>
    %135 = arith.mulf %127, %134 : vector<8x128xf32>
    %136 = arith.mulf %126, %126 : vector<8x128xf32>
    %cst_81 = arith.constant dense<0.000000e+00> : vector<8xf32>
    %137 = vector.multi_reduction <add>, %136, %cst_81 [1] : vector<8x128xf32> to vector<8xf32>
    %138 = vector.shape_cast %137 : vector<8xf32> to vector<8x1xf32>
    %cst_82 = arith.constant 1.000000e-24 : f32
    %139 = vector.broadcast %cst_82 : f32 to vector<8x1xf32>
    %140 = arith.maximumf %138, %139 : vector<8x1xf32>
    %141 = math.rsqrt %140 : vector<8x1xf32>
    %142 = vector.broadcast %141 : vector<8x1xf32> to vector<8x128xf32>
    %143 = arith.mulf %126, %142 : vector<8x128xf32>
    %144 = tpu.concatenate %135, %143 in 0 : vector<8x128xf32>, vector<8x128xf32> -> vector<16x128xf32>
    %c0_83 = arith.constant 0 : index
    %c0_84 = arith.constant 0 : index
    %145 = vector.load %arg23[%c0_83, %c0_84] : memref<128x128xbf16, #tpu.memory_space<vmem>>, vector<128x128xbf16>
    %c0_85 = arith.constant 0 : index
    %c0_86 = arith.constant 0 : index
    %146 = vector.load %arg24[%c0_85, %c0_86] : memref<128x128xbf16, #tpu.memory_space<vmem>>, vector<128x128xbf16>
    %c0_87 = arith.constant 0 : index
    %c0_88 = arith.constant 0 : index
    %147 = vector.load %arg25[%c0_87, %c0_88] : memref<1x128xf32, #tpu.memory_space<vmem>>, vector<1x128xf32>
    %c0_89 = arith.constant 0 : index
    %c0_90 = arith.constant 0 : index
    %148 = vector.load %arg26[%c0_89, %c0_90] : memref<128x128xbf16, #tpu.memory_space<vmem>>, vector<128x128xbf16>
    %c0_91 = arith.constant 0 : index
    %c0_92 = arith.constant 0 : index
    %149 = vector.load %arg27[%c0_91, %c0_92] : memref<1x128xf32, #tpu.memory_space<vmem>>, vector<1x128xf32>
    %150 = arith.truncf %144 : vector<16x128xf32> to vector<16x128xbf16>
    %cst_93 = arith.constant dense<0.000000e+00> : vector<16x128xf32>
    %151 = tpu.matmul %150, %145, %cst_93 {dimension_numbers = #tpu.dot_dimension_numbers<[1], [0], [0], [1], [0, 0, 1, 1], [], []>} : vector<16x128xbf16>, vector<128x128xbf16>, vector<16x128xf32> -> vector<16x128xf32>
    %152 = arith.truncf %151 : vector<16x128xf32> to vector<16x128xbf16>
    %cst_94 = arith.constant dense<0.000000e+00> : vector<16x128xf32>
    %153 = tpu.matmul %0, %152, %cst_94 {dimension_numbers = #tpu.dot_dimension_numbers<[1], [0], [0], [1], [0, 0, 1, 1], [], []>} : vector<16x16xbf16>, vector<16x128xbf16>, vector<16x128xf32> -> vector<16x128xf32>
    %cst_95 = arith.constant 0.000000e+00 : f32
    %154 = vector.broadcast %cst_95 : f32 to vector<16x128xf32>
    %155 = arith.cmpf oge, %153, %154 : vector<16x128xf32>
    %cst_96 = arith.constant 0.00999999977 : f32
    %156 = vector.broadcast %cst_96 : f32 to vector<16x128xf32>
    %157 = arith.mulf %156, %153 : vector<16x128xf32>
    %158 = arith.select %155, %153, %157 : vector<16x128xi1>, vector<16x128xf32>
    %cst_97 = arith.constant dense<0.000000e+00> : vector<16x128xf32>
    %159 = tpu.matmul %150, %146, %cst_97 {dimension_numbers = #tpu.dot_dimension_numbers<[1], [0], [0], [1], [0, 0, 1, 1], [], []>} : vector<16x128xbf16>, vector<128x128xbf16>, vector<16x128xf32> -> vector<16x128xf32>
    %160 = vector.broadcast %147 : vector<1x128xf32> to vector<16x128xf32>
    %161 = arith.addf %159, %160 : vector<16x128xf32>
    %cst_98 = arith.constant 0.000000e+00 : f32
    %162 = vector.broadcast %cst_98 : f32 to vector<16x128xf32>
    %163 = arith.cmpf oge, %161, %162 : vector<16x128xf32>
    %cst_99 = arith.constant 0.00999999977 : f32
    %164 = vector.broadcast %cst_99 : f32 to vector<16x128xf32>
    %165 = arith.mulf %164, %161 : vector<16x128xf32>
    %166 = arith.select %163, %161, %165 : vector<16x128xi1>, vector<16x128xf32>
    %167 = arith.addf %166, %1 : vector<16x128xf32>
    %168 = arith.truncf %158 : vector<16x128xf32> to vector<16x128xbf16>
    %cst_100 = arith.constant dense<0.000000e+00> : vector<16x128xf32>
    %169 = tpu.matmul %168, %148, %cst_100 {dimension_numbers = #tpu.dot_dimension_numbers<[1], [0], [0], [1], [0, 0, 1, 1], [], []>} : vector<16x128xbf16>, vector<128x128xbf16>, vector<16x128xf32> -> vector<16x128xf32>
    %170 = vector.broadcast %149 : vector<1x128xf32> to vector<16x128xf32>
    %171 = arith.addf %169, %170 : vector<16x128xf32>
    %172 = arith.addf %171, %167 : vector<16x128xf32>
    %cst_101 = arith.constant 0.000000e+00 : f32
    %173 = vector.broadcast %cst_101 : f32 to vector<16x128xf32>
    %174 = arith.cmpf oge, %172, %173 : vector<16x128xf32>
    %cst_102 = arith.constant 0.00999999977 : f32
    %175 = vector.broadcast %cst_102 : f32 to vector<16x128xf32>
    %176 = arith.mulf %175, %172 : vector<16x128xf32>
    %177 = arith.select %174, %172, %176 : vector<16x128xi1>, vector<16x128xf32>
    %c0_103 = arith.constant 0 : index
    %c0_104 = arith.constant 0 : index
    %178 = vector.load %arg28[%c0_103, %c0_104] : memref<128x128xbf16, #tpu.memory_space<vmem>>, vector<128x128xbf16>
    %c0_105 = arith.constant 0 : index
    %c0_106 = arith.constant 0 : index
    %179 = vector.load %arg29[%c0_105, %c0_106] : memref<128x128xbf16, #tpu.memory_space<vmem>>, vector<128x128xbf16>
    %c0_107 = arith.constant 0 : index
    %c0_108 = arith.constant 0 : index
    %180 = vector.load %arg30[%c0_107, %c0_108] : memref<1x128xf32, #tpu.memory_space<vmem>>, vector<1x128xf32>
    %c0_109 = arith.constant 0 : index
    %c0_110 = arith.constant 0 : index
    %181 = vector.load %arg31[%c0_109, %c0_110] : memref<128x128xbf16, #tpu.memory_space<vmem>>, vector<128x128xbf16>
    %c0_111 = arith.constant 0 : index
    %c0_112 = arith.constant 0 : index
    %182 = vector.load %arg32[%c0_111, %c0_112] : memref<1x128xf32, #tpu.memory_space<vmem>>, vector<1x128xf32>
    %183 = arith.truncf %177 : vector<16x128xf32> to vector<16x128xbf16>
    %cst_113 = arith.constant dense<0.000000e+00> : vector<16x128xf32>
    %184 = tpu.matmul %183, %178, %cst_113 {dimension_numbers = #tpu.dot_dimension_numbers<[1], [0], [0], [1], [0, 0, 1, 1], [], []>} : vector<16x128xbf16>, vector<128x128xbf16>, vector<16x128xf32> -> vector<16x128xf32>
    %185 = arith.truncf %184 : vector<16x128xf32> to vector<16x128xbf16>
    %cst_114 = arith.constant dense<0.000000e+00> : vector<16x128xf32>
    %186 = tpu.matmul %0, %185, %cst_114 {dimension_numbers = #tpu.dot_dimension_numbers<[1], [0], [0], [1], [0, 0, 1, 1], [], []>} : vector<16x16xbf16>, vector<16x128xbf16>, vector<16x128xf32> -> vector<16x128xf32>
    %cst_115 = arith.constant 0.000000e+00 : f32
    %187 = vector.broadcast %cst_115 : f32 to vector<16x128xf32>
    %188 = arith.cmpf oge, %186, %187 : vector<16x128xf32>
    %cst_116 = arith.constant 0.00999999977 : f32
    %189 = vector.broadcast %cst_116 : f32 to vector<16x128xf32>
    %190 = arith.mulf %189, %186 : vector<16x128xf32>
    %191 = arith.select %188, %186, %190 : vector<16x128xi1>, vector<16x128xf32>
    %cst_117 = arith.constant dense<0.000000e+00> : vector<16x128xf32>
    %192 = tpu.matmul %183, %179, %cst_117 {dimension_numbers = #tpu.dot_dimension_numbers<[1], [0], [0], [1], [0, 0, 1, 1], [], []>} : vector<16x128xbf16>, vector<128x128xbf16>, vector<16x128xf32> -> vector<16x128xf32>
    %193 = vector.broadcast %180 : vector<1x128xf32> to vector<16x128xf32>
    %194 = arith.addf %192, %193 : vector<16x128xf32>
    %cst_118 = arith.constant 0.000000e+00 : f32
    %195 = vector.broadcast %cst_118 : f32 to vector<16x128xf32>
    %196 = arith.cmpf oge, %194, %195 : vector<16x128xf32>
    %cst_119 = arith.constant 0.00999999977 : f32
    %197 = vector.broadcast %cst_119 : f32 to vector<16x128xf32>
    %198 = arith.mulf %197, %194 : vector<16x128xf32>
    %199 = arith.select %196, %194, %198 : vector<16x128xi1>, vector<16x128xf32>
    %200 = arith.addf %199, %1 : vector<16x128xf32>
    %201 = arith.truncf %191 : vector<16x128xf32> to vector<16x128xbf16>
    %cst_120 = arith.constant dense<0.000000e+00> : vector<16x128xf32>
    %202 = tpu.matmul %201, %181, %cst_120 {dimension_numbers = #tpu.dot_dimension_numbers<[1], [0], [0], [1], [0, 0, 1, 1], [], []>} : vector<16x128xbf16>, vector<128x128xbf16>, vector<16x128xf32> -> vector<16x128xf32>
    %203 = vector.broadcast %182 : vector<1x128xf32> to vector<16x128xf32>
    %204 = arith.addf %202, %203 : vector<16x128xf32>
    %205 = arith.addf %204, %200 : vector<16x128xf32>
    %cst_121 = arith.constant 0.000000e+00 : f32
    %206 = vector.broadcast %cst_121 : f32 to vector<16x128xf32>
    %207 = arith.cmpf oge, %205, %206 : vector<16x128xf32>
    %cst_122 = arith.constant 0.00999999977 : f32
    %208 = vector.broadcast %cst_122 : f32 to vector<16x128xf32>
    %209 = arith.mulf %208, %205 : vector<16x128xf32>
    %210 = arith.select %207, %205, %209 : vector<16x128xi1>, vector<16x128xf32>
    %c0_123 = arith.constant 0 : index
    %c0_124 = arith.constant 0 : index
    %211 = vector.load %arg33[%c0_123, %c0_124] : memref<128x128xbf16, #tpu.memory_space<vmem>>, vector<128x128xbf16>
    %c0_125 = arith.constant 0 : index
    %c0_126 = arith.constant 0 : index
    %212 = vector.load %arg34[%c0_125, %c0_126] : memref<128x128xbf16, #tpu.memory_space<vmem>>, vector<128x128xbf16>
    %c0_127 = arith.constant 0 : index
    %c0_128 = arith.constant 0 : index
    %213 = vector.load %arg35[%c0_127, %c0_128] : memref<1x128xf32, #tpu.memory_space<vmem>>, vector<1x128xf32>
    %c0_129 = arith.constant 0 : index
    %c0_130 = arith.constant 0 : index
    %214 = vector.load %arg36[%c0_129, %c0_130] : memref<128x128xbf16, #tpu.memory_space<vmem>>, vector<128x128xbf16>
    %c0_131 = arith.constant 0 : index
    %c0_132 = arith.constant 0 : index
    %215 = vector.load %arg37[%c0_131, %c0_132] : memref<1x128xf32, #tpu.memory_space<vmem>>, vector<1x128xf32>
    %216 = arith.truncf %210 : vector<16x128xf32> to vector<16x128xbf16>
    %cst_133 = arith.constant dense<0.000000e+00> : vector<16x128xf32>
    %217 = tpu.matmul %216, %211, %cst_133 {dimension_numbers = #tpu.dot_dimension_numbers<[1], [0], [0], [1], [0, 0, 1, 1], [], []>} : vector<16x128xbf16>, vector<128x128xbf16>, vector<16x128xf32> -> vector<16x128xf32>
    %218 = arith.truncf %217 : vector<16x128xf32> to vector<16x128xbf16>
    %cst_134 = arith.constant dense<0.000000e+00> : vector<16x128xf32>
    %219 = tpu.matmul %0, %218, %cst_134 {dimension_numbers = #tpu.dot_dimension_numbers<[1], [0], [0], [1], [0, 0, 1, 1], [], []>} : vector<16x16xbf16>, vector<16x128xbf16>, vector<16x128xf32> -> vector<16x128xf32>
    %cst_135 = arith.constant 0.000000e+00 : f32
    %220 = vector.broadcast %cst_135 : f32 to vector<16x128xf32>
    %221 = arith.cmpf oge, %219, %220 : vector<16x128xf32>
    %cst_136 = arith.constant 0.00999999977 : f32
    %222 = vector.broadcast %cst_136 : f32 to vector<16x128xf32>
    %223 = arith.mulf %222, %219 : vector<16x128xf32>
    %224 = arith.select %221, %219, %223 : vector<16x128xi1>, vector<16x128xf32>
    %cst_137 = arith.constant dense<0.000000e+00> : vector<16x128xf32>
    %225 = tpu.matmul %216, %212, %cst_137 {dimension_numbers = #tpu.dot_dimension_numbers<[1], [0], [0], [1], [0, 0, 1, 1], [], []>} : vector<16x128xbf16>, vector<128x128xbf16>, vector<16x128xf32> -> vector<16x128xf32>
    %226 = vector.broadcast %213 : vector<1x128xf32> to vector<16x128xf32>
    %227 = arith.addf %225, %226 : vector<16x128xf32>
    %cst_138 = arith.constant 0.000000e+00 : f32
    %228 = vector.broadcast %cst_138 : f32 to vector<16x128xf32>
    %229 = arith.cmpf oge, %227, %228 : vector<16x128xf32>
    %cst_139 = arith.constant 0.00999999977 : f32
    %230 = vector.broadcast %cst_139 : f32 to vector<16x128xf32>
    %231 = arith.mulf %230, %227 : vector<16x128xf32>
    %232 = arith.select %229, %227, %231 : vector<16x128xi1>, vector<16x128xf32>
    %233 = arith.addf %232, %1 : vector<16x128xf32>
    %234 = arith.truncf %224 : vector<16x128xf32> to vector<16x128xbf16>
    %cst_140 = arith.constant dense<0.000000e+00> : vector<16x128xf32>
    %235 = tpu.matmul %234, %214, %cst_140 {dimension_numbers = #tpu.dot_dimension_numbers<[1], [0], [0], [1], [0, 0, 1, 1], [], []>} : vector<16x128xbf16>, vector<128x128xbf16>, vector<16x128xf32> -> vector<16x128xf32>
    %236 = vector.broadcast %215 : vector<1x128xf32> to vector<16x128xf32>
    %237 = arith.addf %235, %236 : vector<16x128xf32>
    %238 = arith.addf %237, %233 : vector<16x128xf32>
    %cst_141 = arith.constant 0.000000e+00 : f32
    %239 = vector.broadcast %cst_141 : f32 to vector<16x128xf32>
    %240 = arith.cmpf oge, %238, %239 : vector<16x128xf32>
    %cst_142 = arith.constant 0.00999999977 : f32
    %241 = vector.broadcast %cst_142 : f32 to vector<16x128xf32>
    %242 = arith.mulf %241, %238 : vector<16x128xf32>
    %243 = arith.select %240, %238, %242 : vector<16x128xi1>, vector<16x128xf32>
    %244 = arith.addf %125, %243 : vector<16x128xf32>
    %c0_143 = arith.constant 0 : index
    %c0_144 = arith.constant 0 : index
    %245 = vector.load %arg38[%c0_143, %c0_144] : memref<8x128xf32, #tpu.memory_space<vmem>>, vector<8x128xf32>
    %c0_145 = arith.constant 0 : index
    %c0_146 = arith.constant 0 : index
    %246 = vector.load %arg39[%c0_145, %c0_146] : memref<8x128xf32, #tpu.memory_space<vmem>>, vector<8x128xf32>
    %247 = arith.mulf %246, %246 : vector<8x128xf32>
    %cst_147 = arith.constant dense<0.000000e+00> : vector<8xf32>
    %248 = vector.multi_reduction <add>, %247, %cst_147 [1] : vector<8x128xf32> to vector<8xf32>
    %249 = vector.shape_cast %248 : vector<8xf32> to vector<8x1xf32>
    %cst_148 = arith.constant 1.000000e-24 : f32
    %250 = vector.broadcast %cst_148 : f32 to vector<8x1xf32>
    %251 = arith.maximumf %249, %250 : vector<8x1xf32>
    %252 = math.rsqrt %251 : vector<8x1xf32>
    %253 = vector.broadcast %252 : vector<8x1xf32> to vector<8x128xf32>
    %254 = arith.mulf %246, %253 : vector<8x128xf32>
    %255 = arith.mulf %245, %245 : vector<8x128xf32>
    %cst_149 = arith.constant dense<0.000000e+00> : vector<8xf32>
    %256 = vector.multi_reduction <add>, %255, %cst_149 [1] : vector<8x128xf32> to vector<8xf32>
    %257 = vector.shape_cast %256 : vector<8xf32> to vector<8x1xf32>
    %cst_150 = arith.constant 1.000000e-24 : f32
    %258 = vector.broadcast %cst_150 : f32 to vector<8x1xf32>
    %259 = arith.maximumf %257, %258 : vector<8x1xf32>
    %260 = math.rsqrt %259 : vector<8x1xf32>
    %261 = vector.broadcast %260 : vector<8x1xf32> to vector<8x128xf32>
    %262 = arith.mulf %245, %261 : vector<8x128xf32>
    %263 = tpu.concatenate %254, %262 in 0 : vector<8x128xf32>, vector<8x128xf32> -> vector<16x128xf32>
    %c0_151 = arith.constant 0 : index
    %c0_152 = arith.constant 0 : index
    %264 = vector.load %arg40[%c0_151, %c0_152] : memref<128x128xbf16, #tpu.memory_space<vmem>>, vector<128x128xbf16>
    %c0_153 = arith.constant 0 : index
    %c0_154 = arith.constant 0 : index
    %265 = vector.load %arg41[%c0_153, %c0_154] : memref<128x128xbf16, #tpu.memory_space<vmem>>, vector<128x128xbf16>
    %c0_155 = arith.constant 0 : index
    %c0_156 = arith.constant 0 : index
    %266 = vector.load %arg42[%c0_155, %c0_156] : memref<1x128xf32, #tpu.memory_space<vmem>>, vector<1x128xf32>
    %c0_157 = arith.constant 0 : index
    %c0_158 = arith.constant 0 : index
    %267 = vector.load %arg43[%c0_157, %c0_158] : memref<128x128xbf16, #tpu.memory_space<vmem>>, vector<128x128xbf16>
    %c0_159 = arith.constant 0 : index
    %c0_160 = arith.constant 0 : index
    %268 = vector.load %arg44[%c0_159, %c0_160] : memref<1x128xf32, #tpu.memory_space<vmem>>, vector<1x128xf32>
    %269 = arith.truncf %263 : vector<16x128xf32> to vector<16x128xbf16>
    %cst_161 = arith.constant dense<0.000000e+00> : vector<16x128xf32>
    %270 = tpu.matmul %269, %264, %cst_161 {dimension_numbers = #tpu.dot_dimension_numbers<[1], [0], [0], [1], [0, 0, 1, 1], [], []>} : vector<16x128xbf16>, vector<128x128xbf16>, vector<16x128xf32> -> vector<16x128xf32>
    %271 = arith.truncf %270 : vector<16x128xf32> to vector<16x128xbf16>
    %cst_162 = arith.constant dense<0.000000e+00> : vector<16x128xf32>
    %272 = tpu.matmul %0, %271, %cst_162 {dimension_numbers = #tpu.dot_dimension_numbers<[1], [0], [0], [1], [0, 0, 1, 1], [], []>} : vector<16x16xbf16>, vector<16x128xbf16>, vector<16x128xf32> -> vector<16x128xf32>
    %cst_163 = arith.constant 0.000000e+00 : f32
    %273 = vector.broadcast %cst_163 : f32 to vector<16x128xf32>
    %274 = arith.cmpf oge, %272, %273 : vector<16x128xf32>
    %cst_164 = arith.constant 0.00999999977 : f32
    %275 = vector.broadcast %cst_164 : f32 to vector<16x128xf32>
    %276 = arith.mulf %275, %272 : vector<16x128xf32>
    %277 = arith.select %274, %272, %276 : vector<16x128xi1>, vector<16x128xf32>
    %cst_165 = arith.constant dense<0.000000e+00> : vector<16x128xf32>
    %278 = tpu.matmul %269, %265, %cst_165 {dimension_numbers = #tpu.dot_dimension_numbers<[1], [0], [0], [1], [0, 0, 1, 1], [], []>} : vector<16x128xbf16>, vector<128x128xbf16>, vector<16x128xf32> -> vector<16x128xf32>
    %279 = vector.broadcast %266 : vector<1x128xf32> to vector<16x128xf32>
    %280 = arith.addf %278, %279 : vector<16x128xf32>
    %cst_166 = arith.constant 0.000000e+00 : f32
    %281 = vector.broadcast %cst_166 : f32 to vector<16x128xf32>
    %282 = arith.cmpf oge, %280, %281 : vector<16x128xf32>
    %cst_167 = arith.constant 0.00999999977 : f32
    %283 = vector.broadcast %cst_167 : f32 to vector<16x128xf32>
    %284 = arith.mulf %283, %280 : vector<16x128xf32>
    %285 = arith.select %282, %280, %284 : vector<16x128xi1>, vector<16x128xf32>
    %286 = arith.addf %285, %1 : vector<16x128xf32>
    %287 = arith.truncf %277 : vector<16x128xf32> to vector<16x128xbf16>
    %cst_168 = arith.constant dense<0.000000e+00> : vector<16x128xf32>
    %288 = tpu.matmul %287, %267, %cst_168 {dimension_numbers = #tpu.dot_dimension_numbers<[1], [0], [0], [1], [0, 0, 1, 1], [], []>} : vector<16x128xbf16>, vector<128x128xbf16>, vector<16x128xf32> -> vector<16x128xf32>
    %289 = vector.broadcast %268 : vector<1x128xf32> to vector<16x128xf32>
    %290 = arith.addf %288, %289 : vector<16x128xf32>
    %291 = arith.addf %290, %286 : vector<16x128xf32>
    %cst_169 = arith.constant 0.000000e+00 : f32
    %292 = vector.broadcast %cst_169 : f32 to vector<16x128xf32>
    %293 = arith.cmpf oge, %291, %292 : vector<16x128xf32>
    %cst_170 = arith.constant 0.00999999977 : f32
    %294 = vector.broadcast %cst_170 : f32 to vector<16x128xf32>
    %295 = arith.mulf %294, %291 : vector<16x128xf32>
    %296 = arith.select %293, %291, %295 : vector<16x128xi1>, vector<16x128xf32>
    %c0_171 = arith.constant 0 : index
    %c0_172 = arith.constant 0 : index
    %297 = vector.load %arg45[%c0_171, %c0_172] : memref<128x128xbf16, #tpu.memory_space<vmem>>, vector<128x128xbf16>
    %c0_173 = arith.constant 0 : index
    %c0_174 = arith.constant 0 : index
    %298 = vector.load %arg46[%c0_173, %c0_174] : memref<128x128xbf16, #tpu.memory_space<vmem>>, vector<128x128xbf16>
    %c0_175 = arith.constant 0 : index
    %c0_176 = arith.constant 0 : index
    %299 = vector.load %arg47[%c0_175, %c0_176] : memref<1x128xf32, #tpu.memory_space<vmem>>, vector<1x128xf32>
    %c0_177 = arith.constant 0 : index
    %c0_178 = arith.constant 0 : index
    %300 = vector.load %arg48[%c0_177, %c0_178] : memref<128x128xbf16, #tpu.memory_space<vmem>>, vector<128x128xbf16>
    %c0_179 = arith.constant 0 : index
    %c0_180 = arith.constant 0 : index
    %301 = vector.load %arg49[%c0_179, %c0_180] : memref<1x128xf32, #tpu.memory_space<vmem>>, vector<1x128xf32>
    %302 = arith.truncf %296 : vector<16x128xf32> to vector<16x128xbf16>
    %cst_181 = arith.constant dense<0.000000e+00> : vector<16x128xf32>
    %303 = tpu.matmul %302, %297, %cst_181 {dimension_numbers = #tpu.dot_dimension_numbers<[1], [0], [0], [1], [0, 0, 1, 1], [], []>} : vector<16x128xbf16>, vector<128x128xbf16>, vector<16x128xf32> -> vector<16x128xf32>
    %304 = arith.truncf %303 : vector<16x128xf32> to vector<16x128xbf16>
    %cst_182 = arith.constant dense<0.000000e+00> : vector<16x128xf32>
    %305 = tpu.matmul %0, %304, %cst_182 {dimension_numbers = #tpu.dot_dimension_numbers<[1], [0], [0], [1], [0, 0, 1, 1], [], []>} : vector<16x16xbf16>, vector<16x128xbf16>, vector<16x128xf32> -> vector<16x128xf32>
    %cst_183 = arith.constant 0.000000e+00 : f32
    %306 = vector.broadcast %cst_183 : f32 to vector<16x128xf32>
    %307 = arith.cmpf oge, %305, %306 : vector<16x128xf32>
    %cst_184 = arith.constant 0.00999999977 : f32
    %308 = vector.broadcast %cst_184 : f32 to vector<16x128xf32>
    %309 = arith.mulf %308, %305 : vector<16x128xf32>
    %310 = arith.select %307, %305, %309 : vector<16x128xi1>, vector<16x128xf32>
    %cst_185 = arith.constant dense<0.000000e+00> : vector<16x128xf32>
    %311 = tpu.matmul %302, %298, %cst_185 {dimension_numbers = #tpu.dot_dimension_numbers<[1], [0], [0], [1], [0, 0, 1, 1], [], []>} : vector<16x128xbf16>, vector<128x128xbf16>, vector<16x128xf32> -> vector<16x128xf32>
    %312 = vector.broadcast %299 : vector<1x128xf32> to vector<16x128xf32>
    %313 = arith.addf %311, %312 : vector<16x128xf32>
    %cst_186 = arith.constant 0.000000e+00 : f32
    %314 = vector.broadcast %cst_186 : f32 to vector<16x128xf32>
    %315 = arith.cmpf oge, %313, %314 : vector<16x128xf32>
    %cst_187 = arith.constant 0.00999999977 : f32
    %316 = vector.broadcast %cst_187 : f32 to vector<16x128xf32>
    %317 = arith.mulf %316, %313 : vector<16x128xf32>
    %318 = arith.select %315, %313, %317 : vector<16x128xi1>, vector<16x128xf32>
    %319 = arith.addf %318, %1 : vector<16x128xf32>
    %320 = arith.truncf %310 : vector<16x128xf32> to vector<16x128xbf16>
    %cst_188 = arith.constant dense<0.000000e+00> : vector<16x128xf32>
    %321 = tpu.matmul %320, %300, %cst_188 {dimension_numbers = #tpu.dot_dimension_numbers<[1], [0], [0], [1], [0, 0, 1, 1], [], []>} : vector<16x128xbf16>, vector<128x128xbf16>, vector<16x128xf32> -> vector<16x128xf32>
    %322 = vector.broadcast %301 : vector<1x128xf32> to vector<16x128xf32>
    %323 = arith.addf %321, %322 : vector<16x128xf32>
    %324 = arith.addf %323, %319 : vector<16x128xf32>
    %cst_189 = arith.constant 0.000000e+00 : f32
    %325 = vector.broadcast %cst_189 : f32 to vector<16x128xf32>
    %326 = arith.cmpf oge, %324, %325 : vector<16x128xf32>
    %cst_190 = arith.constant 0.00999999977 : f32
    %327 = vector.broadcast %cst_190 : f32 to vector<16x128xf32>
    %328 = arith.mulf %327, %324 : vector<16x128xf32>
    %329 = arith.select %326, %324, %328 : vector<16x128xi1>, vector<16x128xf32>
    %c0_191 = arith.constant 0 : index
    %c0_192 = arith.constant 0 : index
    %330 = vector.load %arg50[%c0_191, %c0_192] : memref<128x128xbf16, #tpu.memory_space<vmem>>, vector<128x128xbf16>
    %c0_193 = arith.constant 0 : index
    %c0_194 = arith.constant 0 : index
    %331 = vector.load %arg51[%c0_193, %c0_194] : memref<128x128xbf16, #tpu.memory_space<vmem>>, vector<128x128xbf16>
    %c0_195 = arith.constant 0 : index
    %c0_196 = arith.constant 0 : index
    %332 = vector.load %arg52[%c0_195, %c0_196] : memref<1x128xf32, #tpu.memory_space<vmem>>, vector<1x128xf32>
    %c0_197 = arith.constant 0 : index
    %c0_198 = arith.constant 0 : index
    %333 = vector.load %arg53[%c0_197, %c0_198] : memref<128x128xbf16, #tpu.memory_space<vmem>>, vector<128x128xbf16>
    %c0_199 = arith.constant 0 : index
    %c0_200 = arith.constant 0 : index
    %334 = vector.load %arg54[%c0_199, %c0_200] : memref<1x128xf32, #tpu.memory_space<vmem>>, vector<1x128xf32>
    %335 = arith.truncf %329 : vector<16x128xf32> to vector<16x128xbf16>
    %cst_201 = arith.constant dense<0.000000e+00> : vector<16x128xf32>
    %336 = tpu.matmul %335, %330, %cst_201 {dimension_numbers = #tpu.dot_dimension_numbers<[1], [0], [0], [1], [0, 0, 1, 1], [], []>} : vector<16x128xbf16>, vector<128x128xbf16>, vector<16x128xf32> -> vector<16x128xf32>
    %337 = arith.truncf %336 : vector<16x128xf32> to vector<16x128xbf16>
    %cst_202 = arith.constant dense<0.000000e+00> : vector<16x128xf32>
    %338 = tpu.matmul %0, %337, %cst_202 {dimension_numbers = #tpu.dot_dimension_numbers<[1], [0], [0], [1], [0, 0, 1, 1], [], []>} : vector<16x16xbf16>, vector<16x128xbf16>, vector<16x128xf32> -> vector<16x128xf32>
    %cst_203 = arith.constant 0.000000e+00 : f32
    %339 = vector.broadcast %cst_203 : f32 to vector<16x128xf32>
    %340 = arith.cmpf oge, %338, %339 : vector<16x128xf32>
    %cst_204 = arith.constant 0.00999999977 : f32
    %341 = vector.broadcast %cst_204 : f32 to vector<16x128xf32>
    %342 = arith.mulf %341, %338 : vector<16x128xf32>
    %343 = arith.select %340, %338, %342 : vector<16x128xi1>, vector<16x128xf32>
    %cst_205 = arith.constant dense<0.000000e+00> : vector<16x128xf32>
    %344 = tpu.matmul %335, %331, %cst_205 {dimension_numbers = #tpu.dot_dimension_numbers<[1], [0], [0], [1], [0, 0, 1, 1], [], []>} : vector<16x128xbf16>, vector<128x128xbf16>, vector<16x128xf32> -> vector<16x128xf32>
    %345 = vector.broadcast %332 : vector<1x128xf32> to vector<16x128xf32>
    %346 = arith.addf %344, %345 : vector<16x128xf32>
    %cst_206 = arith.constant 0.000000e+00 : f32
    %347 = vector.broadcast %cst_206 : f32 to vector<16x128xf32>
    %348 = arith.cmpf oge, %346, %347 : vector<16x128xf32>
    %cst_207 = arith.constant 0.00999999977 : f32
    %349 = vector.broadcast %cst_207 : f32 to vector<16x128xf32>
    %350 = arith.mulf %349, %346 : vector<16x128xf32>
    %351 = arith.select %348, %346, %350 : vector<16x128xi1>, vector<16x128xf32>
    %352 = arith.addf %351, %1 : vector<16x128xf32>
    %353 = arith.truncf %343 : vector<16x128xf32> to vector<16x128xbf16>
    %cst_208 = arith.constant dense<0.000000e+00> : vector<16x128xf32>
    %354 = tpu.matmul %353, %333, %cst_208 {dimension_numbers = #tpu.dot_dimension_numbers<[1], [0], [0], [1], [0, 0, 1, 1], [], []>} : vector<16x128xbf16>, vector<128x128xbf16>, vector<16x128xf32> -> vector<16x128xf32>
    %355 = vector.broadcast %334 : vector<1x128xf32> to vector<16x128xf32>
    %356 = arith.addf %354, %355 : vector<16x128xf32>
    %357 = arith.addf %356, %352 : vector<16x128xf32>
    %cst_209 = arith.constant 0.000000e+00 : f32
    %358 = vector.broadcast %cst_209 : f32 to vector<16x128xf32>
    %359 = arith.cmpf oge, %357, %358 : vector<16x128xf32>
    %cst_210 = arith.constant 0.00999999977 : f32
    %360 = vector.broadcast %cst_210 : f32 to vector<16x128xf32>
    %361 = arith.mulf %360, %357 : vector<16x128xf32>
    %362 = arith.select %359, %357, %361 : vector<16x128xi1>, vector<16x128xf32>
    %363 = arith.addf %244, %362 : vector<16x128xf32>
    %cst_211 = arith.constant 0.333333343 : f32
    %364 = vector.broadcast %cst_211 : f32 to vector<16x128xf32>
    %365 = arith.mulf %363, %364 : vector<16x128xf32>
    %c0_212 = arith.constant 0 : index
    %c0_213 = arith.constant 0 : index
    %366 = vector.load %arg55[%c0_212, %c0_213] : memref<16x128xf32, #tpu.memory_space<vmem>>, vector<16x128xf32>
    tpu.vector_store %arg55[%c0_212, %c0_213], %365 {strides = array<i32>} : memref<16x128xf32, #tpu.memory_space<vmem>>, vector<16x128xf32>,
    return
  }
}

</mosaic_0001>

<bundles_post_ra>
// kernel: net_forward.1
= control target key start
LH: loop header
LB: loop body
LE: loop exit
PB: predicated region body
PF: predicated region fallthrough
CT: control target
= control target key end

     0   :  { %s7559_s6 = smov 1   ;;  %s7560_s10 = smov 2   ;;  %s8705_s0 = inlined_call_operand.smem [shape: u32[56], index: -1, kind: input, shape index: {}] }
   0x1   :  { %s7676_s5 = sld [smem:[%s8705_s0]]   ;;  %s7561_s14 = smov 3  }
   0x2   :  { %s7681_s9 = sld [smem:[%s8705_s0 + %s7559_s6]]   ;;  %s7562_s18 = smov 4  }
   0x3   :  { %s7686_s13 = sld [smem:[%s8705_s0 + %s7560_s10]]   ;;  %s7563_s22 = smov 5  }
   0x4   :  { %s7691_s17 = sld [smem:[%s8705_s0 + %s7561_s14]]   ;;  %s7564_s26 = smov 6  }
   0x5   :  { %s7696_s21 = sld [smem:[%s8705_s0 + %s7562_s18]]   ;;  %s7565_s30 = smov 7  }
   0x6   :  { %s7701_s25 = sld [smem:[%s8705_s0 + %s7563_s22]]   ;;  %s7566_s4 = smov 8  }
   0x7   :  { %8739 = sst [smem:[#allocation99_spill]] %s7676_s5  ;;  %s7567_s10 = smov 9  }
   0x8   :  { %8740 = sst [smem:[#allocation100_spill]] %s7681_s9  ;;  %s7568_s15 = smov 10  }
   0x9   :  { %8741 = sst [smem:[#allocation101_spill]] %s7686_s13  ;;  %s7569_s20 = smov 11  }
   0xa   :  { %8742 = sst [smem:[#allocation102_spill]] %s7691_s17  ;;  %s7571_s1 = smov 13  }
   0xb   :  { %s7706_s29 = sld [smem:[%s8705_s0 + %s7564_s26]]   ;;  %s7570_s26 = smov 12  }
   0xc   :  { %8743 = sst [smem:[#allocation103_spill]] %s7701_s25  ;;  %s7572_s7 = smov 14  }
   0xd   :  { %s7711_s3 = sld [smem:[%s8705_s0 + %s7565_s30]]   ;;  %s7574_s22 = smov 16  }
   0xe   :  { %s7716_s8 = sld [smem:[%s8705_s0 + %s7566_s4]]   ;;  %s7575_s28 = smov 17  }
   0xf   :  { %s7721_s14 = sld [smem:[%s8705_s0 + %s7567_s10]]  }
  0x10   :  { %s7726_s19 = sld [smem:[%s8705_s0 + %s7568_s15]]   ;;  %s7573_s15 = smov 15  }
  0x11   :  { %s7731_s24 = sld [smem:[%s8705_s0 + %s7569_s20]]  }
  0x12   :  { %s7736_s30 = sld [smem:[%s8705_s0 + %s7570_s26]]  }
  0x13   :  { %8744 = sst [smem:[#allocation104_spill]] %s7711_s3 }
  0x14   :  { %s7741_s6 = sld [smem:[%s8705_s0 + %s7571_s1]]  }
  0x15   :  { %8745 = sst [smem:[#allocation105_spill]] %s7721_s14 }
  0x16   :  { %s7746_s12 = sld [smem:[%s8705_s0 + %s7572_s7]]   ;;  %s7576_s7 = smov 18  }
  0x17   :  { %8746 = sst [smem:[#allocation106_spill]] %s7731_s24 }
  0x18   :  { %s7751_s20 = sld [smem:[%s8705_s0 + %s7573_s15]]   ;;  %s7577_s15 = smov 19  }
  0x19   :  { %s7756_s27 = sld [smem:[%s8705_s0 + %s7574_s22]]   ;;  %s7578_s22 = smov 20  }
  0x1a   :  { %8747 = sst [smem:[#allocation107_spill]] %s7741_s6 }
  0x1b   :  { %s7761_s4 = sld [smem:[%s8705_s0 + %s7575_s28]]   ;;  %s7579_s28 = smov 21  }
  0x1c   :  { %s7766_s9 = sld [smem:[%s8705_s0 + %s7576_s7]]   ;;  %s7580_s7 = smov 22  }
  0x1d   :  { %s7771_s5 = sld [smem:[%s8705_s0 + %s7577_s15]]   ;;  %s7581_s15 = smov 23  }
  0x1e   :  { %8748 = sst [smem:[#allocation108_spill]] %s7751_s20 }
  0x1f   :  { %s7776_s13 = sld [smem:[%s8705_s0 + %s7578_s22]]   ;;  %s7582_s22 = smov 24  }
  0x20   :  { %s7786_s20 = sld [smem:[%s8705_s0 + %s7580_s7]]   ;;  %s7584_s7 = smov 26  }
  0x21   :  { %8749 = sst [smem:[#allocation109_spill]] %s7761_s4 }
  0x22   :  { %s7781_s4 = sld [smem:[%s8705_s0 + %s7579_s28]]   ;;  %s7583_s28 = smov 25  }
  0x23   :  { %8750 = sst [smem:[#allocation110_spill]] %s7771_s5 }
  0x24   :  { %s7791_s5 = sld [smem:[%s8705_s0 + %s7581_s15]]   ;;  %s7585_s15 = smov 27  }
  0x25   :  { %s7796_s6 = sld [smem:[%s8705_s0 + %s7582_s22]]   ;;  %s7586_s22 = smov 28  }
  0x26   :  { %8752 = sst [smem:[#allocation112_spill]] %s7786_s20 }
  0x27   :  { %s7806_s20 = sld [smem:[%s8705_s0 + %s7584_s7]]   ;;  %s7588_s7 = smov 30  }
  0x28   :  { %8751 = sst [smem:[#allocation111_spill]] %s7781_s4 }
  0x29   :  { %s7801_s4 = sld [smem:[%s8705_s0 + %s7583_s28]]   ;;  %s7587_s28 = smov 29  }
  0x2a   :  { %8753 = sst [smem:[#allocation113_spill]] %s7791_s5 }
  0x2b   :  { %s7811_s5 = sld [smem:[%s8705_s0 + %s7585_s15]]   ;;  %s7589_s15 = smov 31  }
  0x2c   :  { %s7816_s24 = sld [smem:[%s8705_s0 + %s7586_s22]]   ;;  %s7590_s22 = smov 32  }
  0x2d   :  { %s7826_s14 = sld [smem:[%s8705_s0 + %s7588_s7]]   ;;  %s7592_s7 = smov 34  }
  0x2e   :  { %s7836_s3 = sld [smem:[%s8705_s0 + %s7590_s22]]   ;;  %s7594_s22 = smov 36  }
  0x2f   :  { %8754 = sst [smem:[#allocation114_spill]] %s7801_s4 }
  0x30   :  { %s7821_s4 = sld [smem:[%s8705_s0 + %s7587_s28]]   ;;  %s7591_s28 = smov 33  }
  0x31   :  { %8755 = sst [smem:[#allocation115_spill]] %s7811_s5 }
  0x32   :  { %s7831_s5 = sld [smem:[%s8705_s0 + %s7589_s15]]   ;;  %s7593_s15 = smov 35  }
  0x33   :  { %s7846_s25 = sld [smem:[%s8705_s0 + %s7592_s7]]   ;;  %s7596_s7 = smov 38  }
  0x34   :  { %s7856_s17 = sld [smem:[%s8705_s0 + %s7594_s22]]   ;;  %s7598_s22 = smov 40  }
  0x36   :  { %8756 = sst [smem:[#allocation116_spill]] %s7821_s4 }
  0x37   :  { %s7841_s4 = sld [smem:[%s8705_s0 + %s7591_s28]]   ;;  %s7595_s28 = smov 37  }
  0x38   :  { %8757 = sst [smem:[#allocation117_spill]] %s7831_s5 }
  0x39   :  { %8759 = sst [smem:[#allocation119_spill]] %s7846_s25 }
  0x3a   :  { %s7851_s5 = sld [smem:[%s8705_s0 + %s7593_s15]]   ;;  %s7597_s15 = smov 39  }
  0x3b   :  { %8761 = sst [smem:[#allocation121_spill]] %s7856_s17 }
  0x3c   :  { %s7866_s25 = sld [smem:[%s8705_s0 + %s7596_s7]]   ;;  %s7600_s7 = smov 42  }
  0x3d   :  { %8758 = sst [smem:[#allocation118_spill]] %s7841_s4 }
  0x3e   :  { %s7861_s4 = sld [smem:[%s8705_s0 + %s7595_s28]]   ;;  %s7599_s28 = smov 41  }
  0x3f   :  { %s7876_s17 = sld [smem:[%s8705_s0 + %s7598_s22]]   ;;  %s7602_s22 = smov 44  }
  0x40   :  { %8760 = sst [smem:[#allocation120_spill]] %s7851_s5 }
  0x41   :  { %s7871_s5 = sld [smem:[%s8705_s0 + %s7597_s15]]   ;;  %s7601_s15 = smov 43  }
  0x42   :  { %8763 = sst [smem:[#allocation123_spill]] %s7866_s25 }
  0x43   :  { %s7886_s25 = sld [smem:[%s8705_s0 + %s7600_s7]]   ;;  %s7604_s7 = smov 46  }
  0x44   :  { %8762 = sst [smem:[#allocation122_spill]] %s7861_s4 }
  0x45   :  { %8765 = sst [smem:[#allocation125_spill]] %s7876_s17 }
  0x46   :  { %s7881_s4 = sld [smem:[%s8705_s0 + %s7599_s28]]   ;;  %s7603_s28 = smov 45  }
  0x47   :  { %8764 = sst [smem:[#allocation124_spill]] %s7871_s5 }
  0x48   :  { %s7891_s5 = sld [smem:[%s8705_s0 + %s7601_s15]]   ;;  %s7605_s15 = smov 47  }
  0x49   :  { %8767 = sst [smem:[#allocation127_spill]] %s7886_s25 }
  0x4a   :  { %s7896_s17 = sld [smem:[%s8705_s0 + %s7602_s22]]   ;;  %s7606_s22 = smov 48  }
  0x4b   :  { %s7906_s25 = sld [smem:[%s8705_s0 + %s7604_s7]]   ;;  %s7608_s7 = smov 50  }
  0x4c   :  { %8766 = sst [smem:[#allocation126_spill]] %s7881_s4 }
  0x4d   :  { %s7901_s4 = sld [smem:[%s8705_s0 + %s7603_s28]]   ;;  %s7607_s28 = smov 49  }
  0x4e   :  { %8768 = sst [smem:[#allocation128_spill]] %s7891_s5 }
  0x4f   :  { %s7911_s5 = sld [smem:[%s8705_s0 + %s7605_s15]]   ;;  %s7609_s15 = smov 51  }
  0x50   :  { %8769 = sst [smem:[#allocation129_spill]] %s7896_s17 }
  0x51   :  { %8771 = sst [smem:[#allocation131_spill]] %s7906_s25 }
  0x52   :  { %s7916_s17 = sld [smem:[%s8705_s0 + %s7606_s22]]   ;;  %s7610_s22 = smov 52  }
  0x53   :  { %8770 = sst [smem:[#allocation130_spill]] %s7901_s4 }
  0x54   :  { %s7921_s4 = sld [smem:[%s8705_s0 + %s7607_s28]]   ;;  %s7611_s28 = smov 53  }
  0x55   :  { %8772 = sst [smem:[#allocation132_spill]] %s7911_s5 }
  0x56   :  { %s7926_s25 = sld [smem:[%s8705_s0 + %s7608_s7]]   ;;  %s7612_s7 = smov 54  }
  0x57   :  { %s7931_s5 = sld [smem:[%s8705_s0 + %s7609_s15]]   ;;  %s7613_s15 = smov 55  }
  0x58   :  { %8773 = sst [smem:[#allocation133_spill]] %s7916_s17 }
  0x59   :  { %s7936_s17 = sld [smem:[%s8705_s0 + %s7610_s22]]  }
  0x5a   :  { %8774 = sst [smem:[#allocation134_spill]] %s7921_s4 }
  0x5b   :  { %s7941_s4 = sld [smem:[%s8705_s0 + %s7611_s28]]  }
  0x5c   :  { %8775 = sst [smem:[#allocation135_spill]] %s7926_s25 }
  0x5d   :  { %8776 = sst [smem:[#allocation136_spill]] %s7931_s5 }
  0x5e   :  { %s7946_s25 = sld [smem:[%s8705_s0 + %s7612_s7]]  }
  0x5f   :  { %s7951_s5 = sld [smem:[%s8705_s0 + %s7613_s15]]  }
  0x60   :  { %116 = vsyncpa [#allocation3], 0 }
  0x61   :  { %117 = vsyncpa [#allocation6], 0 }
  0x62   :  { %118 = vsyncpa [#allocation9], 0 }
  0x63   :  { %119 = vsyncpa [#allocation12], 0 }
  0x64   :  { %120 = vsyncpa [#allocation15], 0 }
  0x65   :  { %121 = vsyncpa [#allocation18], 0 }
  0x66   :  { %122 = vsyncpa [#allocation21], 0 }
  0x67   :  { %123 = vsyncpa [#allocation24], 0 }
  0x68   :  { %124 = vsyncpa [#allocation27], 0 }
  0x69   :  { %125 = vsyncpa [#allocation30], 0 }
  0x6a   :  { %126 = vsyncpa [#allocation33], 0 }
  0x6b   :  { %127 = vsyncpa [#allocation36], 0 }
  0x6c   :  { %128 = vsyncpa [#allocation39], 0 }
  0x6d   :  { %129 = vsyncpa [#allocation42], 0 }
  0x6e   :  { %130 = vsyncpa [#allocation45], 0 }
  0x6f   :  { %131 = vsyncpa [#allocation48], 0 }
  0x70   :  { %132 = vsyncpa [#allocation51], 0 }
  0x71   :  { %133 = vsyncpa [#allocation54], 0 }
  0x72   :  { %134 = vsyncpa [#allocation57], 0 }
  0x73   :  { %135 = vsyncpa [#allocation60], 0 }
  0x74   :  { %136 = vsyncpa [#allocation63], 0 }
  0x75   :  { %137 = vsyncpa [#allocation66], 0 }
  0x76   :  { %138 = vsyncpa [#allocation69], 0 }
  0x77   :  { %139 = vsyncpa [#allocation72], 0 }
  0x78   :  { %140 = vsyncpa [#allocation4], 0  ;;  %s7614_s0 = smov [#allocation5]   ;;  %s6475_s23 = scalar_lea.hbm %s7696_s21, 2048 }
  0x79   :  { %s162_s22 = sshll.u32 %s7614_s0, 4  ;;  %p6476_p0 = scmp.ne.s32.totalorder %s7696_s21, %s6475_s23  ;;  %s163_s22 = int_to_ptr.vmem [resolvable:$true] %s162_s22 }
  0x7a   :  { %p6479_p1 = scmp.lt.u32.totalorder %s6475_s23, %s7696_s21 }
  0x7c   :  { %p6481_p2 = pnand %p6479_p1, %p6476_p0 }
  0x7e   :  { %6484 = shalt.err (!%p6481_p2)
}
  0x7f   :  { %s6485_s26 = scalar_lea.vmem %s163_s22, 2048  ;;  %p6490_p4 = scmp.lt.s32.totalorder %s163_s22, %s163_s22 }
  0x80   :  { %p6486_p3 = scmp.ne.s32.totalorder %s163_s22, %s6485_s26  ;;  %p6491_p5 = scmp.lt.s32.totalorder %s6485_s26, %s6485_s26 }
  0x82   :  { %p6492_p6 = por %p6491_p5, %p6490_p4 }
  0x84   :  { %p6493_p7 = pnand %p6492_p6, %p6486_p3 }
  0x86   :  { %6496 = shalt.err (!%p6493_p7)
}
  0x87   :  { %s7615_s28 = smov 128   ;;  %s7616_s1 = smov 8  }
  0x88   :  { %168 = dma.hbm_to_vmem [thread:$0]  %s7696_s21, 2048, %s163_s22, [#allocation6], %s7615_s28, %s7615_s28, %s7616_s1  }
  0x89   :  { %s7617_s2 = smov [#allocation8]   ;;  %s7618_s10 = smov [#allocation11]  }
  0x8a   :  { %s184_s7 = sshll.u32 %s7617_s2, 4  ;;  %s209_s11 = sshll.u32 %s7618_s10, 4  ;;  %s185_s7 = int_to_ptr.vmem [resolvable:$true] %s184_s7  ;;  %s210_s11 = int_to_ptr.vmem [resolvable:$true] %s209_s11 }
  0x8b   :  { %s6497_s15 = scalar_lea.hbm %s7706_s29, 4096 }
  0x8c   :  { %p6498_p8 = scmp.ne.s32.totalorder %s7706_s29, %s6497_s15  ;;  %p6501_p9 = scmp.lt.u32.totalorder %s6497_s15, %s7706_s29 }
  0x8e   :  { %p6503_p10 = pnand %p6501_p9, %p6498_p8 }
  0x90   :  { %6506 = shalt.err (!%p6503_p10)
}
  0x91   :  { %s6507_s16 = scalar_lea.vmem %s185_s7, 4096  ;;  %p6512_p12 = scmp.lt.s32.totalorder %s185_s7, %s185_s7 }
  0x92   :  { %p6508_p11 = scmp.ne.s32.totalorder %s185_s7, %s6507_s16  ;;  %p6513_p13 = scmp.lt.s32.totalorder %s6507_s16, %s6507_s16 }
  0x94   :  { %p6514_p0 = por %p6513_p13, %p6512_p12 }
  0x96   :  { %p6515_p1 = pnand %p6514_p0, %p6508_p11 }
  0x98   :  { %6518 = shalt.err (!%p6515_p1)
}
  0x99   :  { %190 = dma.hbm_to_vmem [thread:$0]  %s7706_s29, 4096, %s185_s7, [#allocation9], %s7615_s28, %s7615_s28, %s7616_s1  }
  0x9a   :  { %s6519_s21 = scalar_lea.hbm %s7716_s8, 16 }
  0x9b   :  { %p6520_p2 = scmp.ne.s32.totalorder %s7716_s8, %s6519_s21  ;;  %p6523_p3 = scmp.lt.u32.totalorder %s6519_s21, %s7716_s8 }
  0x9d   :  { %p6525_p4 = pnand %p6523_p3, %p6520_p2 }
  0x9f   :  { %6528 = shalt.err (!%p6525_p4)
}
  0xa0   :  { %s6529_s18 = scalar_lea.vmem %s210_s11, 16  ;;  %s6533_s0 = scalar_lea.vmem %s210_s11, 32 }
  0xa1   :  { %p6530_p5 = scmp.ne.s32.totalorder %s210_s11, %s6529_s18  ;;  %p6534_p6 = scmp.lt.s32.totalorder %s210_s11, %s210_s11 }
  0xa2   :  { %p6535_p7 = scmp.lt.s32.totalorder %s6533_s0, %s6529_s18 }
  0xa4   :  { %p6536_p8 = por %p6535_p7, %p6534_p6 }
  0xa6   :  { %p6537_p9 = pnand %p6536_p8, %p6530_p5 }
  0xa8   :  { %6540 = shalt.err (!%p6537_p9)
}
  0xa9   :  { %212 = dma.hbm_to_vmem [thread:$0]  %s7716_s8, 16, %s210_s11, [#allocation12]  }
  0xaa   :  { %s7619_s29 = smov [#allocation14]   ;;  %s6541_s23 = scalar_lea.hbm %s7726_s19, 16 }
  0xab   :  { %s231_s22 = sshll.u32 %s7619_s29, 4  ;;  %p6542_p10 = scmp.ne.s32.totalorder %s7726_s19, %s6541_s23  ;;  %s232_s22 = int_to_ptr.vmem [resolvable:$true] %s231_s22 }
  0xac   :  { %p6545_p11 = scmp.lt.u32.totalorder %s6541_s23, %s7726_s19 }
  0xae   :  { %p6547_p12 = pnand %p6545_p11, %p6542_p10 }
  0xb0   :  { %6550 = shalt.err (!%p6547_p12)
}
  0xb1   :  { %s6551_s26 = scalar_lea.vmem %s232_s22, 16  ;;  %s6555_s2 = scalar_lea.vmem %s232_s22, 32 }
  0xb2   :  { %p6552_p13 = scmp.ne.s32.totalorder %s232_s22, %s6551_s26  ;;  %p6556_p0 = scmp.lt.s32.totalorder %s232_s22, %s232_s22 }
  0xb3   :  { %p6557_p1 = scmp.lt.s32.totalorder %s6555_s2, %s6551_s26 }
  0xb5   :  { %p6558_p2 = por %p6557_p1, %p6556_p0 }
  0xb7   :  { %p6559_p3 = pnand %p6558_p2, %p6552_p13 }
  0xb9   :  { %6562 = shalt.err (!%p6559_p3)
}
  0xba   :  { %234 = dma.hbm_to_vmem [thread:$0]  %s7726_s19, 16, %s232_s22, [#allocation15]  }
  0xbb   :  { %s7620_s8 = smov [#allocation17]   ;;  %s7621_s10 = smov [#allocation20]  }
  0xbc   :  { %s252_s7 = sshll.u32 %s7620_s8, 4  ;;  %s274_s11 = sshll.u32 %s7621_s10, 4  ;;  %s253_s7 = int_to_ptr.vmem [resolvable:$true] %s252_s7  ;;  %s7975_s11 = int_to_ptr.vmem [resolvable:$true] %s274_s11 }
  0xbd   :  { %s6563_s15 = scalar_lea.hbm %s7736_s30, 1024 }
  0xbe   :  { %p6564_p4 = scmp.ne.s32.totalorder %s7736_s30, %s6563_s15  ;;  %p6567_p5 = scmp.lt.u32.totalorder %s6563_s15, %s7736_s30 }
  0xc0   :  { %p6569_p6 = pnand %p6567_p5, %p6564_p4 }
  0xc2   :  { %6572 = shalt.err (!%p6569_p6)
}
  0xc3   :  { %s6573_s16 = scalar_lea.vmem %s253_s7, 1024  ;;  %p6578_p8 = scmp.lt.s32.totalorder %s253_s7, %s253_s7 }
  0xc4   :  { %p6574_p7 = scmp.ne.s32.totalorder %s253_s7, %s6573_s16  ;;  %p6579_p9 = scmp.lt.s32.totalorder %s6573_s16, %s6573_s16 }
  0xc6   :  { %p6580_p10 = por %p6579_p9, %p6578_p8 }
  0xc8   :  { %p6581_p11 = pnand %p6580_p10, %p6574_p7 }
  0xca   :  { %6584 = shalt.err (!%p6581_p11)
}
  0xcb   :  { %s7622_s19 = smov 64   ;;  %s7623_s21 = smov 4  }
  0xcc   :  { %258 = dma.hbm_to_vmem [thread:$0]  %s7736_s30, 1024, %s253_s7, [#allocation18], %s7622_s19, %s7622_s19, %s7623_s21  }
  0xcd   :  { %s6585_s18 = scalar_lea.hbm %s7746_s12, 1024 }
  0xce   :  { %p6586_p12 = scmp.ne.s32.totalorder %s7746_s12, %s6585_s18  ;;  %p6589_p13 = scmp.lt.u32.totalorder %s6585_s18, %s7746_s12 }
  0xd0   :  { %p6591_p0 = pnand %p6589_p13, %p6586_p12 }
  0xd2   :  { %6594 = shalt.err (!%p6591_p0)
}
  0xd3   :  { %s6595_s0 = scalar_lea.vmem %s7975_s11, 1024  ;;  %p6600_p2 = scmp.lt.s32.totalorder %s7975_s11, %s7975_s11 }
  0xd4   :  { %p6596_p1 = scmp.ne.s32.totalorder %s7975_s11, %s6595_s0  ;;  %p6601_p3 = scmp.lt.s32.totalorder %s6595_s0, %s6595_s0 }
  0xd6   :  { %p6602_p4 = por %p6601_p3, %p6600_p2 }
  0xd8   :  { %p6603_p5 = pnand %p6602_p4, %p6596_p1 }
  0xda   :  { %6606 = shalt.err (!%p6603_p5)
}
  0xdb   :  { %280 = dma.hbm_to_vmem [thread:$0]  %s7746_s12, 1024, %s7975_s11, [#allocation21], %s7622_s19, %s7622_s19, %s7623_s21  }
  0xdc   :  { %s7624_s30 = smov [#allocation23]   ;;  %s7625_s22 = smov [#allocation26]  }
  0xdd   :  { %s296_s29 = sshll.u32 %s7624_s30, 4  ;;  %s321_s23 = sshll.u32 %s7625_s22, 4  ;;  %s297_s29 = int_to_ptr.vmem [resolvable:$true] %s296_s29  ;;  %s322_s23 = int_to_ptr.vmem [resolvable:$true] %s321_s23 }
  0xde   :  { %s6607_s26 = scalar_lea.hbm %s7756_s27, 1024 }
  0xdf   :  { %p6608_p6 = scmp.ne.s32.totalorder %s7756_s27, %s6607_s26  ;;  %p6611_p7 = scmp.lt.u32.totalorder %s6607_s26, %s7756_s27 }
  0xe1   :  { %p6613_p8 = pnand %p6611_p7, %p6608_p6 }
  0xe3   :  { %6616 = shalt.err (!%p6613_p8)
}
  0xe4   :  { %s6617_s2 = scalar_lea.vmem %s297_s29, 1024  ;;  %p6622_p10 = scmp.lt.s32.totalorder %s297_s29, %s297_s29 }
  0xe5   :  { %p6618_p9 = scmp.ne.s32.totalorder %s297_s29, %s6617_s2  ;;  %p6623_p11 = scmp.lt.s32.totalorder %s6617_s2, %s6617_s2 }
  0xe7   :  { %p6624_p12 = por %p6623_p11, %p6622_p10 }
  0xe9   :  { %p6625_p13 = pnand %p6624_p12, %p6618_p9 }
  0xeb   :  { %6628 = shalt.err (!%p6625_p13)
}
  0xec   :  { %302 = dma.hbm_to_vmem [thread:$0]  %s7756_s27, 1024, %s297_s29, [#allocation24], %s7622_s19, %s7622_s19, %s7623_s21  }
  0xed   :  { %s6629_s12 = scalar_lea.hbm %s7766_s9, 16 }
  0xee   :  { %p6630_p0 = scmp.ne.s32.totalorder %s7766_s9, %s6629_s12  ;;  %p6633_p1 = scmp.lt.u32.totalorder %s6629_s12, %s7766_s9 }
  0xf0   :  { %p6635_p2 = pnand %p6633_p1, %p6630_p0 }
  0xf2   :  { %6638 = shalt.err (!%p6635_p2)
}
  0xf3   :  { %s6639_s8 = scalar_lea.vmem %s322_s23, 16  ;;  %s6643_s7 = scalar_lea.vmem %s322_s23, 32 }
  0xf4   :  { %p6640_p3 = scmp.ne.s32.totalorder %s322_s23, %s6639_s8  ;;  %p6644_p4 = scmp.lt.s32.totalorder %s322_s23, %s322_s23 }
  0xf5   :  { %p6645_p5 = scmp.lt.s32.totalorder %s6643_s7, %s6639_s8 }
  0xf7   :  { %p6646_p6 = por %p6645_p5, %p6644_p4 }
  0xf9   :  { %p6647_p7 = pnand %p6646_p6, %p6640_p3 }
  0xfb   :  { %6650 = shalt.err (!%p6647_p7)
}
  0xfc   :  { %324 = dma.hbm_to_vmem [thread:$0]  %s7766_s9, 16, %s322_s23, [#allocation27]  }
  0xfd   :  { %s7626_s10 = smov [#allocation29]   ;;  %s7627_s11 = smov [#allocation32]  }
  0xfe   :  { %s343_s27 = sshll.u32 %s7626_s10, 4  ;;  %s366_s15 = sshll.u32 %s7627_s11, 4  ;;  %s344_s27 = int_to_ptr.vmem [resolvable:$true] %s343_s27  ;;  %s8007_s15 = int_to_ptr.vmem [resolvable:$true] %s366_s15 }
  0xff   :  { %s6651_s16 = scalar_lea.hbm %s7776_s13, 16 }
 0x100   :  { %p6652_p8 = scmp.ne.s32.totalorder %s7776_s13, %s6651_s16  ;;  %p6655_p9 = scmp.lt.u32.totalorder %s6651_s16, %s7776_s13 }
 0x102   :  { %p6657_p10 = pnand %p6655_p9, %p6652_p8 }
 0x104   :  { %6660 = shalt.err (!%p6657_p10)
}
 0x105   :  { %s6661_s18 = scalar_lea.vmem %s344_s27, 16  ;;  %s6665_s0 = scalar_lea.vmem %s344_s27, 32 }
 0x106   :  { %p6662_p11 = scmp.ne.s32.totalorder %s344_s27, %s6661_s18  ;;  %p6666_p12 = scmp.lt.s32.totalorder %s344_s27, %s344_s27 }
 0x107   :  { %p6667_p13 = scmp.lt.s32.totalorder %s6665_s0, %s6661_s18 }
 0x109   :  { %p6668_p0 = por %p6667_p13, %p6666_p12 }
 0x10b   :  { %p6669_p1 = pnand %p6668_p0, %p6662_p11 }
 0x10d   :  { %6672 = shalt.err (!%p6669_p1)
}
 0x10e   :  { %346 = dma.hbm_to_vmem [thread:$0]  %s7776_s13, 16, %s344_s27, [#allocation30]  }
 0x10f   :  { %s6673_s9 = scalar_lea.hbm %s7796_s6, 1024 }
 0x110   :  { %p6674_p2 = scmp.ne.s32.totalorder %s7796_s6, %s6673_s9  ;;  %p6677_p3 = scmp.lt.u32.totalorder %s6673_s9, %s7796_s6 }
 0x112   :  { %p6679_p4 = pnand %p6677_p3, %p6674_p2 }
 0x114   :  { %6682 = shalt.err (!%p6679_p4)
}
 0x115   :  { %s6683_s30 = scalar_lea.vmem %s8007_s15, 1024  ;;  %p6688_p6 = scmp.lt.s32.totalorder %s8007_s15, %s8007_s15 }
 0x116   :  { %p6684_p5 = scmp.ne.s32.totalorder %s8007_s15, %s6683_s30  ;;  %p6689_p7 = scmp.lt.s32.totalorder %s6683_s30, %s6683_s30 }
 0x118   :  { %p6690_p8 = por %p6689_p7, %p6688_p6 }
 0x11a   :  { %p6691_p9 = pnand %p6690_p8, %p6684_p5 }
 0x11c   :  { %6694 = shalt.err (!%p6691_p9)
}
 0x11d   :  { %372 = dma.hbm_to_vmem [thread:$0]  %s7796_s6, 1024, %s8007_s15, [#allocation33], %s7622_s19, %s7622_s19, %s7623_s21  }
 0x11e   :  { %s7628_s13 = smov [#allocation35]   ;;  %s7629_s22 = smov [#allocation38]  }
 0x11f   :  { %s388_s29 = sshll.u32 %s7628_s13, 4  ;;  %s410_s23 = sshll.u32 %s7629_s22, 4  ;;  %s389_s29 = int_to_ptr.vmem [resolvable:$true] %s388_s29  ;;  %s8025_s23 = int_to_ptr.vmem [resolvable:$true] %s410_s23 }
 0x120   :  { %s6695_s26 = scalar_lea.hbm %s7806_s20, 1024 }
 0x121   :  { %p6696_p10 = scmp.ne.s32.totalorder %s7806_s20, %s6695_s26  ;;  %p6699_p11 = scmp.lt.u32.totalorder %s6695_s26, %s7806_s20 }
 0x123   :  { %p6701_p12 = pnand %p6699_p11, %p6696_p10 }
 0x125   :  { %6704 = shalt.err (!%p6701_p12)
}
 0x126   :  { %s6705_s2 = scalar_lea.vmem %s389_s29, 1024  ;;  %p6710_p0 = scmp.lt.s32.totalorder %s389_s29, %s389_s29 }
 0x127   :  { %p6706_p13 = scmp.ne.s32.totalorder %s389_s29, %s6705_s2  ;;  %p6711_p1 = scmp.lt.s32.totalorder %s6705_s2, %s6705_s2 }
 0x129   :  { %p6712_p2 = por %p6711_p1, %p6710_p0 }
 0x12b   :  { %p6713_p3 = pnand %p6712_p2, %p6706_p13 }
 0x12d   :  { %6716 = shalt.err (!%p6713_p3)
}
 0x12e   :  { %394 = dma.hbm_to_vmem [thread:$0]  %s7806_s20, 1024, %s389_s29, [#allocation36], %s7622_s19, %s7622_s19, %s7623_s21  }
 0x12f   :  { %s6717_s6 = scalar_lea.hbm %s7816_s24, 1024 }
 0x130   :  { %p6718_p4 = scmp.ne.s32.totalorder %s7816_s24, %s6717_s6  ;;  %p6721_p5 = scmp.lt.u32.totalorder %s6717_s6, %s7816_s24 }
 0x132   :  { %p6723_p6 = pnand %p6721_p5, %p6718_p4 }
 0x134   :  { %6726 = shalt.err (!%p6723_p6)
}
 0x135   :  { %s6727_s12 = scalar_lea.vmem %s8025_s23, 1024  ;;  %p6732_p8 = scmp.lt.s32.totalorder %s8025_s23, %s8025_s23 }
 0x136   :  { %p6728_p7 = scmp.ne.s32.totalorder %s8025_s23, %s6727_s12  ;;  %p6733_p9 = scmp.lt.s32.totalorder %s6727_s12, %s6727_s12 }
 0x138   :  { %p6734_p10 = por %p6733_p9, %p6732_p8 }
 0x13a   :  { %p6735_p11 = pnand %p6734_p10, %p6728_p7 }
 0x13c   :  { %6738 = shalt.err (!%p6735_p11)
}
 0x13d   :  { %416 = dma.hbm_to_vmem [thread:$0]  %s7816_s24, 1024, %s8025_s23, [#allocation39], %s7622_s19, %s7622_s19, %s7623_s21  }
 0x13e   :  { %s7630_s20 = smov [#allocation41]   ;;  %s7631_s7 = smov [#allocation44]  }
 0x13f   :  { %s435_s8 = sshll.u32 %s7630_s20, 4  ;;  %s457_s10 = sshll.u32 %s7631_s7, 4  ;;  %s436_s8 = int_to_ptr.vmem [resolvable:$true] %s435_s8  ;;  %s458_s10 = int_to_ptr.vmem [resolvable:$true] %s457_s10 }
 0x140   :  { %s6739_s27 = scalar_lea.hbm %s7826_s14, 16 }
 0x141   :  { %p6740_p12 = scmp.ne.s32.totalorder %s7826_s14, %s6739_s27  ;;  %p6743_p13 = scmp.lt.u32.totalorder %s6739_s27, %s7826_s14 }
 0x143   :  { %p6745_p0 = pnand %p6743_p13, %p6740_p12 }
 0x145   :  { %6748 = shalt.err (!%p6745_p0)
}
 0x146   :  { %s6749_s11 = scalar_lea.vmem %s436_s8, 16  ;;  %s6753_s15 = scalar_lea.vmem %s436_s8, 32 }
 0x147   :  { %p6750_p1 = scmp.ne.s32.totalorder %s436_s8, %s6749_s11  ;;  %p6754_p2 = scmp.lt.s32.totalorder %s436_s8, %s436_s8 }
 0x148   :  { %p6755_p3 = scmp.lt.s32.totalorder %s6753_s15, %s6749_s11 }
 0x14a   :  { %p6756_p4 = por %p6755_p3, %p6754_p2 }
 0x14c   :  { %p6757_p5 = pnand %p6756_p4, %p6750_p1 }
 0x14e   :  { %6760 = shalt.err (!%p6757_p5)
}
 0x14f   :  { %438 = dma.hbm_to_vmem [thread:$0]  %s7826_s14, 16, %s436_s8, [#allocation42]  }
 0x150   :  { %s6761_s24 = scalar_lea.hbm %s7836_s3, 16 }
 0x151   :  { %p6762_p6 = scmp.ne.s32.totalorder %s7836_s3, %s6761_s24  ;;  %p6765_p7 = scmp.lt.u32.totalorder %s6761_s24, %s7836_s3 }
 0x153   :  { %p6767_p8 = pnand %p6765_p7, %p6762_p6 }
 0x155   :  { %6770 = shalt.err (!%p6767_p8)
}
 0x156   :  { %s6771_s16 = scalar_lea.vmem %s458_s10, 16  ;;  %s6775_s18 = scalar_lea.vmem %s458_s10, 32 }
 0x157   :  { %p6772_p9 = scmp.ne.s32.totalorder %s458_s10, %s6771_s16  ;;  %p6776_p10 = scmp.lt.s32.totalorder %s458_s10, %s458_s10 }
 0x158   :  { %p6777_p11 = scmp.lt.s32.totalorder %s6775_s18, %s6771_s16 }
 0x15a   :  { %p6778_p12 = por %p6777_p11, %p6776_p10 }
 0x15c   :  { %p6779_p13 = pnand %p6778_p12, %p6772_p9 }
 0x15e   :  { %6782 = shalt.err (!%p6779_p13)
}
 0x15f   :  { %s8777_s0 = sld [smem:[#allocation119_spill]]  ;;  %s7632_s9 = smov [#allocation47]  }
 0x160   :  { %460 = dma.hbm_to_vmem [thread:$0]  %s7836_s3, 16, %s458_s10, [#allocation45]  }
 0x161   :  { %s478_s14 = sshll.u32 %s7632_s9, 4  ;;  %s7633_s30 = smov [#allocation50]   ;;  %s479_s14 = int_to_ptr.vmem [resolvable:$true] %s478_s14 }
 0x162   :  { %s500_s13 = sshll.u32 %s7633_s30, 4  ;;  %s8054_s13 = int_to_ptr.vmem [resolvable:$true] %s500_s13 }
 0x165   :  { %s6783_s29 = scalar_lea.hbm %s8777_s0, 1024 }
 0x166   :  { %p6784_p0 = scmp.ne.s32.totalorder %s8777_s0, %s6783_s29  ;;  %p6787_p1 = scmp.lt.u32.totalorder %s6783_s29, %s8777_s0 }
 0x168   :  { %p6789_p2 = pnand %p6787_p1, %p6784_p0 }
 0x16a   :  { %6792 = shalt.err (!%p6789_p2)
}
 0x16b   :  { %s6793_s22 = scalar_lea.vmem %s479_s14, 1024  ;;  %p6798_p4 = scmp.lt.s32.totalorder %s479_s14, %s479_s14 }
 0x16c   :  { %p6794_p3 = scmp.ne.s32.totalorder %s479_s14, %s6793_s22  ;;  %p6799_p5 = scmp.lt.s32.totalorder %s6793_s22, %s6793_s22 }
 0x16e   :  { %p6800_p6 = por %p6799_p5, %p6798_p4 }
 0x170   :  { %p6801_p7 = pnand %p6800_p6, %p6794_p3 }
 0x172   :  { %6804 = shalt.err (!%p6801_p7)
}
 0x173   :  { %s8778_s3 = sld [smem:[#allocation121_spill]] }
 0x174   :  { %484 = dma.hbm_to_vmem [thread:$0]  %s8777_s0, 1024, %s479_s14, [#allocation48], %s7622_s19, %s7622_s19, %s7623_s21  }
 0x179   :  { %s6805_s23 = scalar_lea.hbm %s8778_s3, 1024 }
 0x17a   :  { %p6806_p8 = scmp.ne.s32.totalorder %s8778_s3, %s6805_s23  ;;  %p6809_p9 = scmp.lt.u32.totalorder %s6805_s23, %s8778_s3 }
 0x17c   :  { %p6811_p10 = pnand %p6809_p9, %p6806_p8 }
 0x17e   :  { %6814 = shalt.err (!%p6811_p10)
}
 0x17f   :  { %s6815_s26 = scalar_lea.vmem %s8054_s13, 1024  ;;  %p6820_p12 = scmp.lt.s32.totalorder %s8054_s13, %s8054_s13 }
 0x180   :  { %p6816_p11 = scmp.ne.s32.totalorder %s8054_s13, %s6815_s26  ;;  %p6821_p13 = scmp.lt.s32.totalorder %s6815_s26, %s6815_s26 }
 0x182   :  { %p6822_p0 = por %p6821_p13, %p6820_p12 }
 0x184   :  { %p6823_p1 = pnand %p6822_p0, %p6816_p11 }
 0x186   :  { %6826 = shalt.err (!%p6823_p1)
}
 0x187   :  { %s8779_s2 = sld [smem:[#allocation126_spill]]  ;;  %s7634_s6 = smov [#allocation53]  }
 0x188   :  { %506 = dma.hbm_to_vmem [thread:$0]  %s8778_s3, 1024, %s8054_s13, [#allocation51], %s7622_s19, %s7622_s19, %s7623_s21  }
 0x189   :  { %s528_s12 = sshll.u32 %s7634_s6, 4  ;;  %s7635_s20 = smov [#allocation56]   ;;  %s529_s12 = int_to_ptr.vmem [resolvable:$true] %s528_s12 }
 0x18a   :  { %s555_s8 = sshll.u32 %s7635_s20, 4  ;;  %s556_s8 = int_to_ptr.vmem [resolvable:$true] %s555_s8 }
 0x18d   :  { %s6827_s7 = scalar_lea.hbm %s8779_s2, 1024 }
 0x18e   :  { %p6828_p2 = scmp.ne.s32.totalorder %s8779_s2, %s6827_s7  ;;  %p6831_p3 = scmp.lt.u32.totalorder %s6827_s7, %s8779_s2 }
 0x190   :  { %p6833_p4 = pnand %p6831_p3, %p6828_p2 }
 0x192   :  { %6836 = shalt.err (!%p6833_p4)
}
 0x193   :  { %s6837_s10 = scalar_lea.vmem %s529_s12, 1024  ;;  %p6842_p6 = scmp.lt.s32.totalorder %s529_s12, %s529_s12 }
 0x194   :  { %p6838_p5 = scmp.ne.s32.totalorder %s529_s12, %s6837_s10  ;;  %p6843_p7 = scmp.lt.s32.totalorder %s6837_s10, %s6837_s10 }
 0x196   :  { %p6844_p8 = por %p6843_p7, %p6842_p6 }
 0x198   :  { %p6845_p9 = pnand %p6844_p8, %p6838_p5 }
 0x19a   :  { %6848 = shalt.err (!%p6845_p9)
}
 0x19b   :  { %s8780_s27 = sld [smem:[#allocation129_spill]] }
 0x19c   :  { %534 = dma.hbm_to_vmem [thread:$0]  %s8779_s2, 1024, %s529_s12, [#allocation54], %s7622_s19, %s7622_s19, %s7623_s21  }
 0x1a1   :  { %s6849_s11 = scalar_lea.hbm %s8780_s27, 16 }
 0x1a2   :  { %p6850_p10 = scmp.ne.s32.totalorder %s8780_s27, %s6849_s11  ;;  %p6853_p11 = scmp.lt.u32.totalorder %s6849_s11, %s8780_s27 }
 0x1a4   :  { %p6855_p12 = pnand %p6853_p11, %p6850_p10 }
 0x1a6   :  { %6858 = shalt.err (!%p6855_p12)
}
 0x1a7   :  { %s6859_s15 = scalar_lea.vmem %s556_s8, 16  ;;  %s6863_s24 = scalar_lea.vmem %s556_s8, 32 }
 0x1a8   :  { %p6860_p13 = scmp.ne.s32.totalorder %s556_s8, %s6859_s15  ;;  %p6864_p0 = scmp.lt.s32.totalorder %s556_s8, %s556_s8 }
 0x1a9   :  { %p6865_p1 = scmp.lt.s32.totalorder %s6863_s24, %s6859_s15 }
 0x1ab   :  { %p6866_p2 = por %p6865_p1, %p6864_p0 }
 0x1ad   :  { %p6867_p3 = pnand %p6866_p2, %p6860_p13 }
 0x1af   :  { %6870 = shalt.err (!%p6867_p3)
}
 0x1b0   :  { %s8781_s16 = sld [smem:[#allocation131_spill]]  ;;  %s7636_s18 = smov [#allocation59]  }
 0x1b1   :  { %558 = dma.hbm_to_vmem [thread:$0]  %s8780_s27, 16, %s556_s8, [#allocation57]  }
 0x1b2   :  { %s576_s0 = sshll.u32 %s7636_s18, 4  ;;  %s7637_s9 = smov [#allocation62]   ;;  %s577_s0 = int_to_ptr.vmem [resolvable:$true] %s576_s0 }
 0x1b3   :  { %s598_s14 = sshll.u32 %s7637_s9, 4  ;;  %s8086_s14 = int_to_ptr.vmem [resolvable:$true] %s598_s14 }
 0x1b6   :  { %s6871_s30 = scalar_lea.hbm %s8781_s16, 1024 }
 0x1b7   :  { %p6872_p4 = scmp.ne.s32.totalorder %s8781_s16, %s6871_s30  ;;  %p6875_p5 = scmp.lt.u32.totalorder %s6871_s30, %s8781_s16 }
 0x1b9   :  { %p6877_p6 = pnand %p6875_p5, %p6872_p4 }
 0x1bb   :  { %6880 = shalt.err (!%p6877_p6)
}
 0x1bc   :  { %s6881_s13 = scalar_lea.vmem %s577_s0, 1024  ;;  %p6886_p8 = scmp.lt.s32.totalorder %s577_s0, %s577_s0 }
 0x1bd   :  { %p6882_p7 = scmp.ne.s32.totalorder %s577_s0, %s6881_s13  ;;  %p6887_p9 = scmp.lt.s32.totalorder %s6881_s13, %s6881_s13 }
 0x1bf   :  { %p6888_p10 = por %p6887_p9, %p6886_p8 }
 0x1c1   :  { %p6889_p11 = pnand %p6888_p10, %p6882_p7 }
 0x1c3   :  { %6892 = shalt.err (!%p6889_p11)
}
 0x1c4   :  { %s8782_s29 = sld [smem:[#allocation133_spill]] }
 0x1c5   :  { %582 = dma.hbm_to_vmem [thread:$0]  %s8781_s16, 1024, %s577_s0, [#allocation60], %s7622_s19, %s7622_s19, %s7623_s21  }
 0x1ca   :  { %s6893_s22 = scalar_lea.hbm %s8782_s29, 1024 }
 0x1cb   :  { %p6894_p12 = scmp.ne.s32.totalorder %s8782_s29, %s6893_s22  ;;  %p6897_p13 = scmp.lt.u32.totalorder %s6893_s22, %s8782_s29 }
 0x1cd   :  { %p6899_p0 = pnand %p6897_p13, %p6894_p12 }
 0x1cf   :  { %6902 = shalt.err (!%p6899_p0)
}
 0x1d0   :  { %s6903_s3 = scalar_lea.vmem %s8086_s14, 1024  ;;  %p6908_p2 = scmp.lt.s32.totalorder %s8086_s14, %s8086_s14 }
 0x1d1   :  { %p6904_p1 = scmp.ne.s32.totalorder %s8086_s14, %s6903_s3  ;;  %p6909_p3 = scmp.lt.s32.totalorder %s6903_s3, %s6903_s3 }
 0x1d3   :  { %p6910_p4 = por %p6909_p3, %p6908_p2 }
 0x1d5   :  { %p6911_p5 = pnand %p6910_p4, %p6904_p1 }
 0x1d7   :  { %6914 = shalt.err (!%p6911_p5)
}
 0x1d8   :  { %s8783_s23 = sld [smem:[#allocation135_spill]]  ;;  %s7638_s26 = smov [#allocation65]  }
 0x1d9   :  { %604 = dma.hbm_to_vmem [thread:$0]  %s8782_s29, 1024, %s8086_s14, [#allocation63], %s7622_s19, %s7622_s19, %s7623_s21  }
 0x1da   :  { %s620_s2 = sshll.u32 %s7638_s26, 4  ;;  %s7639_s6 = smov [#allocation68]   ;;  %s621_s2 = int_to_ptr.vmem [resolvable:$true] %s620_s2 }
 0x1db   :  { %s645_s12 = sshll.u32 %s7639_s6, 4  ;;  %s646_s12 = int_to_ptr.vmem [resolvable:$true] %s645_s12 }
 0x1de   :  { %s6915_s20 = scalar_lea.hbm %s8783_s23, 1024 }
 0x1df   :  { %p6916_p6 = scmp.ne.s32.totalorder %s8783_s23, %s6915_s20  ;;  %p6919_p7 = scmp.lt.u32.totalorder %s6915_s20, %s8783_s23 }
 0x1e1   :  { %p6921_p8 = pnand %p6919_p7, %p6916_p6 }
 0x1e3   :  { %6924 = shalt.err (!%p6921_p8)
}
 0x1e4   :  { %s6925_s8 = scalar_lea.vmem %s621_s2, 1024  ;;  %p6930_p10 = scmp.lt.s32.totalorder %s621_s2, %s621_s2 }
 0x1e5   :  { %p6926_p9 = scmp.ne.s32.totalorder %s621_s2, %s6925_s8  ;;  %p6931_p11 = scmp.lt.s32.totalorder %s6925_s8, %s6925_s8 }
 0x1e7   :  { %p6932_p12 = por %p6931_p11, %p6930_p10 }
 0x1e9   :  { %p6933_p13 = pnand %p6932_p12, %p6926_p9 }
 0x1eb   :  { %6936 = shalt.err (!%p6933_p13)
}
 0x1ec   :  { %626 = dma.hbm_to_vmem [thread:$0]  %s8783_s23, 1024, %s621_s2, [#allocation66], %s7622_s19, %s7622_s19, %s7623_s21  }
 0x1ed   :  { %s6937_s7 = scalar_lea.hbm %s7936_s17, 16 }
 0x1ee   :  { %p6938_p0 = scmp.ne.s32.totalorder %s7936_s17, %s6937_s7  ;;  %p6941_p1 = scmp.lt.u32.totalorder %s6937_s7, %s7936_s17 }
 0x1f0   :  { %p6943_p2 = pnand %p6941_p1, %p6938_p0 }
 0x1f2   :  { %6946 = shalt.err (!%p6943_p2)
}
 0x1f3   :  { %s6947_s10 = scalar_lea.vmem %s646_s12, 16  ;;  %s6951_s27 = scalar_lea.vmem %s646_s12, 32 }
 0x1f4   :  { %p6948_p3 = scmp.ne.s32.totalorder %s646_s12, %s6947_s10  ;;  %p6952_p4 = scmp.lt.s32.totalorder %s646_s12, %s646_s12 }
 0x1f5   :  { %p6953_p5 = scmp.lt.s32.totalorder %s6951_s27, %s6947_s10 }
 0x1f7   :  { %p6954_p6 = por %p6953_p5, %p6952_p4 }
 0x1f9   :  { %p6955_p7 = pnand %p6954_p6, %p6948_p3 }
 0x1fb   :  { %6958 = shalt.err (!%p6955_p7)
}
 0x1fc   :  { %s8784_s11 = sld [smem:[#allocation102_spill]]  ;;  %s7640_s15 = smov [#allocation2]  }
 0x1fd   :  { %648 = dma.hbm_to_vmem [thread:$0]  %s7936_s17, 16, %s646_s12, [#allocation69]  }
 0x1fe   :  { %s153_s24 = sshll.u32 %s7640_s15, 4  ;;  %s7641_s16 = smov [#allocation7]   ;;  %s154_s24 = int_to_ptr.vmem [resolvable:$true] %s153_s24 }
 0x1ff   :  { %s175_s18 = sshll.u32 %s7641_s16, 4  ;;  %s176_s18 = int_to_ptr.vmem [resolvable:$true] %s175_s18 }
 0x202   :  { %s6959_s0 = scalar_lea.hbm %s8784_s11, 256 }
 0x203   :  { %p6960_p8 = scmp.ne.s32.totalorder %s8784_s11, %s6959_s0  ;;  %p6963_p9 = scmp.lt.u32.totalorder %s6959_s0, %s8784_s11 }
 0x205   :  { %p6965_p10 = pnand %p6963_p9, %p6960_p8 }
 0x207   :  { %6968 = shalt.err (!%p6965_p10)
}
 0x208   :  { %s6969_s9 = scalar_lea.vmem %s154_s24, 256  ;;  %p6974_p12 = scmp.lt.s32.totalorder %s154_s24, %s154_s24 }
 0x209   :  { %p6970_p11 = scmp.ne.s32.totalorder %s154_s24, %s6969_s9  ;;  %p6975_p13 = scmp.lt.s32.totalorder %s6969_s9, %s6969_s9 }
 0x20b   :  { %p6976_p0 = por %p6975_p13, %p6974_p12 }
 0x20d   :  { %p6977_p1 = pnand %p6976_p0, %p6970_p11 }
 0x20f   :  { %6980 = shalt.err (!%p6977_p1)
}
 0x210   :  { %s8785_s17 = sld [smem:[#allocation103_spill]] }
 0x211   :  { %156 = dma.hbm_to_vmem [thread:$0]  %s8784_s11, 256, %s154_s24, [#allocation3]  }
 0x216   :  { %s6981_s14 = scalar_lea.hbm %s8785_s17, 32 }
 0x217   :  { %p6982_p2 = scmp.ne.s32.totalorder %s8785_s17, %s6981_s14  ;;  %p6985_p3 = scmp.lt.u32.totalorder %s6981_s14, %s8785_s17 }
 0x219   :  { %p6987_p4 = pnand %p6985_p3, %p6982_p2 }
 0x21b   :  { %6990 = shalt.err (!%p6987_p4)
}
 0x21c   :  { %s6991_s30 = scalar_lea.vmem %s176_s18, 32  ;;  %p6996_p6 = scmp.lt.s32.totalorder %s176_s18, %s176_s18 }
 0x21d   :  { %p6992_p5 = scmp.ne.s32.totalorder %s176_s18, %s6991_s30  ;;  %p6997_p7 = scmp.lt.s32.totalorder %s6991_s30, %s6991_s30 }
 0x21f   :  { %p6998_p8 = por %p6997_p7, %p6996_p6 }
 0x221   :  { %p6999_p9 = pnand %p6998_p8, %p6992_p5 }
 0x223   :  { %7002 = shalt.err (!%p6999_p9)
}
 0x224   :  { %s8786_s13 = sld [smem:[#allocation104_spill]]  ;;  %s7642_s29 = smov [#allocation10]  }
 0x225   :  { %178 = dma.hbm_to_vmem [thread:$0]  %s8785_s17, 32, %s176_s18, [#allocation6]  }
 0x226   :  { %s196_s22 = sshll.u32 %s7642_s29, 4  ;;  %s7643_s3 = smov [#allocation13]   ;;  %s197_s22 = int_to_ptr.vmem [resolvable:$true] %s196_s22 }
 0x227   :  { %s218_s23 = sshll.u32 %s7643_s3, 4  ;;  %s8126_s23 = int_to_ptr.vmem [resolvable:$true] %s218_s23 }
 0x22a   :  { %s7003_s26 = scalar_lea.hbm %s8786_s13, 2048 }
 0x22b   :  { %p7004_p10 = scmp.ne.s32.totalorder %s8786_s13, %s7003_s26  ;;  %p7007_p11 = scmp.lt.u32.totalorder %s7003_s26, %s8786_s13 }
 0x22d   :  { %p7009_p12 = pnand %p7007_p11, %p7004_p10 }
 0x22f   :  { %7012 = shalt.err (!%p7009_p12)
}
 0x230   :  { %s7013_s2 = scalar_lea.vmem %s197_s22, 2048  ;;  %p7018_p0 = scmp.lt.s32.totalorder %s197_s22, %s197_s22 }
 0x231   :  { %p7014_p13 = scmp.ne.s32.totalorder %s197_s22, %s7013_s2  ;;  %p7019_p1 = scmp.lt.s32.totalorder %s7013_s2, %s7013_s2 }
 0x233   :  { %p7020_p2 = por %p7019_p1, %p7018_p0 }
 0x235   :  { %p7021_p3 = pnand %p7020_p2, %p7014_p13 }
 0x237   :  { %7024 = shalt.err (!%p7021_p3)
}
 0x238   :  { %s8787_s6 = sld [smem:[#allocation105_spill]] }
 0x239   :  { %202 = dma.hbm_to_vmem [thread:$0]  %s8786_s13, 2048, %s197_s22, [#allocation9], %s7622_s19, %s7622_s19, %s7623_s21  }
 0x23e   :  { %s7025_s12 = scalar_lea.hbm %s8787_s6, 2048 }
 0x23f   :  { %p7026_p4 = scmp.ne.s32.totalorder %s8787_s6, %s7025_s12  ;;  %p7029_p5 = scmp.lt.u32.totalorder %s7025_s12, %s8787_s6 }
 0x241   :  { %p7031_p6 = pnand %p7029_p5, %p7026_p4 }
 0x243   :  { %7034 = shalt.err (!%p7031_p6)
}
 0x244   :  { %s7035_s20 = scalar_lea.vmem %s8126_s23, 2048  ;;  %p7040_p8 = scmp.lt.s32.totalorder %s8126_s23, %s8126_s23 }
 0x245   :  { %p7036_p7 = scmp.ne.s32.totalorder %s8126_s23, %s7035_s20  ;;  %p7041_p9 = scmp.lt.s32.totalorder %s7035_s20, %s7035_s20 }
 0x247   :  { %p7042_p10 = por %p7041_p9, %p7040_p8 }
 0x249   :  { %p7043_p11 = pnand %p7042_p10, %p7036_p7 }
 0x24b   :  { %7046 = shalt.err (!%p7043_p11)
}
 0x24c   :  { %s8788_s8 = sld [smem:[#allocation106_spill]]  ;;  %s7644_s7 = smov [#allocation16]  }
 0x24d   :  { %224 = dma.hbm_to_vmem [thread:$0]  %s8787_s6, 2048, %s8126_s23, [#allocation12], %s7622_s19, %s7622_s19, %s7623_s21  }
 0x24e   :  { %s240_s10 = sshll.u32 %s7644_s7, 4  ;;  %s7645_s27 = smov [#allocation19]   ;;  %s241_s10 = int_to_ptr.vmem [resolvable:$true] %s240_s10 }
 0x24f   :  { %s265_s11 = sshll.u32 %s7645_s27, 4  ;;  %s266_s11 = int_to_ptr.vmem [resolvable:$true] %s265_s11 }
 0x252   :  { %s7047_s15 = scalar_lea.hbm %s8788_s8, 1024 }
 0x253   :  { %p7048_p12 = scmp.ne.s32.totalorder %s8788_s8, %s7047_s15  ;;  %p7051_p13 = scmp.lt.u32.totalorder %s7047_s15, %s8788_s8 }
 0x255   :  { %p7053_p0 = pnand %p7051_p13, %p7048_p12 }
 0x257   :  { %7056 = shalt.err (!%p7053_p0)
}
 0x258   :  { %s7057_s24 = scalar_lea.vmem %s241_s10, 1024  ;;  %p7062_p2 = scmp.lt.s32.totalorder %s241_s10, %s241_s10 }
 0x259   :  { %p7058_p1 = scmp.ne.s32.totalorder %s241_s10, %s7057_s24  ;;  %p7063_p3 = scmp.lt.s32.totalorder %s7057_s24, %s7057_s24 }
 0x25b   :  { %p7064_p4 = por %p7063_p3, %p7062_p2 }
 0x25d   :  { %p7065_p5 = pnand %p7064_p4, %p7058_p1 }
 0x25f   :  { %7068 = shalt.err (!%p7065_p5)
}
 0x260   :  { %s8789_s16 = sld [smem:[#allocation107_spill]] }
 0x261   :  { %246 = dma.hbm_to_vmem [thread:$0]  %s8788_s8, 1024, %s241_s10, [#allocation15], %s7622_s19, %s7622_s19, %s7623_s21  }
 0x266   :  { %s7069_s18 = scalar_lea.hbm %s8789_s16, 16 }
 0x267   :  { %p7070_p6 = scmp.ne.s32.totalorder %s8789_s16, %s7069_s18  ;;  %p7073_p7 = scmp.lt.u32.totalorder %s7069_s18, %s8789_s16 }
 0x269   :  { %p7075_p8 = pnand %p7073_p7, %p7070_p6 }
 0x26b   :  { %7078 = shalt.err (!%p7075_p8)
}
 0x26c   :  { %s7079_s0 = scalar_lea.vmem %s266_s11, 16  ;;  %s7083_s9 = scalar_lea.vmem %s266_s11, 32 }
 0x26d   :  { %p7080_p9 = scmp.ne.s32.totalorder %s266_s11, %s7079_s0  ;;  %p7084_p10 = scmp.lt.s32.totalorder %s266_s11, %s266_s11 }
 0x26e   :  { %p7085_p11 = scmp.lt.s32.totalorder %s7083_s9, %s7079_s0 }
 0x270   :  { %p7086_p12 = por %p7085_p11, %p7084_p10 }
 0x272   :  { %p7087_p13 = pnand %p7086_p12, %p7080_p9 }
 0x274   :  { %7090 = shalt.err (!%p7087_p13)
}
 0x275   :  { %s8790_s17 = sld [smem:[#allocation108_spill]]  ;;  %s7646_s14 = smov [#allocation22]  }
 0x276   :  { %268 = dma.hbm_to_vmem [thread:$0]  %s8789_s16, 16, %s266_s11, [#allocation18]  }
 0x277   :  { %s287_s30 = sshll.u32 %s7646_s14, 4  ;;  %s7647_s13 = smov [#allocation25]   ;;  %s288_s30 = int_to_ptr.vmem [resolvable:$true] %s287_s30 }
 0x278   :  { %s308_s29 = sshll.u32 %s7647_s13, 4  ;;  %s8158_s29 = int_to_ptr.vmem [resolvable:$true] %s308_s29 }
 0x27b   :  { %s7091_s22 = scalar_lea.hbm %s8790_s17, 16 }
 0x27c   :  { %p7092_p0 = scmp.ne.s32.totalorder %s8790_s17, %s7091_s22  ;;  %p7095_p1 = scmp.lt.u32.totalorder %s7091_s22, %s8790_s17 }
 0x27e   :  { %p7097_p2 = pnand %p7095_p1, %p7092_p0 }
 0x280   :  { %7100 = shalt.err (!%p7097_p2)
}
 0x281   :  { %s7101_s3 = scalar_lea.vmem %s288_s30, 16  ;;  %s7105_s23 = scalar_lea.vmem %s288_s30, 32 }
 0x282   :  { %p7102_p3 = scmp.ne.s32.totalorder %s288_s30, %s7101_s3  ;;  %p7106_p4 = scmp.lt.s32.totalorder %s288_s30, %s288_s30 }
 0x283   :  { %p7107_p5 = scmp.lt.s32.totalorder %s7105_s23, %s7101_s3 }
 0x285   :  { %p7108_p6 = por %p7107_p5, %p7106_p4 }
 0x287   :  { %p7109_p7 = pnand %p7108_p6, %p7102_p3 }
 0x289   :  { %7112 = shalt.err (!%p7109_p7)
}
 0x28a   :  { %s8791_s26 = sld [smem:[#allocation109_spill]] }
 0x28b   :  { %290 = dma.hbm_to_vmem [thread:$0]  %s8790_s17, 16, %s288_s30, [#allocation21]  }
 0x290   :  { %s7113_s2 = scalar_lea.hbm %s8791_s26, 1024 }
 0x291   :  { %p7114_p8 = scmp.ne.s32.totalorder %s8791_s26, %s7113_s2  ;;  %p7117_p9 = scmp.lt.u32.totalorder %s7113_s2, %s8791_s26 }
 0x293   :  { %p7119_p10 = pnand %p7117_p9, %p7114_p8 }
 0x295   :  { %7122 = shalt.err (!%p7119_p10)
}
 0x296   :  { %s7123_s6 = scalar_lea.vmem %s8158_s29, 1024  ;;  %p7128_p12 = scmp.lt.s32.totalorder %s8158_s29, %s8158_s29 }
 0x297   :  { %p7124_p11 = scmp.ne.s32.totalorder %s8158_s29, %s7123_s6  ;;  %p7129_p13 = scmp.lt.s32.totalorder %s7123_s6, %s7123_s6 }
 0x299   :  { %p7130_p0 = por %p7129_p13, %p7128_p12 }
 0x29b   :  { %p7131_p1 = pnand %p7130_p0, %p7124_p11 }
 0x29d   :  { %7134 = shalt.err (!%p7131_p1)
}
 0x29e   :  { %s8792_s12 = sld [smem:[#allocation110_spill]]  ;;  %s7648_s20 = smov [#allocation28]  }
 0x29f   :  { %314 = dma.hbm_to_vmem [thread:$0]  %s8791_s26, 1024, %s8158_s29, [#allocation24], %s7622_s19, %s7622_s19, %s7623_s21  }
 0x2a0   :  { %s330_s8 = sshll.u32 %s7648_s20, 4  ;;  %s7649_s7 = smov [#allocation31]   ;;  %s331_s8 = int_to_ptr.vmem [resolvable:$true] %s330_s8 }
 0x2a1   :  { %s355_s10 = sshll.u32 %s7649_s7, 4  ;;  %s356_s10 = int_to_ptr.vmem [resolvable:$true] %s355_s10 }
 0x2a4   :  { %s7135_s27 = scalar_lea.hbm %s8792_s12, 1024 }
 0x2a5   :  { %p7136_p2 = scmp.ne.s32.totalorder %s8792_s12, %s7135_s27  ;;  %p7139_p3 = scmp.lt.u32.totalorder %s7135_s27, %s8792_s12 }
 0x2a7   :  { %p7141_p4 = pnand %p7139_p3, %p7136_p2 }
 0x2a9   :  { %7144 = shalt.err (!%p7141_p4)
}
 0x2aa   :  { %s7145_s11 = scalar_lea.vmem %s331_s8, 1024  ;;  %p7150_p6 = scmp.lt.s32.totalorder %s331_s8, %s331_s8 }
 0x2ab   :  { %p7146_p5 = scmp.ne.s32.totalorder %s331_s8, %s7145_s11  ;;  %p7151_p7 = scmp.lt.s32.totalorder %s7145_s11, %s7145_s11 }
 0x2ad   :  { %p7152_p8 = por %p7151_p7, %p7150_p6 }
 0x2af   :  { %p7153_p9 = pnand %p7152_p8, %p7146_p5 }
 0x2b1   :  { %7156 = shalt.err (!%p7153_p9)
}
 0x2b2   :  { %s8793_s15 = sld [smem:[#allocation112_spill]] }
 0x2b3   :  { %336 = dma.hbm_to_vmem [thread:$0]  %s8792_s12, 1024, %s331_s8, [#allocation27], %s7622_s19, %s7622_s19, %s7623_s21  }
 0x2b8   :  { %s7157_s24 = scalar_lea.hbm %s8793_s15, 128 }
 0x2b9   :  { %p7158_p10 = scmp.ne.s32.totalorder %s8793_s15, %s7157_s24  ;;  %p7161_p11 = scmp.lt.u32.totalorder %s7157_s24, %s8793_s15 }
 0x2bb   :  { %p7163_p12 = pnand %p7161_p11, %p7158_p10 }
 0x2bd   :  { %7166 = shalt.err (!%p7163_p12)
}
 0x2be   :  { %s7167_s16 = scalar_lea.vmem %s356_s10, 128  ;;  %p7172_p0 = scmp.lt.s32.totalorder %s356_s10, %s356_s10 }
 0x2bf   :  { %p7168_p13 = scmp.ne.s32.totalorder %s356_s10, %s7167_s16  ;;  %p7173_p1 = scmp.lt.s32.totalorder %s7167_s16, %s7167_s16 }
 0x2c1   :  { %p7174_p2 = por %p7173_p1, %p7172_p0 }
 0x2c3   :  { %p7175_p3 = pnand %p7174_p2, %p7168_p13 }
 0x2c5   :  { %7178 = shalt.err (!%p7175_p3)
}
 0x2c6   :  { %s8794_s18 = sld [smem:[#allocation114_spill]]  ;;  %s7650_s0 = smov [#allocation34]  }
 0x2c7   :  { %358 = dma.hbm_to_vmem [thread:$0]  %s8793_s15, 128, %s356_s10, [#allocation30]  }
 0x2c8   :  { %s379_s9 = sshll.u32 %s7650_s0, 4  ;;  %s7651_s17 = smov [#allocation37]   ;;  %s380_s9 = int_to_ptr.vmem [resolvable:$true] %s379_s9 }
 0x2c9   :  { %s401_s14 = sshll.u32 %s7651_s17, 4  ;;  %s402_s14 = int_to_ptr.vmem [resolvable:$true] %s401_s14 }
 0x2cc   :  { %s7179_s30 = scalar_lea.hbm %s8794_s18, 16 }
 0x2cd   :  { %p7180_p4 = scmp.ne.s32.totalorder %s8794_s18, %s7179_s30  ;;  %p7183_p5 = scmp.lt.u32.totalorder %s7179_s30, %s8794_s18 }
 0x2cf   :  { %p7185_p6 = pnand %p7183_p5, %p7180_p4 }
 0x2d1   :  { %7188 = shalt.err (!%p7185_p6)
}
 0x2d2   :  { %s7189_s13 = scalar_lea.vmem %s380_s9, 16  ;;  %s7193_s29 = scalar_lea.vmem %s380_s9, 32 }
 0x2d3   :  { %p7190_p7 = scmp.ne.s32.totalorder %s380_s9, %s7189_s13  ;;  %p7194_p8 = scmp.lt.s32.totalorder %s380_s9, %s380_s9 }
 0x2d4   :  { %p7195_p9 = scmp.lt.s32.totalorder %s7193_s29, %s7189_s13 }
 0x2d6   :  { %p7196_p10 = por %p7195_p9, %p7194_p8 }
 0x2d8   :  { %p7197_p11 = pnand %p7196_p10, %p7190_p7 }
 0x2da   :  { %7200 = shalt.err (!%p7197_p11)
}
 0x2db   :  { %s8795_s22 = sld [smem:[#allocation115_spill]] }
 0x2dc   :  { %382 = dma.hbm_to_vmem [thread:$0]  %s8794_s18, 16, %s380_s9, [#allocation33]  }
 0x2e1   :  { %s7201_s3 = scalar_lea.hbm %s8795_s22, 16 }
 0x2e2   :  { %p7202_p12 = scmp.ne.s32.totalorder %s8795_s22, %s7201_s3  ;;  %p7205_p13 = scmp.lt.u32.totalorder %s7201_s3, %s8795_s22 }
 0x2e4   :  { %p7207_p0 = pnand %p7205_p13, %p7202_p12 }
 0x2e6   :  { %7210 = shalt.err (!%p7207_p0)
}
 0x2e7   :  { %s7211_s23 = scalar_lea.vmem %s402_s14, 16  ;;  %s7215_s26 = scalar_lea.vmem %s402_s14, 32 }
 0x2e8   :  { %p7212_p1 = scmp.ne.s32.totalorder %s402_s14, %s7211_s23  ;;  %p7216_p2 = scmp.lt.s32.totalorder %s402_s14, %s402_s14 }
 0x2e9   :  { %p7217_p3 = scmp.lt.s32.totalorder %s7215_s26, %s7211_s23 }
 0x2eb   :  { %p7218_p4 = por %p7217_p3, %p7216_p2 }
 0x2ed   :  { %p7219_p5 = pnand %p7218_p4, %p7212_p1 }
 0x2ef   :  { %7222 = shalt.err (!%p7219_p5)
}
 0x2f0   :  { %s8796_s2 = sld [smem:[#allocation116_spill]]  ;;  %s7652_s6 = smov [#allocation40]  }
 0x2f1   :  { %404 = dma.hbm_to_vmem [thread:$0]  %s8795_s22, 16, %s402_s14, [#allocation36]  }
 0x2f2   :  { %s422_s12 = sshll.u32 %s7652_s6, 4  ;;  %s7653_s20 = smov [#allocation43]   ;;  %s423_s12 = int_to_ptr.vmem [resolvable:$true] %s422_s12 }
 0x2f3   :  { %s444_s8 = sshll.u32 %s7653_s20, 4  ;;  %s8195_s8 = int_to_ptr.vmem [resolvable:$true] %s444_s8 }
 0x2f6   :  { %s7223_s7 = scalar_lea.hbm %s8796_s2, 1024 }
 0x2f7   :  { %p7224_p6 = scmp.ne.s32.totalorder %s8796_s2, %s7223_s7  ;;  %p7227_p7 = scmp.lt.u32.totalorder %s7223_s7, %s8796_s2 }
 0x2f9   :  { %p7229_p8 = pnand %p7227_p7, %p7224_p6 }
 0x2fb   :  { %7232 = shalt.err (!%p7229_p8)
}
 0x2fc   :  { %s7233_s10 = scalar_lea.vmem %s423_s12, 1024  ;;  %p7238_p10 = scmp.lt.s32.totalorder %s423_s12, %s423_s12 }
 0x2fd   :  { %p7234_p9 = scmp.ne.s32.totalorder %s423_s12, %s7233_s10  ;;  %p7239_p11 = scmp.lt.s32.totalorder %s7233_s10, %s7233_s10 }
 0x2ff   :  { %p7240_p12 = por %p7239_p11, %p7238_p10 }
 0x301   :  { %p7241_p13 = pnand %p7240_p12, %p7234_p9 }
 0x303   :  { %7244 = shalt.err (!%p7241_p13)
}
 0x304   :  { %s8797_s27 = sld [smem:[#allocation117_spill]] }
 0x305   :  { %428 = dma.hbm_to_vmem [thread:$0]  %s8796_s2, 1024, %s423_s12, [#allocation39], %s7622_s19, %s7622_s19, %s7623_s21  }
 0x30a   :  { %s7245_s11 = scalar_lea.hbm %s8797_s27, 1024 }
 0x30b   :  { %p7246_p0 = scmp.ne.s32.totalorder %s8797_s27, %s7245_s11  ;;  %p7249_p1 = scmp.lt.u32.totalorder %s7245_s11, %s8797_s27 }
 0x30d   :  { %p7251_p2 = pnand %p7249_p1, %p7246_p0 }
 0x30f   :  { %7254 = shalt.err (!%p7251_p2)
}
 0x310   :  { %s7255_s15 = scalar_lea.vmem %s8195_s8, 1024  ;;  %p7260_p4 = scmp.lt.s32.totalorder %s8195_s8, %s8195_s8 }
 0x311   :  { %p7256_p3 = scmp.ne.s32.totalorder %s8195_s8, %s7255_s15  ;;  %p7261_p5 = scmp.lt.s32.totalorder %s7255_s15, %s7255_s15 }
 0x313   :  { %p7262_p6 = por %p7261_p5, %p7260_p4 }
 0x315   :  { %p7263_p7 = pnand %p7262_p6, %p7256_p3 }
 0x317   :  { %7266 = shalt.err (!%p7263_p7)
}
 0x318   :  { %s8798_s24 = sld [smem:[#allocation118_spill]]  ;;  %s7654_s16 = smov [#allocation46]  }
 0x319   :  { %450 = dma.hbm_to_vmem [thread:$0]  %s8797_s27, 1024, %s8195_s8, [#allocation42], %s7622_s19, %s7622_s19, %s7623_s21  }
 0x31a   :  { %s466_s18 = sshll.u32 %s7654_s16, 4  ;;  %s7655_s0 = smov [#allocation49]   ;;  %s467_s18 = int_to_ptr.vmem [resolvable:$true] %s466_s18 }
 0x31b   :  { %s491_s9 = sshll.u32 %s7655_s0, 4  ;;  %s492_s9 = int_to_ptr.vmem [resolvable:$true] %s491_s9 }
 0x31e   :  { %s7267_s17 = scalar_lea.hbm %s8798_s24, 1024 }
 0x31f   :  { %p7268_p8 = scmp.ne.s32.totalorder %s8798_s24, %s7267_s17  ;;  %p7271_p9 = scmp.lt.u32.totalorder %s7267_s17, %s8798_s24 }
 0x321   :  { %p7273_p10 = pnand %p7271_p9, %p7268_p8 }
 0x323   :  { %7276 = shalt.err (!%p7273_p10)
}
 0x324   :  { %s7277_s14 = scalar_lea.vmem %s467_s18, 1024  ;;  %p7282_p12 = scmp.lt.s32.totalorder %s467_s18, %s467_s18 }
 0x325   :  { %p7278_p11 = scmp.ne.s32.totalorder %s467_s18, %s7277_s14  ;;  %p7283_p13 = scmp.lt.s32.totalorder %s7277_s14, %s7277_s14 }
 0x327   :  { %p7284_p0 = por %p7283_p13, %p7282_p12 }
 0x329   :  { %p7285_p1 = pnand %p7284_p0, %p7278_p11 }
 0x32b   :  { %7288 = shalt.err (!%p7285_p1)
}
 0x32c   :  { %s8799_s30 = sld [smem:[#allocation120_spill]] }
 0x32d   :  { %472 = dma.hbm_to_vmem [thread:$0]  %s8798_s24, 1024, %s467_s18, [#allocation45], %s7622_s19, %s7622_s19, %s7623_s21  }
 0x332   :  { %s7289_s13 = scalar_lea.hbm %s8799_s30, 16 }
 0x333   :  { %p7290_p2 = scmp.ne.s32.totalorder %s8799_s30, %s7289_s13  ;;  %p7293_p3 = scmp.lt.u32.totalorder %s7289_s13, %s8799_s30 }
 0x335   :  { %p7295_p4 = pnand %p7293_p3, %p7290_p2 }
 0x337   :  { %7298 = shalt.err (!%p7295_p4)
}
 0x338   :  { %s7299_s29 = scalar_lea.vmem %s492_s9, 16  ;;  %s7303_s22 = scalar_lea.vmem %s492_s9, 32 }
 0x339   :  { %p7300_p5 = scmp.ne.s32.totalorder %s492_s9, %s7299_s29  ;;  %p7304_p6 = scmp.lt.s32.totalorder %s492_s9, %s492_s9 }
 0x33a   :  { %p7305_p7 = scmp.lt.s32.totalorder %s7303_s22, %s7299_s29 }
 0x33c   :  { %p7306_p8 = por %p7305_p7, %p7304_p6 }
 0x33e   :  { %p7307_p9 = pnand %p7306_p8, %p7300_p5 }
 0x340   :  { %7310 = shalt.err (!%p7307_p9)
}
 0x341   :  { %s8800_s3 = sld [smem:[#allocation122_spill]]  ;;  %s7656_s23 = smov [#allocation52]  }
 0x342   :  { %494 = dma.hbm_to_vmem [thread:$0]  %s8799_s30, 16, %s492_s9, [#allocation48]  }
 0x343   :  { %s513_s26 = sshll.u32 %s7656_s23, 4  ;;  %s7657_s2 = smov [#allocation55]   ;;  %s514_s26 = int_to_ptr.vmem [resolvable:$true] %s513_s26 }
 0x344   :  { %s542_s6 = sshll.u32 %s7657_s2, 4  ;;  %s8227_s6 = int_to_ptr.vmem [resolvable:$true] %s542_s6 }
 0x347   :  { %s7311_s12 = scalar_lea.hbm %s8800_s3, 16 }
 0x348   :  { %p7312_p10 = scmp.ne.s32.totalorder %s8800_s3, %s7311_s12  ;;  %p7315_p11 = scmp.lt.u32.totalorder %s7311_s12, %s8800_s3 }
 0x34a   :  { %p7317_p12 = pnand %p7315_p11, %p7312_p10 }
 0x34c   :  { %7320 = shalt.err (!%p7317_p12)
}
 0x34d   :  { %s7321_s20 = scalar_lea.vmem %s514_s26, 16  ;;  %s7325_s8 = scalar_lea.vmem %s514_s26, 32 }
 0x34e   :  { %p7322_p13 = scmp.ne.s32.totalorder %s514_s26, %s7321_s20  ;;  %p7326_p0 = scmp.lt.s32.totalorder %s514_s26, %s514_s26 }
 0x34f   :  { %p7327_p1 = scmp.lt.s32.totalorder %s7325_s8, %s7321_s20 }
 0x351   :  { %p7328_p2 = por %p7327_p1, %p7326_p0 }
 0x353   :  { %p7329_p3 = pnand %p7328_p2, %p7322_p13 }
 0x355   :  { %7332 = shalt.err (!%p7329_p3)
}
 0x356   :  { %s8801_s7 = sld [smem:[#allocation128_spill]] }
 0x357   :  { %516 = dma.hbm_to_vmem [thread:$0]  %s8800_s3, 16, %s514_s26, [#allocation51]  }
 0x35c   :  { %s7333_s10 = scalar_lea.hbm %s8801_s7, 1024 }
 0x35d   :  { %p7334_p4 = scmp.ne.s32.totalorder %s8801_s7, %s7333_s10  ;;  %p7337_p5 = scmp.lt.u32.totalorder %s7333_s10, %s8801_s7 }
 0x35f   :  { %p7339_p6 = pnand %p7337_p5, %p7334_p4 }
 0x361   :  { %7342 = shalt.err (!%p7339_p6)
}
 0x362   :  { %s7343_s27 = scalar_lea.vmem %s8227_s6, 1024  ;;  %p7348_p8 = scmp.lt.s32.totalorder %s8227_s6, %s8227_s6 }
 0x363   :  { %p7344_p7 = scmp.ne.s32.totalorder %s8227_s6, %s7343_s27  ;;  %p7349_p9 = scmp.lt.s32.totalorder %s7343_s27, %s7343_s27 }
 0x365   :  { %p7350_p10 = por %p7349_p9, %p7348_p8 }
 0x367   :  { %p7351_p11 = pnand %p7350_p10, %p7344_p7 }
 0x369   :  { %7354 = shalt.err (!%p7351_p11)
}
 0x36a   :  { %s8802_s11 = sld [smem:[#allocation130_spill]]  ;;  %s7658_s15 = smov [#allocation58]  }
 0x36b   :  { %548 = dma.hbm_to_vmem [thread:$0]  %s8801_s7, 1024, %s8227_s6, [#allocation54], %s7622_s19, %s7622_s19, %s7623_s21  }
 0x36c   :  { %s564_s24 = sshll.u32 %s7658_s15, 4  ;;  %s7659_s16 = smov [#allocation61]   ;;  %s565_s24 = int_to_ptr.vmem [resolvable:$true] %s564_s24 }
 0x36d   :  { %s589_s18 = sshll.u32 %s7659_s16, 4  ;;  %s590_s18 = int_to_ptr.vmem [resolvable:$true] %s589_s18 }
 0x370   :  { %s7355_s0 = scalar_lea.hbm %s8802_s11, 1024 }
 0x371   :  { %p7356_p12 = scmp.ne.s32.totalorder %s8802_s11, %s7355_s0  ;;  %p7359_p13 = scmp.lt.u32.totalorder %s7355_s0, %s8802_s11 }
 0x373   :  { %p7361_p0 = pnand %p7359_p13, %p7356_p12 }
 0x375   :  { %7364 = shalt.err (!%p7361_p0)
}
 0x376   :  { %s7365_s9 = scalar_lea.vmem %s565_s24, 1024  ;;  %p7370_p2 = scmp.lt.s32.totalorder %s565_s24, %s565_s24 }
 0x377   :  { %p7366_p1 = scmp.ne.s32.totalorder %s565_s24, %s7365_s9  ;;  %p7371_p3 = scmp.lt.s32.totalorder %s7365_s9, %s7365_s9 }
 0x379   :  { %p7372_p4 = por %p7371_p3, %p7370_p2 }
 0x37b   :  { %p7373_p5 = pnand %p7372_p4, %p7366_p1 }
 0x37d   :  { %7376 = shalt.err (!%p7373_p5)
}
 0x37e   :  { %s8803_s17 = sld [smem:[#allocation132_spill]] }
 0x37f   :  { %570 = dma.hbm_to_vmem [thread:$0]  %s8802_s11, 1024, %s565_s24, [#allocation57], %s7622_s19, %s7622_s19, %s7623_s21  }
 0x384   :  { %s7377_s14 = scalar_lea.hbm %s8803_s17, 16 }
 0x385   :  { %p7378_p6 = scmp.ne.s32.totalorder %s8803_s17, %s7377_s14  ;;  %p7381_p7 = scmp.lt.u32.totalorder %s7377_s14, %s8803_s17 }
 0x387   :  { %p7383_p8 = pnand %p7381_p7, %p7378_p6 }
 0x389   :  { %7386 = shalt.err (!%p7383_p8)
}
 0x38a   :  { %s7387_s30 = scalar_lea.vmem %s590_s18, 16  ;;  %s7391_s13 = scalar_lea.vmem %s590_s18, 32 }
 0x38b   :  { %p7388_p9 = scmp.ne.s32.totalorder %s590_s18, %s7387_s30  ;;  %p7392_p10 = scmp.lt.s32.totalorder %s590_s18, %s590_s18 }
 0x38c   :  { %p7393_p11 = scmp.lt.s32.totalorder %s7391_s13, %s7387_s30 }
 0x38e   :  { %p7394_p12 = por %p7393_p11, %p7392_p10 }
 0x390   :  { %p7395_p13 = pnand %p7394_p12, %p7388_p9 }
 0x392   :  { %7398 = shalt.err (!%p7395_p13)
}
 0x393   :  { %s8804_s29 = sld [smem:[#allocation134_spill]]  ;;  %s7660_s22 = smov [#allocation64]  }
 0x394   :  { %592 = dma.hbm_to_vmem [thread:$0]  %s8803_s17, 16, %s590_s18, [#allocation60]  }
 0x395   :  { %s611_s3 = sshll.u32 %s7660_s22, 4  ;;  %s7661_s23 = smov [#allocation67]   ;;  %s612_s3 = int_to_ptr.vmem [resolvable:$true] %s611_s3 }
 0x396   :  { %s632_s26 = sshll.u32 %s7661_s23, 4  ;;  %s8256_s26 = int_to_ptr.vmem [resolvable:$true] %s632_s26 }
 0x399   :  { %s7399_s2 = scalar_lea.hbm %s8804_s29, 16 }
 0x39a   :  { %p7400_p0 = scmp.ne.s32.totalorder %s8804_s29, %s7399_s2  ;;  %p7403_p1 = scmp.lt.u32.totalorder %s7399_s2, %s8804_s29 }
 0x39c   :  { %p7405_p2 = pnand %p7403_p1, %p7400_p0 }
 0x39e   :  { %7408 = shalt.err (!%p7405_p2)
}
 0x39f   :  { %s7409_s6 = scalar_lea.vmem %s612_s3, 16  ;;  %s7413_s12 = scalar_lea.vmem %s612_s3, 32 }
 0x3a0   :  { %p7410_p3 = scmp.ne.s32.totalorder %s612_s3, %s7409_s6  ;;  %p7414_p4 = scmp.lt.s32.totalorder %s612_s3, %s612_s3 }
 0x3a1   :  { %p7415_p5 = scmp.lt.s32.totalorder %s7413_s12, %s7409_s6 }
 0x3a3   :  { %p7416_p6 = por %p7415_p5, %p7414_p4 }
 0x3a5   :  { %p7417_p7 = pnand %p7416_p6, %p7410_p3 }
 0x3a7   :  { %7420 = shalt.err (!%p7417_p7)
}
 0x3a8   :  { %s8805_s20 = sld [smem:[#allocation136_spill]] }
 0x3a9   :  { %614 = dma.hbm_to_vmem [thread:$0]  %s8804_s29, 16, %s612_s3, [#allocation63]  }
 0x3ae   :  { %s7421_s8 = scalar_lea.hbm %s8805_s20, 1024 }
 0x3af   :  { %p7422_p8 = scmp.ne.s32.totalorder %s8805_s20, %s7421_s8  ;;  %p7425_p9 = scmp.lt.u32.totalorder %s7421_s8, %s8805_s20 }
 0x3b1   :  { %p7427_p10 = pnand %p7425_p9, %p7422_p8 }
 0x3b3   :  { %7430 = shalt.err (!%p7427_p10)
}
 0x3b4   :  { %s7431_s7 = scalar_lea.vmem %s8256_s26, 1024  ;;  %p7436_p12 = scmp.lt.s32.totalorder %s8256_s26, %s8256_s26 }
 0x3b5   :  { %p7432_p11 = scmp.ne.s32.totalorder %s8256_s26, %s7431_s7  ;;  %p7437_p13 = scmp.lt.s32.totalorder %s7431_s7, %s7431_s7 }
 0x3b7   :  { %p7438_p0 = por %p7437_p13, %p7436_p12 }
 0x3b9   :  { %p7439_p1 = pnand %p7438_p0, %p7432_p11 }
 0x3bb   :  { %7442 = shalt.err (!%p7439_p1)
}
 0x3bc   :  { %638 = dma.hbm_to_vmem [thread:$0]  %s8805_s20, 1024, %s8256_s26, [#allocation66], %s7622_s19, %s7622_s19, %s7623_s21  }
 0x3bd   :  { %s7662_s10 = smov [#allocation70]   ;;  %s7663_s11 = smov [#allocation71]  }
 0x3be   :  { %s654_s27 = sshll.u32 %s7662_s10, 4  ;;  %s667_s15 = sshll.u32 %s7663_s11, 4  ;;  %s655_s27 = int_to_ptr.vmem [resolvable:$true] %s654_s27  ;;  %s668_s15 = int_to_ptr.vmem [resolvable:$true] %s667_s15 }
 0x3bf   :  { %s7443_s24 = scalar_lea.hbm %s7941_s4, 1024 }
 0x3c0   :  { %p7444_p2 = scmp.ne.s32.totalorder %s7941_s4, %s7443_s24  ;;  %p7447_p3 = scmp.lt.u32.totalorder %s7443_s24, %s7941_s4 }
 0x3c2   :  { %p7449_p4 = pnand %p7447_p3, %p7444_p2 }
 0x3c4   :  { %7452 = shalt.err (!%p7449_p4)
}
 0x3c5   :  { %s7453_s16 = scalar_lea.vmem %s655_s27, 1024  ;;  %p7458_p6 = scmp.lt.s32.totalorder %s655_s27, %s655_s27 }
 0x3c6   :  { %p7454_p5 = scmp.ne.s32.totalorder %s655_s27, %s7453_s16  ;;  %p7459_p7 = scmp.lt.s32.totalorder %s7453_s16, %s7453_s16 }
 0x3c8   :  { %p7460_p8 = por %p7459_p7, %p7458_p6 }
 0x3ca   :  { %p7461_p9 = pnand %p7460_p8, %p7454_p5 }
 0x3cc   :  { %7464 = shalt.err (!%p7461_p9)
}
 0x3cd   :  { %660 = dma.hbm_to_vmem [thread:$0]  %s7941_s4, 1024, %s655_s27, [#allocation69], %s7622_s19, %s7622_s19, %s7623_s21  }
 0x3ce   :  { %s7465_s18 = scalar_lea.hbm %s7946_s25, 16 }
 0x3cf   :  { %p7466_p10 = scmp.ne.s32.totalorder %s7946_s25, %s7465_s18  ;;  %p7469_p11 = scmp.lt.u32.totalorder %s7465_s18, %s7946_s25 }
 0x3d1   :  { %p7471_p12 = pnand %p7469_p11, %p7466_p10 }
 0x3d3   :  { %7474 = shalt.err (!%p7471_p12)
}
 0x3d4   :  { %s7475_s0 = scalar_lea.vmem %s668_s15, 16  ;;  %s7479_s9 = scalar_lea.vmem %s668_s15, 32 }
 0x3d5   :  { %p7476_p13 = scmp.ne.s32.totalorder %s668_s15, %s7475_s0  ;;  %p7480_p0 = scmp.lt.s32.totalorder %s668_s15, %s668_s15 }
 0x3d6   :  { %p7481_p1 = scmp.lt.s32.totalorder %s7479_s9, %s7475_s0 }
 0x3d8   :  { %p7482_p2 = por %p7481_p1, %p7480_p0 }
 0x3da   :  { %p7483_p3 = pnand %p7482_p2, %p7476_p13 }
 0x3dc   :  { %7486 = shalt.err (!%p7483_p3)
}
 0x3dd   :  { %670 = dma.hbm_to_vmem [thread:$0]  %s7946_s25, 16, %s668_s15, [#allocation72]  }
 0x3de   :  { %7509 = dma.done.wait [#allocation3], 256  }
 0x3df   :  { %7510 = vsyncadd [#allocation3], 4294967040 }
 0x3e0   :  { %7511 = dma.done.wait [#allocation6], 2080  }
 0x3e1   :  { %7512 = vsyncadd [#allocation6], 4294965216 }
 0x3e2   :  { %7513 = dma.done.wait [#allocation9], 6144  }
 0x3e3   :  { %7514 = vsyncadd [#allocation9], 4294961152 }
 0x3e4   :  { %7515 = dma.done.wait [#allocation12], 2064  }
 0x3e5   :  { %7516 = vsyncadd [#allocation12], 4294965232 }
 0x3e6   :  { %7517 = dma.done.wait [#allocation15], 1040  }
 0x3e7   :  { %7518 = vsyncadd [#allocation15], 4294966256 }
 0x3e8   :  { %7519 = dma.done.wait [#allocation18], 1040  }
 0x3e9   :  { %7520 = vsyncadd [#allocation18], 4294966256 }
 0x3ea   :  { %7521 = dma.done.wait [#allocation21], 1040  }
 0x3eb   :  { %7522 = vsyncadd [#allocation21], 4294966256 }
 0x3ec   :  { %7523 = dma.done.wait [#allocation24], 2048  }
 0x3ed   :  { %7524 = vsyncadd [#allocation24], 4294965248 }
 0x3ee   :  { %7525 = dma.done.wait [#allocation27], 1040  }
 0x3ef   :  { %7526 = vsyncadd [#allocation27], 4294966256 }
 0x3f0   :  { %7527 = dma.done.wait [#allocation30], 144  }
 0x3f1   :  { %7528 = vsyncadd [#allocation30], 4294967152 }
 0x3f2   :  { %7529 = dma.done.wait [#allocation33], 1040  }
 0x3f3   :  { %7530 = vsyncadd [#allocation33], 4294966256 }
 0x3f4   :  { %7531 = dma.done.wait [#allocation36], 1040  }
 0x3f5   :  { %7532 = vsyncadd [#allocation36], 4294966256 }
 0x3f6   :  { %7533 = dma.done.wait [#allocation39], 2048  }
 0x3f7   :  { %7534 = vsyncadd [#allocation39], 4294965248 }
 0x3f8   :  { %7535 = dma.done.wait [#allocation42], 1040  }
 0x3f9   :  { %7536 = vsyncadd [#allocation42], 4294966256 }
 0x3fa   :  { %7537 = dma.done.wait [#allocation45], 1040  }
 0x3fb   :  { %7538 = vsyncadd [#allocation45], 4294966256 }
 0x3fc   :  { %7539 = dma.done.wait [#allocation48], 1040  }
 0x3fd   :  { %7540 = vsyncadd [#allocation48], 4294966256 }
 0x3fe   :  { %7541 = dma.done.wait [#allocation51], 1040  }
 0x3ff   :  { %7542 = vsyncadd [#allocation51], 4294966256 }
 0x400   :  { %7543 = dma.done.wait [#allocation54], 2048  }
 0x401   :  { %7544 = vsyncadd [#allocation54], 4294965248 }
 0x402   :  { %7545 = dma.done.wait [#allocation57], 1040  }
 0x403   :  { %7546 = vsyncadd [#allocation57], 4294966256 }
 0x404   :  { %7547 = dma.done.wait [#allocation60], 1040  }
 0x405   :  { %7548 = vsyncadd [#allocation60], 4294966256 }
 0x406   :  { %7549 = dma.done.wait [#allocation63], 1040  }
 0x407   :  { %7550 = vsyncadd [#allocation63], 4294966256 }
 0x408   :  { %7551 = dma.done.wait [#allocation66], 2048  }
 0x409   :  { %7552 = vsyncadd [#allocation66], 4294965248 }
 0x40a   :  { %7553 = dma.done.wait [#allocation69], 1040  }
 0x40b   :  { %7554 = vsyncadd [#allocation69], 4294966256 }
 0x40c   :  { %7555 = dma.done.wait [#allocation72], 16  }
 0x40d   :  { %7556 = vsyncadd [#allocation72], 4294967280  ;;  %v7664_v0 = vmov 0   ;;  %v6162_v1 = vld [vmem:[#allocation5 + $0x4] ss:$8 sps:$4 sm:$0xff]   ;;  %s8806_s25 = sld [smem:[#allocation101_spill]]  ;;  %v836_v56 = vlaneseq }
 0x40e   :  { %958 = vmatprep.mubr.bf16.mxu0 %v7664_v0  ;;  %v6164_v2 = vld [vmem:[#allocation5] ss:$8 sps:$4 sm:$0xff]   ;;  %926 = vmatprep.subr.bf16.mxu0 %v6162_v1  ;;  %v6165_v3 = vld [vmem:[#allocation5 + $0x14] ss:$8 sps:$4 sm:$0xff]   ;;  %v6167_v4 = vld [vmem:[#allocation5 + $0x10] ss:$8 sps:$4 sm:$0xff]  }
 0x40f   :  { %927 = vmatpush1.bf16.msra.mxu0 %v6164_v2  ;;  %v6168_v5 = vld [vmem:[#allocation5 + $0x24] ss:$8 sps:$4 sm:$0xff]   ;;  %v6170_v6 = vld [vmem:[#allocation5 + $0x20] ss:$8 sps:$4 sm:$0xff]   ;;  %v6171_v7 = vld [vmem:[#allocation5 + $0x34] ss:$8 sps:$4 sm:$0xff]  }
 0x410   :  { %928 = vmatprep.subr.bf16.mxu0 %v6165_v3  ;;  %v6173_v8 = vld [vmem:[#allocation5 + $0x30] ss:$8 sps:$4 sm:$0xff]   ;;  %v6174_v9 = vld [vmem:[#allocation5 + $0x44] ss:$8 sps:$4 sm:$0xff]   ;;  %v6176_v10 = vld [vmem:[#allocation5 + $0x40] ss:$8 sps:$4 sm:$0xff]  }
 0x411   :  { %v6177_v11 = vld [vmem:[#allocation5 + $0x54] ss:$8 sps:$4 sm:$0xff]   ;;  %v6179_v12 = vld [vmem:[#allocation5 + $0x50] ss:$8 sps:$4 sm:$0xff]   ;;  %v6180_v13 = vld [vmem:[#allocation5 + $0x64] ss:$8 sps:$4 sm:$0xff]  }
 0x412   :  { %v6182_v14 = vld [vmem:[#allocation5 + $0x60] ss:$8 sps:$4 sm:$0xff]   ;;  %v6183_v15 = vld [vmem:[#allocation5 + $0x74] ss:$8 sps:$4 sm:$0xff]   ;;  %v6185_v16 = vld [vmem:[#allocation5 + $0x70] ss:$8 sps:$4 sm:$0xff]  }
 0x413   :  { %929 = vmatpush1.bf16.msra.mxu0 %v6167_v4  ;;  %v814_v17 = vld [vmem:[%s8806_s25] sm:$0xff]  ;;  %v8287_v19 = vld [vmem:[#allocation2] sm:$0xff]  ;;  %v6188_v25 = vld [vmem:[#allocation8] ss:$8 sps:$4 sm:$0xff]   ;;  %v837_v57 = vshrl.u32 %v836_v56, 7  ;;  %s8807_s4 = sld [smem:[#allocation99_spill]] }
 0x414   :  { %930 = vmatprep.subr.bf16.mxu0 %v6168_v5  ;;  %v834_v18 = vpack.c.bf16 %v814_v17, %v814_v17  ;;  %v8289_v20 = vld [vmem:[#allocation2 + $0x8] sm:$0xff]  ;;  %v967_v21 = vmul.f32 %v8287_v19, %v8287_v19  ;;  %v6186_v24 = vld [vmem:[#allocation8 + $0x4] ss:$8 sps:$4 sm:$0xff]   ;;  %v6194_v31 = vld [vmem:[#allocation8 + $0x20] ss:$8 sps:$4 sm:$0xff]   ;;  %vm1295_vm0 = vcmask 130048  }
 0x415   :  { %v968_v22 = vmul.f32 %v8289_v20, %v8289_v20  ;;  %v6189_v26 = vld [vmem:[#allocation8 + $0x14] ss:$8 sps:$4 sm:$0xff]   ;;  %1245 = vmatprep.subr.bf16.mxu1 %v6186_v24  ;;  %v6191_v27 = vld [vmem:[#allocation8 + $0x10] ss:$8 sps:$4 sm:$0xff]   ;;  %v6192_v28 = vld [vmem:[#allocation8 + $0x24] ss:$8 sps:$4 sm:$0xff]  }
 0x416   :  { %1246 = vmatpush1.bf16.msra.mxu1 %v6188_v25  ;;  %v6212_v29 = vld [vmem:[#allocation10 + $0x40] sm:$0xff]   ;;  %v6217_v32 = vld [vmem:[#allocation10 + $0x48] sm:$0xff]   ;;  %v6195_v33 = vld [vmem:[#allocation8 + $0x34] ss:$8 sps:$4 sm:$0xff]   ;;  %v838_v58 = vsub.s32 0, %v837_v57  ;;  %v842_v60 = vsub.s32 1, %v837_v57 }
 0x417   :  { %931 = vmatpush1.bf16.msra.mxu0 %v6170_v6  ;;  %v969_v23 = vadd.f32 %v968_v22, %v967_v21  ;;  %1247 = vmatprep.subr.bf16.mxu1 %v6189_v26  ;;  %v6214_v30 = vld [vmem:[#allocation10] sm:$0xff]   ;;  %v6219_v34 = vld [vmem:[#allocation10 + $0x8] sm:$0xff]   ;;  %v6222_v35 = vld [vmem:[#allocation10 + $0x50] sm:$0xff]   ;;  %s8808_s19 = sld [smem:[#allocation100_spill]]  ;;  %vm7666_vm5 = vmmov 0   ;;  %s8809_s21 = sld [smem:[#allocation111_spill]] }
 0x418   :  { %932 = vmatprep.subr.bf16.mxu0 %v6171_v7  ;;  %v6197_v36 = vld [vmem:[#allocation8 + $0x30] ss:$8 sps:$4 sm:$0xff]   ;;  %v6198_v37 = vld [vmem:[#allocation8 + $0x44] ss:$8 sps:$4 sm:$0xff]   ;;  %v6200_v39 = vld [vmem:[#allocation8 + $0x40] ss:$8 sps:$4 sm:$0xff]  }
 0x419   :  { %970 = vadd.xlane.f32.xlu0 %v969_v23  ;;  %v6224_v38 = vld [vmem:[#allocation10 + $0x10] sm:$0xff]   ;;  %v6227_v40 = vld [vmem:[#allocation10 + $0x58] sm:$0xff]   ;;  %v6204_v44 = vld [vmem:[#allocation8 + $0x64] ss:$8 sps:$4 sm:$0xff]   ;;  %s8810_s17 = sld [smem:[#allocation113_spill]]  ;;  %s8811_s14 = sld [smem:[#allocation123_spill]] }
 0x41a   :  { %1248 = vmatpush1.bf16.msra.mxu1 %v6191_v27  ;;  %v6201_v41 = vld [vmem:[#allocation8 + $0x54] ss:$8 sps:$4 sm:$0xff]   ;;  %v6203_v43 = vld [vmem:[#allocation8 + $0x50] ss:$8 sps:$4 sm:$0xff]   ;;  %v6206_v45 = vld [vmem:[#allocation8 + $0x60] ss:$8 sps:$4 sm:$0xff]  }
 0x41b   :  { %933 = vmatpush1.bf16.msra.mxu0 %v6173_v8  ;;  %1249 = vmatprep.subr.bf16.mxu1 %v6192_v28  ;;  %v6229_v42 = vld [vmem:[#allocation10 + $0x18] sm:$0xff]   ;;  %v6210_v48 = vld [vmem:[#allocation8 + $0x84] ss:$8 sps:$4 sm:$0xff]   ;;  %v6213_v49 = vld [vmem:[#allocation8 + $0x80] ss:$8 sps:$4 sm:$0xff]   ;;  %s8812_s30 = sld [smem:[#allocation124_spill]] }
 0x41c   :  { %934 = vmatprep.subr.bf16.mxu0 %v6174_v9  ;;  %v6207_v46 = vld [vmem:[#allocation8 + $0x74] ss:$8 sps:$4 sm:$0xff]   ;;  %v6209_v47 = vld [vmem:[#allocation8 + $0x70] ss:$8 sps:$4 sm:$0xff]   ;;  %v6220_v52 = vld [vmem:[#allocation8 + $0xa4] ss:$8 sps:$4 sm:$0xff]  }
 0x41d   :  { %v6215_v50 = vld [vmem:[#allocation8 + $0x94] ss:$8 sps:$4 sm:$0xff]   ;;  %v6218_v51 = vld [vmem:[#allocation8 + $0x90] ss:$8 sps:$4 sm:$0xff]   ;;  %v6223_v53 = vld [vmem:[#allocation8 + $0xa0] ss:$8 sps:$4 sm:$0xff]  }
 0x41e   :  { %1250 = vmatpush1.bf16.msra.mxu1 %v6194_v31  ;;  %v6225_v54 = vld [vmem:[#allocation8 + $0xb4] ss:$8 sps:$4 sm:$0xff]   ;;  %v6228_v55 = vld [vmem:[#allocation8 + $0xb0] ss:$8 sps:$4 sm:$0xff]   ;;  %v6230_v9 = vld [vmem:[#allocation8 + $0xc4] ss:$8 sps:$4 sm:$0xff]  }
 0x41f   :  { %935 = vmatpush1.bf16.msra.mxu0 %v6176_v10  ;;  %1251 = vmatprep.subr.bf16.mxu1 %v6195_v33  ;;  %v833_v59 = vld [vmem:[#allocation7] sm:$0x3]  ;;  %v6232_v10 = vld [vmem:[#allocation10 + $0x60] sm:$0xff]   ;;  %v6244_v22 = vld [vmem:[#allocation10 + $0x30] sm:$0xff]   ;;  %s8813_s13 = sld [smem:[#allocation125_spill]]  ;;  %s8814_s29 = sld [smem:[#allocation127_spill]] }
 0x420   :  { %936 = vmatprep.subr.bf16.mxu0 %v6177_v11  ;;  %v839_v61 = vrot.slane %v833_v59, %v838_v58  ;;  %v843_v62 = vrot.slane %v833_v59, %v842_v60  ;;  %v6233_v11 = vld [vmem:[#allocation8 + $0xc0] ss:$8 sps:$4 sm:$0xff]   ;;  %v6240_v17 = vld [vmem:[#allocation8 + $0xe4] ss:$8 sps:$4 sm:$0xff]   ;;  %v6245_v23 = vld [vmem:[#allocation8 + $0xf4] ss:$8 sps:$4 sm:$0xff]  }
 0x421   :  { %v6243_v21 = vld [vmem:[#allocation8 + $0xe0] ss:$8 sps:$4 sm:$0xff]   ;;  %v6247_v24 = vld [vmem:[#allocation10 + $0x78] sm:$0xff]   ;;  %s7667_s22 = smov [#allocation73]  }
 0x422   :  { %1252 = vmatpush1.bf16.msra.mxu1 %v6197_v36  ;;  %v6248_v25 = vld [vmem:[#allocation8 + $0xf0] ss:$8 sps:$4 sm:$0xff]   ;;  %v6259_v57 = vld [vmem:[#allocation13 + $0x60] sm:$0xff]   ;;  %s4859_s3 = sshll.u32 %s7667_s22, 4  ;;  %s4860_s3 = int_to_ptr.vmem [resolvable:$true] %s4859_s3 }
 0x423   :  { %937 = vmatpush1.bf16.msra.mxu0 %v6179_v12  ;;  %1253 = vmatprep.subr.bf16.mxu1 %v6198_v37  ;;  %v6234_v12 = vld [vmem:[#allocation10 + $0x20] sm:$0xff]   ;;  %v6249_v26 = vld [vmem:[#allocation10 + $0x38] sm:$0xff]   ;;  %v6261_v59 = vld [vmem:[#allocation13 + $0x68] sm:$0xff]   ;;  %s7487_s23 = scalar_lea.vmem %s4860_s3, 256  ;;  %p7492_p5 = scmp.lt.s32.totalorder %s4860_s3, %s4860_s3 }
 0x424   :  { %938 = vmatprep.subr.bf16.mxu0 %v6180_v13  ;;  %v6235_v13 = vld [vmem:[#allocation8 + $0xd4] ss:$8 sps:$4 sm:$0xff]   ;;  %v6260_v58 = vld [vmem:[#allocation13 + $0x20] sm:$0xff]   ;;  %v6262_v60 = vld [vmem:[#allocation13 + $0x28] sm:$0xff]   ;;  %p7488_p4 = scmp.ne.s32.totalorder %s4860_s3, %s7487_s23  ;;  %p7493_p6 = scmp.lt.s32.totalorder %s7487_s23, %s7487_s23 }
 0x425   :  { %v6258_v56 = vld [vmem:[#allocation13 + $0x18] sm:$0xff]  }
 0x426   :  { %1254 = vmatpush1.bf16.msra.mxu1 %v6200_v39  ;;  %p7494_p7 = por %p7493_p6, %p7492_p5 }
 0x427   :  { %939 = vmatpush1.bf16.msra.mxu0 %v6182_v14  ;;  %1255 = vmatprep.subr.bf16.mxu1 %v6201_v41  ;;  %v6237_v14 = vld [vmem:[#allocation10 + $0x68] sm:$0xff]  }
 0x428   :  { %940 = vmatprep.subr.bf16.mxu0 %v6183_v15  ;;  %v6238_v15 = vld [vmem:[#allocation8 + $0xd0] ss:$8 sps:$4 sm:$0xff]   ;;  %p7495_p8 = pnand %p7494_p7, %p7488_p4 }
 0x42a   :  { %1256 = vmatpush1.bf16.msra.mxu1 %v6203_v43 }
 0x42b   :  { %941 = vmatpush1.bf16.msra.mxu0 %v6185_v16  ;;  %1257 = vmatprep.subr.bf16.mxu1 %v6204_v44  ;;  %v6239_v16 = vld [vmem:[#allocation10 + $0x28] sm:$0xff]  }
 0x42c   :  { %5249 = vmatprep.subr.bf16.mxu0 %v6212_v29 }
 0x42e   :  { %959 = vmatmul.mubr.bf16.vlgmr.msra.gmra.mrb[0].mxu0 %v834_v18  ;;  %1258 = vmatpush1.bf16.msra.mxu1 %v6206_v45  ;;  %v6242_v18 = vld [vmem:[#allocation10 + $0x70] sm:$0xff]  }
 0x42f   :  { %5250 = vmatpush3.bf16.msra.mxu0 %v6214_v30  ;;  %1259 = vmatprep.subr.bf16.mxu1 %v6207_v46 }
 0x430   :  { %5251 = vmatprep.subr.bf16.mxu0 %v6217_v32 }
 0x432   :  { %1260 = vmatpush1.bf16.msra.mxu1 %v6209_v47 }
 0x433   :  { %5252 = vmatpush3.bf16.msra.mxu0 %v6219_v34  ;;  %1261 = vmatprep.subr.bf16.mxu1 %v6210_v48 }
 0x434   :  { %5253 = vmatprep.subr.bf16.mxu0 %v6222_v35 }
 0x436   :  { %1262 = vmatpush1.bf16.msra.mxu1 %v6213_v49  ;;  %v6251_v49 = vld [vmem:[#allocation13 + $0x40] sm:$0xff]  }
 0x437   :  { %5254 = vmatpush3.bf16.msra.mxu0 %v6224_v38  ;;  %1263 = vmatprep.subr.bf16.mxu1 %v6215_v50  ;;  %v8303_v50 = vld [vmem:[%s8807_s4] sm:$0xff]  }
 0x438   :  { %5255 = vmatprep.subr.bf16.mxu0 %v6227_v40 }
 0x43a   :  { %1264 = vmatpush1.bf16.msra.mxu1 %v6218_v51  ;;  %v6253_v51 = vld [vmem:[#allocation13 + $0x48] sm:$0xff]  }
 0x43b   :  { %5256 = vmatpush3.bf16.msra.mxu0 %v6229_v42  ;;  %1265 = vmatprep.subr.bf16.mxu1 %v6220_v52  ;;  %v6254_v52 = vld [vmem:[#allocation13 + $0x8] sm:$0xff]  }
 0x43c   :  { %5257 = vmatprep.subr.bf16.mxu0 %v6232_v10 }
 0x43e   :  { %1266 = vmatpush1.bf16.msra.mxu1 %v6223_v53  ;;  %v6255_v53 = vld [vmem:[#allocation13 + $0x50] sm:$0xff]  }
 0x43f   :  { %1267 = vmatprep.subr.bf16.mxu1 %v6225_v54  ;;  %5258 = vmatpush3.bf16.msra.mxu0 %v6234_v12  ;;  %v6256_v54 = vld [vmem:[#allocation13 + $0x10] sm:$0xff]  }
 0x440   :  { %5259 = vmatprep.subr.bf16.mxu0 %v6237_v14 }
 0x442   :  { %1268 = vmatpush1.bf16.msra.mxu1 %v6228_v55  ;;  %v6257_v55 = vld [vmem:[#allocation13 + $0x58] sm:$0xff]  }
 0x443   :  { %1269 = vmatprep.subr.bf16.mxu1 %v6230_v9  ;;  %5260 = vmatpush3.bf16.msra.mxu0 %v6239_v16 }
 0x444   :  { %5261 = vmatprep.subr.bf16.mxu0 %v6242_v18 }
 0x446   :  { %1270 = vmatpush1.bf16.msra.mxu1 %v6233_v11 }
 0x447   :  { %1271 = vmatprep.subr.bf16.mxu1 %v6235_v13  ;;  %5262 = vmatpush3.bf16.msra.mxu0 %v6244_v22 }
 0x448   :  { %5263 = vmatprep.subr.bf16.mxu0 %v6247_v24  ;;  %v6272_v24 = vld [vmem:[#allocation16 + $0x28] sm:$0xff]  }
 0x44a   :  { %1272 = vmatpush1.bf16.msra.mxu1 %v6238_v15 }
 0x44b   :  { %1273 = vmatprep.subr.bf16.mxu1 %v6240_v17  ;;  %5264 = vmatpush3.bf16.msra.mxu0 %v6249_v26  ;;  %v6274_v26 = vld [vmem:[#allocation16 + $0x38] sm:$0xff]  }
 0x44e   :  { %1274 = vmatpush1.bf16.msra.mxu1 %v6243_v21 }
 0x44f   :  { %1275 = vmatprep.subr.bf16.mxu1 %v6245_v23 }
 0x452   :  { %1276 = vmatpush1.bf16.msra.mxu1 %v6248_v25  ;;  %v6273_v25 = vld [vmem:[#allocation16 + $0x30] sm:$0xff]  }
 0x4a6   :  { %v971_v27 = vpop.xlane.xlu0 %970 }
 0x4a7   :  { %v972_v28 = vmax.f32 %v971_v27, 1e-24  ;;  %v4999_v27 = vld [vmem:[#allocation11] ss:$0 sm:$0xff] }
 0x4a9   :  { %6459 = vrsqrt.f32 %v972_v28 }
 0x4b3   :  { %v6460_v31 = vpop.eup %6459 }
 0x4b4   :  { %v975_v33 = vmul.f32 %v6460_v31, %v8289_v20  ;;  %v974_v35 = vmul.f32 %v6460_v31, %v8287_v19 }
 0x501   :  { %v960_v63 = vpop.f32.mrb[0].mxu0 }
 0x502   :  { %v961_v1 = vadd.f32 %v960_v63, %v839_v61  ;;  %v962_v2 = vpop.f32.mrb[1].mxu0  ;;  %v6263_v61 = vld [vmem:[#allocation13 + $0x70] sm:$0xff]   ;;  %v6265_v63 = vld [vmem:[#allocation13 + $0x78] sm:$0xff]  }
 0x503   :  { %v963_v3 = vadd.f32 %v962_v2, %v843_v62  ;;  %v964_v4 = vpop.f32.mrb[2].mxu0  ;;  %v6264_v62 = vld [vmem:[#allocation13 + $0x30] sm:$0xff]   ;;  %v6267_v2 = vld [vmem:[#allocation16] sm:$0xff]  }
 0x504   :  { %v976_v5 = vmul.f32 %v961_v1, %v961_v1  ;;  %v965_v6 = vpop.f32.mrb[3].mxu0  ;;  %v6268_v4 = vld [vmem:[#allocation16 + $0x8] sm:$0xff]  }
 0x505   :  { %v977_v7 = vmul.f32 %v963_v3, %v963_v3  ;;  %v6270_v6 = vld [vmem:[#allocation16 + $0x18] sm:$0xff]  }
 0x507   :  { %v978_v8 = vadd.f32 %v977_v7, %v976_v5  ;;  %v6269_v5 = vld [vmem:[#allocation16 + $0x10] sm:$0xff]   ;;  %v6271_v7 = vld [vmem:[#allocation16 + $0x20] sm:$0xff]  }
 0x509   :  { %979 = vadd.xlane.f32.xlu0 %v978_v8 }
 0x596   :  { %v980_v29 = vpop.xlane.xlu0 %979 }
 0x597   :  { %v981_v30 = vmax.f32 %v980_v29, 1e-24 }
 0x599   :  { %6461 = vrsqrt.f32 %v981_v30 }
 0x5a3   :  { %v6462_v32 = vpop.eup %6461 }
 0x5a4   :  { %v984_v34 = vmul.f32 %v6462_v32, %v963_v3  ;;  %v983_v36 = vmul.f32 %v6462_v32, %v961_v1  ;;  %v6266_v1 = vld [vmem:[#allocation13 + $0x38] sm:$0xff]   ;;  %v7665_v3 = vmov 0.0  }
 0x5a5   :  { %5525 = vmatprep.subr.bf16.mxu0 %v7665_v3 }
 0x5a6   :  { %v1084_v37 = vpack.c.bf16 %v984_v34, %v975_v33  ;;  %v1083_v38 = vpack.c.bf16 %v983_v36, %v974_v35  ;;  %v8324_v34 = vld [vmem:[%s8808_s19] sm:$0xff]  ;;  %v5016_v35 = vld [vmem:[#allocation14] ss:$0 sm:$0xff] }
 0x5a8   :  { %1277 = vmatprep.mubr.bf16.mxu1 %v1084_v37  ;;  %1488 = vmatprep.mubr.bf16.mxu0 %v1084_v37 }
 0x5a9   :  { %1278 = vmatmul.mubr.bf16.vlgmr.msra.gmra.mrb[0].mxu1 %v1083_v38  ;;  %1489 = vmatmul.mubr.bf16.vlgmr.msra.gmra.mrb[4].mxu0 %v1083_v38 }
 0x5aa   :  { %1331 = vmatprep.mubr.bf16.mxu1 %v7664_v0  ;;  %v6252_v0 = vld [vmem:[#allocation13] sm:$0xff]   ;;  %5526 = vmatpush3.bf16.msra.mxu0 %v6267_v2 }
 0x5ab   :  { %5527 = vmatprep.subr.bf16.mxu0 %v7665_v3  ;;  %5541 = vmatprep.mubr.msk.bf16.mxu0 %vm7666_vm5, %v7665_v3  ;;  %v6283_v2 = vld [vmem:[#allocation20] sm:$0xff]  }
 0x5ae   :  { %5528 = vmatpush3.bf16.msra.mxu0 %v6268_v4  ;;  %v6284_v4 = vld [vmem:[#allocation20 + $0x8] sm:$0xff]  }
 0x5af   :  { %5529 = vmatprep.subr.bf16.mxu0 %v7665_v3 }
 0x5b2   :  { %5530 = vmatpush3.bf16.msra.mxu0 %v6269_v5  ;;  %v6285_v5 = vld [vmem:[#allocation20 + $0x10] sm:$0xff]  }
 0x5b3   :  { %5531 = vmatprep.subr.bf16.mxu0 %v7665_v3 }
 0x5b6   :  { %5532 = vmatpush3.bf16.msra.mxu0 %v6270_v6  ;;  %v6286_v6 = vld [vmem:[#allocation20 + $0x18] sm:$0xff]  }
 0x5b7   :  { %5533 = vmatprep.subr.bf16.mxu0 %v7665_v3 }
 0x5ba   :  { %5534 = vmatpush3.bf16.msra.mxu0 %v6271_v7  ;;  %v6287_v7 = vld [vmem:[#allocation20 + $0x20] sm:$0xff]  }
 0x5bb   :  { %5535 = vmatprep.subr.bf16.mxu0 %v7665_v3 }
 0x5be   :  { %5536 = vmatpush3.bf16.msra.mxu0 %v6272_v24 }
 0x5bf   :  { %5537 = vmatprep.subr.bf16.mxu0 %v7665_v3 }
 0x5c2   :  { %5538 = vmatpush3.bf16.msra.mxu0 %v6273_v25 }
 0x5c3   :  { %5539 = vmatprep.subr.bf16.mxu0 %v7665_v3 }
 0x5c6   :  { %5540 = vmatpush3.bf16.msra.mxu0 %v6274_v26 }
 0x5c7   :  { %5551 = vmatprep.subr.bf16.mxu0 %v7665_v3 }
 0x67c   :  { %v1279_v39 = vpop.f32.mrb[0].mxu1  ;;  %v5265_v40 = vpop.f32.mrb[4].mxu0 }
 0x67d   :  { %v1281_v41 = vpop.f32.mrb[1].mxu1  ;;  %v5266_v42 = vpop.f32.mrb[5].mxu0 }
 0x67e   :  { %v8298_v43 = vadd.f32 %v5266_v42, %v5265_v40  ;;  %v1283_v20 = vpop.f32.mrb[2].mxu1  ;;  %v5268_v44 = vpop.f32.mrb[6].mxu0  ;;  %v8327_v40 = vld [vmem:[%s8808_s19 + $0x8] sm:$0xff] }
 0x67f   :  { %v1288_v45 = vpack.c.bf16 %v1283_v20, %v1279_v39  ;;  %v1285_v19 = vpop.f32.mrb[3].mxu1  ;;  %v5269_v46 = vpop.f32.mrb[7].mxu0 }
 0x680   :  { %v1289_v47 = vpack.c.bf16 %v1285_v19, %v1281_v41  ;;  %v8300_v48 = vadd.f32 %v5269_v46, %v5268_v44  ;;  %v1491_v28 = vadd.f32 %v8298_v43, %v4999_v27 }
 0x682   :  { %1299 = vmatprep.subr.bf16.mxu1 %v1289_v47  ;;  %v1494_v29 = vadd.f32 %v8300_v48, %v4999_v27  ;;  %v1499_v30 = vmul.f32 0.01, %v1491_v28  ;;  %vm1497_vm6 = vcmp.ge.f32.partialorder %v1491_v28, 0.0 }
 0x683   :  { %1300 = vmatpush1.bf16.msra.mxu1 %v1288_v45 }
 0x684   :  { %5271 = vmatprep.subr.bf16.mxu1 %v6251_v49  ;;  %v1500_v31 = vmul.f32 0.01, %v1494_v29  ;;  %vm1498_vm7 = vcmp.ge.f32.partialorder %v1494_v29, 0.0  ;;  %v1501_v33 = vsel %vm1497_vm6, %v1491_v28, %v1499_v30 }
 0x685   :  { %v1503_v42 = vadd.f32 %v1501_v33, %v8324_v34  ;;  %v6298_v33 = vld [vmem:[#allocation23 + $0x38] sm:$0xff]  }
 0x686   :  { %4998 = vmatmul.mubr.msk.bf16.vlgmr.msra.gmra.mrb[4].mxu1 %vm1295_vm0, %v8303_v50  ;;  %v1502_v39 = vsel %vm1498_vm7, %v1494_v29, %v1500_v31  ;;  %v6296_v31 = vld [vmem:[#allocation23 + $0x28] sm:$0xff]  }
 0x687   :  { %5272 = vmatpush3.bf16.msra.mxu1 %v6252_v0  ;;  %v1504_v45 = vadd.f32 %v1502_v39, %v8327_v40  ;;  %v5042_v39 = vld [vmem:[#allocation19] ss:$0 sm:$0xff] }
 0x688   :  { %5273 = vmatprep.subr.bf16.mxu1 %v6253_v51  ;;  %v6275_v51 = vld [vmem:[#allocation17] sm:$0xff]  }
 0x68b   :  { %5274 = vmatpush3.bf16.msra.mxu1 %v6254_v52 }
 0x68c   :  { %5275 = vmatprep.subr.bf16.mxu1 %v6255_v53  ;;  %v6276_v53 = vld [vmem:[#allocation17 + $0x8] sm:$0xff]  }
 0x68f   :  { %5276 = vmatpush3.bf16.msra.mxu1 %v6256_v54  ;;  %v6277_v54 = vld [vmem:[#allocation17 + $0x10] sm:$0xff]  }
 0x690   :  { %5277 = vmatprep.subr.bf16.mxu1 %v6257_v55  ;;  %v6278_v55 = vld [vmem:[#allocation17 + $0x18] sm:$0xff]  }
 0x693   :  { %5278 = vmatpush3.bf16.msra.mxu1 %v6258_v56  ;;  %v6279_v56 = vld [vmem:[#allocation17 + $0x20] sm:$0xff]  }
 0x694   :  { %5279 = vmatprep.subr.bf16.mxu1 %v6259_v57  ;;  %v6280_v57 = vld [vmem:[#allocation17 + $0x28] sm:$0xff]  }
 0x697   :  { %5280 = vmatpush3.bf16.msra.mxu1 %v6260_v58  ;;  %v6281_v58 = vld [vmem:[#allocation17 + $0x30] sm:$0xff]  }
 0x698   :  { %5281 = vmatprep.subr.bf16.mxu1 %v6261_v59  ;;  %v6282_v59 = vld [vmem:[#allocation17 + $0x38] sm:$0xff]  }
 0x69b   :  { %5282 = vmatpush3.bf16.msra.mxu1 %v6262_v60 }
 0x69c   :  { %5283 = vmatprep.subr.bf16.mxu1 %v6263_v61 }
 0x69f   :  { %5284 = vmatpush3.bf16.msra.mxu1 %v6264_v62 }
 0x6a0   :  { %5285 = vmatprep.subr.bf16.mxu1 %v6265_v63 }
 0x6a3   :  { %5286 = vmatpush3.bf16.msra.mxu1 %v6266_v1 }
 0x6a4   :  { %5545 = vmatprep.subr.bf16.mxu1 %v7665_v3 }
 0x759   :  { %v1333_v8 = vpop.f32.mrb[4].mxu1 }
 0x75a   :  { %v1346_v9 = vmul.f32 0.01, %v1333_v8  ;;  %v1335_v10 = vpop.f32.mrb[5].mxu1  ;;  %vm1342_vm1 = vcmp.ge.f32.partialorder %v1333_v8, 0.0 }
 0x75b   :  { %v1347_v11 = vmul.f32 0.01, %v1335_v10  ;;  %v1337_v12 = vpop.f32.mrb[6].mxu1  ;;  %vm1343_vm2 = vcmp.ge.f32.partialorder %v1335_v10, 0.0 }
 0x75c   :  { %vm1344_vm3 = vcmp.ge.f32.partialorder %v1337_v12, 0.0  ;;  %v1348_v13 = vmul.f32 0.01, %v1337_v12  ;;  %v1339_v14 = vpop.f32.mrb[7].mxu1  ;;  %v1350_v16 = vsel %vm1342_vm1, %v1333_v8, %v1346_v9  ;;  %v6288_v8 = vld [vmem:[#allocation20 + $0x28] sm:$0xff]  }
 0x75d   :  { %vm1345_vm4 = vcmp.ge.f32.partialorder %v1339_v14, 0.0  ;;  %v1349_v15 = vmul.f32 0.01, %v1339_v14  ;;  %v1351_v18 = vsel %vm1343_vm2, %v1335_v10, %v1347_v11 }
 0x75e   :  { %v1352_v17 = vsel %vm1344_vm3, %v1337_v12, %v1348_v13  ;;  %v6289_v13 = vld [vmem:[#allocation20 + $0x30] sm:$0xff]  }
 0x75f   :  { %v1505_v21 = vpack.c.bf16 %v1352_v17, %v1350_v16  ;;  %v1353_v22 = vsel %vm1345_vm4, %v1339_v14, %v1349_v15  ;;  %v6290_v14 = vld [vmem:[#allocation20 + $0x38] sm:$0xff]   ;;  %v6291_v15 = vld [vmem:[#allocation23] sm:$0xff]   ;;  %v6292_v16 = vld [vmem:[#allocation23 + $0x8] sm:$0xff]  }
 0x760   :  { %v1506_v23 = vpack.c.bf16 %v1353_v22, %v1351_v18  ;;  %v6293_v17 = vld [vmem:[#allocation23 + $0x10] sm:$0xff]   ;;  %v6294_v18 = vld [vmem:[#allocation23 + $0x18] sm:$0xff]  }
 0x762   :  { %1641 = vmatprep.mubr.bf16.mxu1 %v1506_v23 }
 0x763   :  { %1642 = vmatmul.mubr.bf16.vlgmr.msra.gmra.mrb[8].mxu1 %v1505_v21  ;;  %v6295_v21 = vld [vmem:[#allocation23 + $0x20] sm:$0xff]  }
 0x764   :  { %5547 = vmatprep.mubr.msk.bf16.mxu1 %vm7666_vm5, %v7665_v3 }
 0x836   :  { %v5287_v32 = vpop.f32.mrb[8].mxu1 }
 0x837   :  { %v5288_v36 = vpop.f32.mrb[9].mxu1 }
 0x838   :  { %v5289_v37 = vadd.f32 %v5288_v36, %v5287_v32  ;;  %v5290_v38 = vpop.f32.mrb[10].mxu1  ;;  %v6297_v32 = vld [vmem:[#allocation23 + $0x30] sm:$0xff]  }
 0x839   :  { %v5291_v41 = vpop.f32.mrb[11].mxu1  ;;  %v8369_v36 = vld [vmem:[%s8809_s21] sm:$0xff] }
 0x83a   :  { %v1644_v43 = vadd.f32 %v5289_v37, %v5016_v35  ;;  %v5292_v20 = vadd.f32 %v5291_v41, %v5290_v38  ;;  %v2456_v38 = vmul.f32 %v8369_v36, %v8369_v36 }
 0x83c   :  { %v1650_v44 = vadd.f32 %v1644_v43, %v1503_v42  ;;  %v1647_v19 = vadd.f32 %v5292_v20, %v5016_v35  ;;  %v8366_v35 = vld [vmem:[#allocation31] sm:$0xff] }
 0x83d   :  { %v2450_v37 = vmul.f32 %v8366_v35, %v8366_v35 }
 0x83e   :  { %v1654_v46 = vmul.f32 0.01, %v1650_v44  ;;  %v1651_v47 = vadd.f32 %v1647_v19, %v1504_v45  ;;  %vm1652_vm8 = vcmp.ge.f32.partialorder %v1650_v44, 0.0  ;;  %v5051_v45 = vld [vmem:[#allocation22] ss:$0 sm:$0xff] }
 0x83f   :  { %2451 = vadd.xlane.f32.xlu1 %v2450_v37 }
 0x840   :  { %vm1653_vm9 = vcmp.ge.f32.partialorder %v1651_v47, 0.0  ;;  %v1655_v48 = vmul.f32 0.01, %v1651_v47  ;;  %v1656_v49 = vsel %vm1652_vm8, %v1650_v44, %v1654_v46 }
 0x842   :  { %v1657_v0 = vsel %vm1653_vm9, %v1651_v47, %v1655_v48 }
 0x843   :  { %v1708_v52 = vpack.c.bf16 %v1657_v0, %v1656_v49  ;;  %2457 = vadd.xlane.f32.xlu1 %v2456_v38 }
 0x845   :  { %5542 = vmatmul.mubr.bf16.vlgmr.msra.gmra.mrb[8].mxu0 %v1708_v52 }
 0x846   :  { %5552 = vmatpush3.bf16.msra.mxu0 %v6275_v51  ;;  %5567 = vmatprep.mubr.msk.bf16.mxu0 %vm7666_vm5, %v7665_v3 }
 0x847   :  { %5553 = vmatprep.subr.bf16.mxu0 %v7665_v3 }
 0x84a   :  { %5554 = vmatpush3.bf16.msra.mxu0 %v6276_v53 }
 0x84b   :  { %5555 = vmatprep.subr.bf16.mxu0 %v7665_v3 }
 0x84e   :  { %5556 = vmatpush3.bf16.msra.mxu0 %v6277_v54 }
 0x84f   :  { %5557 = vmatprep.subr.bf16.mxu0 %v7665_v3 }
 0x852   :  { %5558 = vmatpush3.bf16.msra.mxu0 %v6278_v55 }
 0x853   :  { %5559 = vmatprep.subr.bf16.mxu0 %v7665_v3 }
 0x856   :  { %5560 = vmatpush3.bf16.msra.mxu0 %v6279_v56 }
 0x857   :  { %5561 = vmatprep.subr.bf16.mxu0 %v7665_v3 }
 0x85a   :  { %5562 = vmatpush3.bf16.msra.mxu0 %v6280_v57 }
 0x85b   :  { %5563 = vmatprep.subr.bf16.mxu0 %v7665_v3 }
 0x85e   :  { %5564 = vmatpush3.bf16.msra.mxu0 %v6281_v58 }
 0x85f   :  { %5565 = vmatprep.subr.bf16.mxu0 %v7665_v3 }
 0x862   :  { %5566 = vmatpush3.bf16.msra.mxu0 %v6282_v59 }
 0x863   :  { %5591 = vmatprep.subr.bf16.mxu0 %v7665_v3 }
 0x865   :  { %5568 = vmatmul.mubr.bf16.vlgmr.msra.gmra.mrb[12].mxu0 %v1708_v52 }
 0x866   :  { %5607 = vmatprep.mubr.msk.bf16.mxu0 %vm7666_vm5, %v7665_v3  ;;  %5592 = vmatpush3.bf16.msra.mxu0 %v6291_v15  ;;  %v6304_v15 = vld [vmem:[#allocation25 + $0x28] sm:$0xff]  }
 0x867   :  { %5593 = vmatprep.subr.bf16.mxu0 %v7665_v3 }
 0x86a   :  { %5594 = vmatpush3.bf16.msra.mxu0 %v6292_v16  ;;  %v6305_v16 = vld [vmem:[#allocation25 + $0x30] sm:$0xff]  }
 0x86b   :  { %5595 = vmatprep.subr.bf16.mxu0 %v7665_v3 }
 0x86e   :  { %5596 = vmatpush3.bf16.msra.mxu0 %v6293_v17  ;;  %v6306_v17 = vld [vmem:[#allocation25 + $0x38] sm:$0xff]  }
 0x86f   :  { %5597 = vmatprep.subr.bf16.mxu0 %v7665_v3 }
 0x872   :  { %5598 = vmatpush3.bf16.msra.mxu0 %v6294_v18  ;;  %v6307_v18 = vld [vmem:[%s8810_s17] sm:$0xff]  }
 0x873   :  { %5599 = vmatprep.subr.bf16.mxu0 %v7665_v3 }
 0x876   :  { %5600 = vmatpush3.bf16.msra.mxu0 %v6295_v21 }
 0x877   :  { %5601 = vmatprep.subr.bf16.mxu0 %v7665_v3 }
 0x87a   :  { %5602 = vmatpush3.bf16.msra.mxu0 %v6296_v31 }
 0x87b   :  { %5603 = vmatprep.subr.bf16.mxu0 %v7665_v3 }
 0x87e   :  { %5604 = vmatpush3.bf16.msra.mxu0 %v6297_v32 }
 0x87f   :  { %5605 = vmatprep.subr.bf16.mxu0 %v7665_v3 }
 0x882   :  { %5606 = vmatpush3.bf16.msra.mxu0 %v6298_v33  ;;  %v6314_v33 = vld [vmem:[%s8810_s17 + $0x38] sm:$0xff]  }
 0x883   :  { %5637 = vmatprep.subr.bf16.mxu0 %v7665_v3 }
 0x8cc   :  { %v2452_v21 = vpop.xlane.xlu1 %2451 }
 0x918   :  { %v1791_v60 = vpop.f32.mrb[8].mxu0 }
 0x919   :  { %v5543_v61 = vpop.f32.mrb[9].mxu0 }
 0x91a   :  { %v1794_v62 = vpop.f32.mrb[10].mxu0  ;;  %v6315_v61 = vld [vmem:[#allocation28] sm:$0xff]  }
 0x91b   :  { %v1798_v63 = vpack.c.bf16 %v1794_v62, %v1791_v60  ;;  %v5544_v1 = vpop.f32.mrb[11].mxu0  ;;  %v6316_v62 = vld [vmem:[#allocation28 + $0x8] sm:$0xff]  }
 0x91c   :  { %v6318_v1 = vld [vmem:[#allocation28 + $0x18] sm:$0xff]  }
 0x91d   :  { %5546 = vmatpush3.bf16.msra.mxu1 %v1798_v63  ;;  %v6317_v63 = vld [vmem:[#allocation28 + $0x10] sm:$0xff]  }
 0x91e   :  { %5571 = vmatprep.subr.bf16.mxu1 %v7665_v3 }
 0x920   :  { %5548 = vmatmul.mubr.msk.bf16.vlgmr.msra.gmra.mrb[12].mxu1 %vm1295_vm0, %v8303_v50 }
 0x921   :  { %5572 = vmatpush3.bf16.msra.mxu1 %v6283_v2  ;;  %5587 = vmatprep.mubr.msk.bf16.mxu1 %vm7666_vm5, %v7665_v3  ;;  %v6319_v2 = vld [vmem:[#allocation28 + $0x20] sm:$0xff]  }
 0x922   :  { %5573 = vmatprep.subr.bf16.mxu1 %v7665_v3 }
 0x925   :  { %5574 = vmatpush3.bf16.msra.mxu1 %v6284_v4  ;;  %v6320_v4 = vld [vmem:[#allocation28 + $0x28] sm:$0xff]  }
 0x926   :  { %5575 = vmatprep.subr.bf16.mxu1 %v7665_v3 }
 0x929   :  { %5576 = vmatpush3.bf16.msra.mxu1 %v6285_v5 }
 0x92a   :  { %5577 = vmatprep.subr.bf16.mxu1 %v7665_v3 }
 0x92d   :  { %5578 = vmatpush3.bf16.msra.mxu1 %v6286_v6 }
 0x92e   :  { %5579 = vmatprep.subr.bf16.mxu1 %v7665_v3 }
 0x931   :  { %5580 = vmatpush3.bf16.msra.mxu1 %v6287_v7 }
 0x932   :  { %5581 = vmatprep.subr.bf16.mxu1 %v7665_v3 }
 0x935   :  { %5582 = vmatpush3.bf16.msra.mxu1 %v6288_v8 }
 0x936   :  { %5583 = vmatprep.subr.bf16.mxu1 %v7665_v3 }
 0x938   :  { %v1934_v9 = vpop.f32.mrb[12].mxu0 }
 0x939   :  { %v5569_v10 = vpop.f32.mrb[13].mxu0  ;;  %5584 = vmatpush3.bf16.msra.mxu1 %v6289_v13  ;;  %v1935_v41 = vadd.f32 %v5042_v39, %v1934_v9  ;;  %v6302_v13 = vld [vmem:[#allocation25 + $0x18] sm:$0xff]  }
 0x93a   :  { %v1937_v11 = vpop.f32.mrb[14].mxu0  ;;  %5585 = vmatprep.subr.bf16.mxu1 %v7665_v3  ;;  %v6299_v10 = vld [vmem:[#allocation25] sm:$0xff]  }
 0x93b   :  { %v5570_v12 = vpop.f32.mrb[15].mxu0  ;;  %v1938_v42 = vadd.f32 %v5042_v39, %v1937_v11  ;;  %v1943_v43 = vmul.f32 0.01, %v1935_v41  ;;  %vm1941_vm12 = vcmp.ge.f32.partialorder %v1935_v41, 0.0  ;;  %v6300_v11 = vld [vmem:[#allocation25 + $0x8] sm:$0xff]  }
 0x93c   :  { %v6301_v12 = vld [vmem:[#allocation25 + $0x10] sm:$0xff]  }
 0x93d   :  { %5586 = vmatpush3.bf16.msra.mxu1 %v6290_v14  ;;  %v1944_v20 = vmul.f32 0.01, %v1938_v42  ;;  %vm1942_vm13 = vcmp.ge.f32.partialorder %v1938_v42, 0.0  ;;  %v1945_v44 = vsel %vm1941_vm12, %v1935_v41, %v1943_v43  ;;  %v6303_v14 = vld [vmem:[#allocation25 + $0x20] sm:$0xff]   ;;  %v6321_v41 = vld [vmem:[#allocation28 + $0x30] sm:$0xff]  }
 0x93e   :  { %5611 = vmatprep.subr.bf16.mxu1 %v7665_v3  ;;  %v1947_v47 = vadd.f32 %v1945_v44, %v8324_v34 }
 0x93f   :  { %v1946_v19 = vsel %vm1942_vm13, %v1938_v42, %v1944_v20  ;;  %v6322_v42 = vld [vmem:[#allocation28 + $0x38] sm:$0xff]  }
 0x940   :  { %v1948_v52 = vadd.f32 %v1946_v19, %v8327_v40 }
 0x9f3   :  { %v1833_v22 = vpop.f32.mrb[12].mxu1 }
 0x9f4   :  { %v1842_v23 = vmul.f32 0.01, %v1833_v22  ;;  %v5549_v24 = vpop.f32.mrb[13].mxu1  ;;  %vm1840_vm10 = vcmp.ge.f32.partialorder %v1833_v22, 0.0 }
 0x9f5   :  { %v1836_v25 = vpop.f32.mrb[14].mxu1  ;;  %v2458_v24 = vpop.xlane.xlu1 %2457 }
 0x9f6   :  { %vm1841_vm11 = vcmp.ge.f32.partialorder %v1836_v25, 0.0  ;;  %v1843_v26 = vmul.f32 0.01, %v1836_v25  ;;  %v5550_v27 = vpop.f32.mrb[15].mxu1  ;;  %v1844_v28 = vsel %vm1840_vm10, %v1833_v22, %v1842_v23  ;;  %v6308_v22 = vld [vmem:[%s8810_s17 + $0x8] sm:$0xff]   ;;  %v6309_v23 = vld [vmem:[%s8810_s17 + $0x10] sm:$0xff]  }
 0x9f7   :  { %v6310_v27 = vld [vmem:[%s8810_s17 + $0x18] sm:$0xff]  }
 0x9f8   :  { %v1845_v29 = vsel %vm1841_vm11, %v1836_v25, %v1843_v26  ;;  %v2453_v25 = vmax.f32 %v2452_v21, 1e-24  ;;  %v2459_v26 = vmax.f32 %v2458_v24, 1e-24 }
 0x9f9   :  { %v1949_v30 = vpack.c.bf16 %v1845_v29, %v1844_v28  ;;  %v6311_v28 = vld [vmem:[%s8810_s17 + $0x20] sm:$0xff]   ;;  %v6312_v29 = vld [vmem:[%s8810_s17 + $0x28] sm:$0xff]  }
 0x9fa   :  { %6463 = vrsqrt.f32 %v2453_v25 }
 0x9fb   :  { %5588 = vmatmul.mubr.bf16.vlgmr.msra.gmra.mrb[16].mxu1 %v1949_v30  ;;  %6465 = vrsqrt.f32 %v2459_v26  ;;  %v6313_v30 = vld [vmem:[%s8810_s17 + $0x30] sm:$0xff]  }
 0x9fc   :  { %5613 = vmatprep.mubr.msk.bf16.mxu1 %vm7666_vm5, %v7665_v3 }
 0xa04   :  { %v6464_v31 = vpop.eup %6463 }
 0xa05   :  { %v6466_v32 = vpop.eup %6465  ;;  %v2455_v37 = vmul.f32 %v6464_v31, %v8366_v35 }
 0xa06   :  { %v2461_v38 = vmul.f32 %v6466_v32, %v8369_v36 }
 0xa08   :  { %v8417_v39 = vpack.c.bf16 %v2461_v38, %v2455_v37 }
 0xace   :  { %v2038_v46 = vpop.f32.mrb[16].mxu1 }
 0xacf   :  { %v2039_v48 = vadd.f32 %v5051_v45, %v2038_v46  ;;  %v5589_v49 = vpop.f32.mrb[17].mxu1 }
 0xad0   :  { %v2041_v0 = vpop.f32.mrb[18].mxu1 }
 0xad1   :  { %v2045_v51 = vadd.f32 %v2039_v48, %v1947_v47  ;;  %v2042_v53 = vadd.f32 %v5051_v45, %v2041_v0  ;;  %v5590_v54 = vpop.f32.mrb[19].mxu1 }
 0xad3   :  { %v2049_v55 = vmul.f32 0.01, %v2045_v51  ;;  %v2046_v56 = vadd.f32 %v2042_v53, %v1948_v52  ;;  %vm2047_vm14 = vcmp.ge.f32.partialorder %v2045_v51, 0.0 }
 0xad5   :  { %vm2048_vm15 = vcmp.ge.f32.partialorder %v2046_v56, 0.0  ;;  %v2050_v57 = vmul.f32 0.01, %v2046_v56  ;;  %v2051_v58 = vsel %vm2047_vm14, %v2045_v51, %v2049_v55 }
 0xad7   :  { %v2052_v59 = vsel %vm2048_vm15, %v2046_v56, %v2050_v57  ;;  %v6323_v57 = vld [vmem:[#allocation32] sm:$0xff]  }
 0xad8   :  { %v2103_v60 = vpack.c.bf16 %v2052_v59, %v2051_v58  ;;  %v6324_v58 = vld [vmem:[#allocation32 + $0x8] sm:$0xff]   ;;  %v6325_v59 = vld [vmem:[#allocation32 + $0x10] sm:$0xff]  }
 0xada   :  { %5608 = vmatmul.mubr.bf16.vlgmr.msra.gmra.mrb[16].mxu0 %v2103_v60 }
 0xadb   :  { %5653 = vmatprep.mubr.msk.bf16.mxu0 %vm7666_vm5, %v7665_v3  ;;  %5638 = vmatpush3.bf16.msra.mxu0 %v6315_v61  ;;  %v6327_v61 = vld [vmem:[#allocation32 + $0x20] sm:$0xff]  }
 0xadc   :  { %5639 = vmatprep.subr.bf16.mxu0 %v7665_v3 }
 0xadf   :  { %5640 = vmatpush3.bf16.msra.mxu0 %v6316_v62  ;;  %v6329_v62 = vld [vmem:[#allocation32 + $0x30] sm:$0xff]  }
 0xae0   :  { %5641 = vmatprep.subr.bf16.mxu0 %v7665_v3 }
 0xae3   :  { %5642 = vmatpush3.bf16.msra.mxu0 %v6317_v63  ;;  %v6330_v63 = vld [vmem:[#allocation32 + $0x38] sm:$0xff]  }
 0xae4   :  { %5643 = vmatprep.subr.bf16.mxu0 %v7665_v3 }
 0xae7   :  { %5644 = vmatpush3.bf16.msra.mxu0 %v6318_v1  ;;  %v6331_v1 = vld [vmem:[#allocation35] sm:$0xff]  }
 0xae8   :  { %5645 = vmatprep.subr.bf16.mxu0 %v7665_v3 }
 0xaeb   :  { %5646 = vmatpush3.bf16.msra.mxu0 %v6319_v2  ;;  %v6332_v2 = vld [vmem:[#allocation35 + $0x8] sm:$0xff]  }
 0xaec   :  { %5647 = vmatprep.subr.bf16.mxu0 %v7665_v3 }
 0xaef   :  { %5648 = vmatpush3.bf16.msra.mxu0 %v6320_v4  ;;  %v6333_v4 = vld [vmem:[#allocation35 + $0x10] sm:$0xff]  }
 0xaf0   :  { %5649 = vmatprep.subr.bf16.mxu0 %v7665_v3 }
 0xaf3   :  { %5650 = vmatpush3.bf16.msra.mxu0 %v6321_v41 }
 0xaf4   :  { %5651 = vmatprep.subr.bf16.mxu0 %v7665_v3 }
 0xaf7   :  { %5652 = vmatpush3.bf16.msra.mxu0 %v6322_v42 }
 0xaf8   :  { %5677 = vmatprep.subr.bf16.mxu0 %v7665_v3 }
 0xbad   :  { %v2186_v5 = vpop.f32.mrb[16].mxu0 }
 0xbae   :  { %v5609_v6 = vpop.f32.mrb[17].mxu0 }
 0xbaf   :  { %v2189_v7 = vpop.f32.mrb[18].mxu0  ;;  %v6335_v6 = vld [vmem:[#allocation35 + $0x20] sm:$0xff]  }
 0xbb0   :  { %v2193_v8 = vpack.c.bf16 %v2189_v7, %v2186_v5  ;;  %v5610_v9 = vpop.f32.mrb[19].mxu0  ;;  %v6334_v5 = vld [vmem:[#allocation35 + $0x18] sm:$0xff]   ;;  %v6336_v7 = vld [vmem:[#allocation35 + $0x28] sm:$0xff]  }
 0xbb1   :  { %v6338_v9 = vld [vmem:[#allocation35 + $0x38] sm:$0xff]  }
 0xbb2   :  { %5612 = vmatpush3.bf16.msra.mxu1 %v2193_v8  ;;  %v6337_v8 = vld [vmem:[#allocation35 + $0x30] sm:$0xff]  }
 0xbb3   :  { %5617 = vmatprep.subr.bf16.mxu1 %v7665_v3 }
 0xbb5   :  { %5614 = vmatmul.mubr.msk.bf16.vlgmr.msra.gmra.mrb[20].mxu1 %vm1295_vm0, %v8303_v50 }
 0xbb6   :  { %5618 = vmatpush3.bf16.msra.mxu1 %v6299_v10  ;;  %5633 = vmatprep.mubr.msk.bf16.mxu1 %vm7666_vm5, %v7665_v3  ;;  %v6339_v10 = vld [vmem:[#allocation38] sm:$0xff]  }
 0xbb7   :  { %5619 = vmatprep.subr.bf16.mxu1 %v7665_v3 }
 0xbba   :  { %5620 = vmatpush3.bf16.msra.mxu1 %v6300_v11  ;;  %v6340_v11 = vld [vmem:[#allocation38 + $0x8] sm:$0xff]  }
 0xbbb   :  { %5621 = vmatprep.subr.bf16.mxu1 %v7665_v3 }
 0xbbe   :  { %5622 = vmatpush3.bf16.msra.mxu1 %v6301_v12  ;;  %v6341_v12 = vld [vmem:[#allocation38 + $0x10] sm:$0xff]  }
 0xbbf   :  { %5623 = vmatprep.subr.bf16.mxu1 %v7665_v3 }
 0xbc2   :  { %5624 = vmatpush3.bf16.msra.mxu1 %v6302_v13  ;;  %v6342_v13 = vld [vmem:[#allocation38 + $0x18] sm:$0xff]  }
 0xbc3   :  { %5625 = vmatprep.subr.bf16.mxu1 %v7665_v3 }
 0xbc6   :  { %5626 = vmatpush3.bf16.msra.mxu1 %v6303_v14  ;;  %v5069_v14 = vld [vmem:[#allocation26] ss:$0 sm:$0xff] }
 0xbc7   :  { %5627 = vmatprep.subr.bf16.mxu1 %v7665_v3 }
 0xbca   :  { %5628 = vmatpush3.bf16.msra.mxu1 %v6304_v15  ;;  %v6343_v15 = vld [vmem:[#allocation38 + $0x20] sm:$0xff]  }
 0xbcb   :  { %5629 = vmatprep.subr.bf16.mxu1 %v7665_v3 }
 0xbce   :  { %5630 = vmatpush3.bf16.msra.mxu1 %v6305_v16 }
 0xbcf   :  { %5631 = vmatprep.subr.bf16.mxu1 %v7665_v3 }
 0xbd2   :  { %5632 = vmatpush3.bf16.msra.mxu1 %v6306_v17 }
 0xbd3   :  { %5657 = vmatprep.subr.bf16.mxu1 %v7665_v3 }
 0xbd5   :  { %5634 = vmatmul.mubr.bf16.vlgmr.msra.gmra.mrb[24].mxu1 %v2103_v60  ;;  %v6326_v60 = vld [vmem:[#allocation32 + $0x18] sm:$0xff]  }
 0xbd6   :  { %5658 = vmatpush3.bf16.msra.mxu1 %v6307_v18  ;;  %5673 = vmatprep.mubr.msk.bf16.mxu1 %vm7666_vm5, %v7665_v3 }
 0xbd7   :  { %5659 = vmatprep.subr.bf16.mxu1 %v7665_v3 }
 0xbda   :  { %5660 = vmatpush3.bf16.msra.mxu1 %v6308_v22 }
 0xbdb   :  { %5661 = vmatprep.subr.bf16.mxu1 %v7665_v3 }
 0xbde   :  { %5662 = vmatpush3.bf16.msra.mxu1 %v6309_v23  ;;  %v5078_v23 = vld [vmem:[#allocation29] ss:$0 sm:$0xff] }
 0xbdf   :  { %5663 = vmatprep.subr.bf16.mxu1 %v7665_v3 }
 0xbe2   :  { %5664 = vmatpush3.bf16.msra.mxu1 %v6310_v27 }
 0xbe3   :  { %5665 = vmatprep.subr.bf16.mxu1 %v7665_v3 }
 0xbe6   :  { %5666 = vmatpush3.bf16.msra.mxu1 %v6311_v28 }
 0xbe7   :  { %5667 = vmatprep.subr.bf16.mxu1 %v7665_v3 }
 0xbea   :  { %5668 = vmatpush3.bf16.msra.mxu1 %v6312_v29 }
 0xbeb   :  { %5669 = vmatprep.subr.bf16.mxu1 %v7665_v3 }
 0xbee   :  { %5670 = vmatpush3.bf16.msra.mxu1 %v6313_v30 }
 0xbef   :  { %5671 = vmatprep.subr.bf16.mxu1 %v7665_v3 }
 0xbf2   :  { %5672 = vmatpush3.bf16.msra.mxu1 %v6314_v33 }
 0xbf3   :  { %5703 = vmatprep.subr.bf16.mxu1 %v7665_v3 }
 0xbf5   :  { %5674 = vmatmul.mubr.bf16.vlgmr.msra.gmra.mrb[28].mxu1 %v8417_v39 }
 0xbf6   :  { %5719 = vmatprep.mubr.msk.bf16.mxu1 %vm7666_vm5, %v7665_v3  ;;  %5704 = vmatpush3.bf16.msra.mxu1 %v6331_v1 }
 0xbf7   :  { %5705 = vmatprep.subr.bf16.mxu1 %v7665_v3 }
 0xbfa   :  { %5706 = vmatpush3.bf16.msra.mxu1 %v6332_v2 }
 0xbfb   :  { %5707 = vmatprep.subr.bf16.mxu1 %v7665_v3 }
 0xbfe   :  { %5708 = vmatpush3.bf16.msra.mxu1 %v6333_v4 }
 0xbff   :  { %5709 = vmatprep.subr.bf16.mxu1 %v7665_v3 }
 0xc02   :  { %5710 = vmatpush3.bf16.msra.mxu1 %v6334_v5 }
 0xc03   :  { %5711 = vmatprep.subr.bf16.mxu1 %v7665_v3 }
 0xc06   :  { %5712 = vmatpush3.bf16.msra.mxu1 %v6335_v6 }
 0xc07   :  { %5713 = vmatprep.subr.bf16.mxu1 %v7665_v3 }
 0xc0a   :  { %5714 = vmatpush3.bf16.msra.mxu1 %v6336_v7 }
 0xc0b   :  { %5715 = vmatprep.subr.bf16.mxu1 %v7665_v3 }
 0xc0e   :  { %5716 = vmatpush3.bf16.msra.mxu1 %v6337_v8 }
 0xc0f   :  { %5717 = vmatprep.subr.bf16.mxu1 %v7665_v3 }
 0xc12   :  { %5718 = vmatpush3.bf16.msra.mxu1 %v6338_v9 }
 0xc13   :  { %5743 = vmatprep.subr.bf16.mxu1 %v7665_v3 }
 0xc88   :  { %v2228_v35 = vpop.f32.mrb[20].mxu1 }
 0xc89   :  { %v2237_v36 = vmul.f32 0.01, %v2228_v35  ;;  %v5615_v43 = vpop.f32.mrb[21].mxu1  ;;  %vm2235_vm1 = vcmp.ge.f32.partialorder %v2228_v35, 0.0 }
 0xc8a   :  { %v2231_v20 = vpop.f32.mrb[22].mxu1 }
 0xc8b   :  { %vm2236_vm2 = vcmp.ge.f32.partialorder %v2231_v20, 0.0  ;;  %v2238_v44 = vmul.f32 0.01, %v2231_v20  ;;  %v5616_v45 = vpop.f32.mrb[23].mxu1  ;;  %v2239_v19 = vsel %vm2235_vm1, %v2228_v35, %v2237_v36 }
 0xc8d   :  { %v2240_v46 = vsel %vm2236_vm2, %v2231_v20, %v2238_v44 }
 0xc8e   :  { %v2344_v47 = vpack.c.bf16 %v2240_v46, %v2239_v19 }
 0xc90   :  { %5654 = vmatmul.mubr.bf16.vlgmr.msra.gmra.mrb[20].mxu0 %v2344_v47 }
 0xc91   :  { %5679 = vmatprep.mubr.msk.bf16.mxu0 %vm7666_vm5, %v7665_v3 }
 0xca8   :  { %v8427_v48 = vpop.f32.mrb[24].mxu1 }
 0xca9   :  { %v5635_v49 = vpop.f32.mrb[25].mxu1  ;;  %v2330_v16 = vadd.f32 %v5069_v14, %v8427_v48  ;;  %v6344_v48 = vld [vmem:[#allocation38 + $0x28] sm:$0xff]  }
 0xcaa   :  { %v8429_v0 = vpop.f32.mrb[26].mxu1  ;;  %v6345_v49 = vld [vmem:[#allocation38 + $0x30] sm:$0xff]  }
 0xcab   :  { %v5636_v51 = vpop.f32.mrb[27].mxu1  ;;  %v2333_v17 = vadd.f32 %v5069_v14, %v8429_v0  ;;  %v2338_v18 = vmul.f32 0.01, %v2330_v16  ;;  %vm2336_vm3 = vcmp.ge.f32.partialorder %v2330_v16, 0.0  ;;  %v6346_v0 = vld [vmem:[#allocation38 + $0x38] sm:$0xff]   ;;  %v6360_v14 = vld [vmem:[#allocation43 + $0x28] sm:$0xff]  }
 0xcac   :  { %v5096_v51 = vld [vmem:[#allocation34] ss:$0 sm:$0xff] }
 0xcad   :  { %v2339_v21 = vmul.f32 0.01, %v2333_v17  ;;  %vm2337_vm4 = vcmp.ge.f32.partialorder %v2333_v17, 0.0  ;;  %v2340_v22 = vsel %vm2336_vm3, %v2330_v16, %v2338_v18 }
 0xcae   :  { %v2342_v26 = vadd.f32 %v2340_v22, %v8324_v34  ;;  %v6347_v22 = vld [vmem:[#allocation40] sm:$0xff]  }
 0xcaf   :  { %v2341_v24 = vsel %vm2337_vm4, %v2333_v17, %v2339_v21 }
 0xcb0   :  { %v2343_v31 = vadd.f32 %v2341_v24, %v8327_v40  ;;  %v6348_v24 = vld [vmem:[#allocation40 + $0x8] sm:$0xff]  }
 0xcc8   :  { %v2595_v52 = vpop.f32.mrb[28].mxu1 }
 0xcc9   :  { %v5675_v53 = vpop.f32.mrb[29].mxu1 }
 0xcca   :  { %v2598_v54 = vpop.f32.mrb[30].mxu1 }
 0xccb   :  { %v2602_v55 = vpack.c.bf16 %v2598_v54, %v2595_v52  ;;  %v5676_v56 = vpop.f32.mrb[31].mxu1 }
 0xccd   :  { %5678 = vmatpush3.bf16.msra.mxu0 %v2602_v55 }
 0xcce   :  { %5683 = vmatprep.subr.bf16.mxu0 %v7665_v3 }
 0xcd0   :  { %5680 = vmatmul.mubr.msk.bf16.vlgmr.msra.gmra.mrb[24].mxu0 %vm1295_vm0, %v8303_v50  ;;  %v6328_v50 = vld [vmem:[#allocation32 + $0x28] sm:$0xff]  }
 0xcd1   :  { %5684 = vmatpush3.bf16.msra.mxu0 %v6323_v57  ;;  %5699 = vmatprep.mubr.msk.bf16.mxu0 %vm7666_vm5, %v7665_v3  ;;  %v5105_v57 = vld [vmem:[#allocation37] ss:$0 sm:$0xff] }
 0xcd2   :  { %5685 = vmatprep.subr.bf16.mxu0 %v7665_v3 }
 0xcd5   :  { %5686 = vmatpush3.bf16.msra.mxu0 %v6324_v58 }
 0xcd6   :  { %5687 = vmatprep.subr.bf16.mxu0 %v7665_v3 }
 0xcd9   :  { %5688 = vmatpush3.bf16.msra.mxu0 %v6325_v59 }
 0xcda   :  { %5689 = vmatprep.subr.bf16.mxu0 %v7665_v3 }
 0xcdd   :  { %5690 = vmatpush3.bf16.msra.mxu0 %v6326_v60 }
 0xcde   :  { %5691 = vmatprep.subr.bf16.mxu0 %v7665_v3 }
 0xce1   :  { %5692 = vmatpush3.bf16.msra.mxu0 %v6327_v61 }
 0xce2   :  { %5693 = vmatprep.subr.bf16.mxu0 %v7665_v3 }
 0xce5   :  { %5694 = vmatpush3.bf16.msra.mxu0 %v6328_v50 }
 0xce6   :  { %5695 = vmatprep.subr.bf16.mxu0 %v7665_v3 }
 0xce9   :  { %5696 = vmatpush3.bf16.msra.mxu0 %v6329_v62 }
 0xcea   :  { %5697 = vmatprep.subr.bf16.mxu0 %v7665_v3 }
 0xced   :  { %5698 = vmatpush3.bf16.msra.mxu0 %v6330_v63 }
 0xcee   :  { %5723 = vmatprep.subr.bf16.mxu0 %v7665_v3 }
 0xcf0   :  { %5700 = vmatmul.mubr.bf16.vlgmr.msra.gmra.mrb[28].mxu0 %v8417_v39 }
 0xcf1   :  { %5739 = vmatprep.mubr.msk.bf16.mxu0 %vm7666_vm5, %v7665_v3  ;;  %5724 = vmatpush3.bf16.msra.mxu0 %v6339_v10 }
 0xcf2   :  { %5725 = vmatprep.subr.bf16.mxu0 %v7665_v3 }
 0xcf5   :  { %5726 = vmatpush3.bf16.msra.mxu0 %v6340_v11  ;;  %v6356_v11 = vld [vmem:[#allocation43 + $0x8] sm:$0xff]  }
 0xcf6   :  { %5727 = vmatprep.subr.bf16.mxu0 %v7665_v3 }
 0xcf9   :  { %5728 = vmatpush3.bf16.msra.mxu0 %v6341_v12  ;;  %v6358_v12 = vld [vmem:[#allocation43 + $0x18] sm:$0xff]  }
 0xcfa   :  { %5729 = vmatprep.subr.bf16.mxu0 %v7665_v3 }
 0xcfd   :  { %5730 = vmatpush3.bf16.msra.mxu0 %v6342_v13  ;;  %v6359_v13 = vld [vmem:[#allocation43 + $0x20] sm:$0xff]  }
 0xcfe   :  { %5731 = vmatprep.subr.bf16.mxu0 %v7665_v3 }
 0xd01   :  { %5732 = vmatpush3.bf16.msra.mxu0 %v6343_v15 }
 0xd02   :  { %5733 = vmatprep.subr.bf16.mxu0 %v7665_v3 }
 0xd05   :  { %5734 = vmatpush3.bf16.msra.mxu0 %v6344_v48 }
 0xd06   :  { %5735 = vmatprep.subr.bf16.mxu0 %v7665_v3 }
 0xd09   :  { %5736 = vmatpush3.bf16.msra.mxu0 %v6345_v49 }
 0xd0a   :  { %5737 = vmatprep.subr.bf16.mxu0 %v7665_v3 }
 0xd0d   :  { %5738 = vmatpush3.bf16.msra.mxu0 %v6346_v0 }
 0xd0e   :  { %5769 = vmatprep.subr.bf16.mxu0 %v7665_v3 }
 0xd63   :  { %v2433_v25 = vpop.f32.mrb[20].mxu0 }
 0xd64   :  { %v2434_v27 = vadd.f32 %v5078_v23, %v2433_v25  ;;  %v5655_v28 = vpop.f32.mrb[21].mxu0  ;;  %v6349_v25 = vld [vmem:[#allocation40 + $0x10] sm:$0xff]  }
 0xd65   :  { %v2436_v29 = vpop.f32.mrb[22].mxu0  ;;  %v6352_v28 = vld [vmem:[#allocation40 + $0x28] sm:$0xff]  }
 0xd66   :  { %v8463_v30 = vadd.f32 %v2434_v27, %v2342_v26  ;;  %v2437_v32 = vadd.f32 %v5078_v23, %v2436_v29  ;;  %v5656_v33 = vpop.f32.mrb[23].mxu0  ;;  %v8485_v23 = vld [vmem:[%s8807_s4] sm:$0xff]   ;;  %v6353_v29 = vld [vmem:[#allocation40 + $0x30] sm:$0xff]  }
 0xd67   :  { %v6350_v26 = vld [vmem:[#allocation40 + $0x18] sm:$0xff]   ;;  %v6351_v27 = vld [vmem:[#allocation40 + $0x20] sm:$0xff]  }
 0xd68   :  { %v8466_v37 = vadd.f32 %v2437_v32, %v2343_v31  ;;  %v6354_v31 = vld [vmem:[#allocation40 + $0x38] sm:$0xff]  }
 0xd69   :  { %v6361_v32 = vld [vmem:[#allocation43 + $0x30] sm:$0xff]   ;;  %v6362_v33 = vld [vmem:[#allocation43 + $0x38] sm:$0xff]  }
 0xda3   :  { %v2637_v38 = vpop.f32.mrb[24].mxu0 }
 0xda4   :  { %v2646_v39 = vmul.f32 0.01, %v2637_v38  ;;  %v5681_v41 = vpop.f32.mrb[25].mxu0  ;;  %vm2644_vm6 = vcmp.ge.f32.partialorder %v2637_v38, 0.0 }
 0xda5   :  { %v2640_v42 = vpop.f32.mrb[26].mxu0  ;;  %v6365_v41 = vld [vmem:[#allocation46 + $0x10] sm:$0xff]  }
 0xda6   :  { %vm2645_vm7 = vcmp.ge.f32.partialorder %v2640_v42, 0.0  ;;  %v2647_v35 = vmul.f32 0.01, %v2640_v42  ;;  %v5682_v36 = vpop.f32.mrb[27].mxu0  ;;  %v2648_v43 = vsel %vm2644_vm6, %v2637_v38, %v2646_v39  ;;  %v6363_v38 = vld [vmem:[#allocation46] sm:$0xff]   ;;  %v6364_v39 = vld [vmem:[#allocation46 + $0x8] sm:$0xff]  }
 0xda8   :  { %v2649_v20 = vsel %vm2645_vm7, %v2640_v42, %v2647_v35  ;;  %v6366_v42 = vld [vmem:[#allocation46 + $0x18] sm:$0xff]   ;;  %v6367_v35 = vld [vmem:[#allocation46 + $0x20] sm:$0xff]  }
 0xda9   :  { %v2753_v44 = vpack.c.bf16 %v2649_v20, %v2648_v43 }
 0xdab   :  { %5720 = vmatmul.mubr.bf16.vlgmr.msra.gmra.mrb[32].mxu1 %v2753_v44 }
 0xdac   :  { %5745 = vmatprep.mubr.msk.bf16.mxu1 %vm7666_vm5, %v7665_v3 }
 0xdc3   :  { %v2738_v45 = vpop.f32.mrb[28].mxu0 }
 0xdc4   :  { %v5701_v19 = vpop.f32.mrb[29].mxu0  ;;  %v2739_v52 = vadd.f32 %v5096_v51, %v2738_v45 }
 0xdc5   :  { %v2741_v46 = vpop.f32.mrb[30].mxu0 }
 0xdc6   :  { %v5702_v47 = vpop.f32.mrb[31].mxu0  ;;  %v2742_v53 = vadd.f32 %v5096_v51, %v2741_v46  ;;  %v2747_v54 = vmul.f32 0.01, %v2739_v52  ;;  %vm2745_vm8 = vcmp.ge.f32.partialorder %v2739_v52, 0.0 }
 0xdc8   :  { %v2748_v55 = vmul.f32 0.01, %v2742_v53  ;;  %vm2746_vm9 = vcmp.ge.f32.partialorder %v2742_v53, 0.0  ;;  %v2749_v56 = vsel %vm2745_vm8, %v2739_v52, %v2747_v54  ;;  %v6369_v54 = vld [vmem:[#allocation46 + $0x30] sm:$0xff]   ;;  %vm2442_vm8 = vcmp.ge.f32.partialorder %v8463_v30, 0.0 }
 0xdc9   :  { %v2751_v60 = vadd.f32 %v2749_v56, %v8324_v34  ;;  %v6355_v34 = vld [vmem:[#allocation43] sm:$0xff]  }
 0xdca   :  { %v2750_v58 = vsel %vm2746_vm9, %v2742_v53, %v2748_v55  ;;  %v6368_v53 = vld [vmem:[#allocation46 + $0x28] sm:$0xff]   ;;  %v6370_v55 = vld [vmem:[#allocation46 + $0x38] sm:$0xff]  }
 0xdcb   :  { %v2752_v1 = vadd.f32 %v2750_v58, %v8327_v40  ;;  %v6357_v40 = vld [vmem:[#allocation43 + $0x10] sm:$0xff]   ;;  %v8514_v56 = vld [vmem:[%s8811_s14] sm:$0xff] }
 0xdcc   :  { %v3657_v58 = vmul.f32 %v8514_v56, %v8514_v56 }
 0xdce   :  { %3658 = vadd.xlane.f32.xlu1 %v3657_v58  ;;  %v6385_v58 = vld [vmem:[%s8813_s13 + $0x30] sm:$0xff]  }
 0xe7e   :  { %v2842_v59 = vpop.f32.mrb[32].mxu1 }
 0xe7f   :  { %v2843_v61 = vadd.f32 %v5105_v57, %v2842_v59  ;;  %v5721_v50 = vpop.f32.mrb[33].mxu1 }
 0xe80   :  { %v2845_v62 = vpop.f32.mrb[34].mxu1 }
 0xe81   :  { %v2849_v63 = vadd.f32 %v2843_v61, %v2751_v60  ;;  %v2846_v2 = vadd.f32 %v5105_v57, %v2845_v62  ;;  %v5722_v4 = vpop.f32.mrb[35].mxu1  ;;  %v8517_v57 = vld [vmem:[%s8812_s30] sm:$0xff] }
 0xe82   :  { %v3651_v59 = vmul.f32 %v8517_v57, %v8517_v57  ;;  %v5123_v60 = vld [vmem:[#allocation41] ss:$0 sm:$0xff] }
 0xe83   :  { %v2853_v5 = vmul.f32 0.01, %v2849_v63  ;;  %v2850_v6 = vadd.f32 %v2846_v2, %v2752_v1  ;;  %vm2851_vm10 = vcmp.ge.f32.partialorder %v2849_v63, 0.0  ;;  %v5132_v2 = vld [vmem:[#allocation44] ss:$0 sm:$0xff] }
 0xe84   :  { %3652 = vadd.xlane.f32.xlu0 %v3651_v59 }
 0xe85   :  { %vm2852_vm11 = vcmp.ge.f32.partialorder %v2850_v6, 0.0  ;;  %v2854_v7 = vmul.f32 0.01, %v2850_v6  ;;  %v2855_v8 = vsel %vm2851_vm10, %v2849_v63, %v2853_v5  ;;  %vm2443_vm10 = vcmp.ge.f32.partialorder %v8466_v37, 0.0 }
 0xe87   :  { %v2856_v9 = vsel %vm2852_vm11, %v2850_v6, %v2854_v7  ;;  %v8524_v6 = vld [vmem:[%s8808_s19] sm:$0xff] }
 0xe88   :  { %v2907_v10 = vpack.c.bf16 %v2856_v9, %v2855_v8 }
 0xe8a   :  { %5740 = vmatmul.mubr.bf16.vlgmr.msra.gmra.mrb[32].mxu0 %v2907_v10 }
 0xe8b   :  { %5785 = vmatprep.mubr.msk.bf16.mxu0 %vm7666_vm5, %v7665_v3  ;;  %5770 = vmatpush3.bf16.msra.mxu0 %v6355_v34 }
 0xe8c   :  { %5771 = vmatprep.subr.bf16.mxu0 %v7665_v3 }
 0xe8f   :  { %5772 = vmatpush3.bf16.msra.mxu0 %v6356_v11  ;;  %v8528_v11 = vld [vmem:[%s8808_s19 + $0x8] sm:$0xff] }
 0xe90   :  { %5773 = vmatprep.subr.bf16.mxu0 %v7665_v3 }
 0xe93   :  { %5774 = vmatpush3.bf16.msra.mxu0 %v6357_v40 }
 0xe94   :  { %5775 = vmatprep.subr.bf16.mxu0 %v7665_v3 }
 0xe97   :  { %5776 = vmatpush3.bf16.msra.mxu0 %v6358_v12 }
 0xe98   :  { %5777 = vmatprep.subr.bf16.mxu0 %v7665_v3 }
 0xe9b   :  { %5778 = vmatpush3.bf16.msra.mxu0 %v6359_v13 }
 0xe9c   :  { %5779 = vmatprep.subr.bf16.mxu0 %v7665_v3 }
 0xe9f   :  { %5780 = vmatpush3.bf16.msra.mxu0 %v6360_v14 }
 0xea0   :  { %5781 = vmatprep.subr.bf16.mxu0 %v7665_v3 }
 0xea3   :  { %5782 = vmatpush3.bf16.msra.mxu0 %v6361_v32 }
 0xea4   :  { %5783 = vmatprep.subr.bf16.mxu0 %v7665_v3 }
 0xea7   :  { %5784 = vmatpush3.bf16.msra.mxu0 %v6362_v33 }
 0xea8   :  { %5809 = vmatprep.subr.bf16.mxu0 %v7665_v3 }
 0xf5d   :  { %v2990_v15 = vpop.f32.mrb[32].mxu0 }
 0xf5e   :  { %v5741_v16 = vpop.f32.mrb[33].mxu0 }
 0xf5f   :  { %v2993_v17 = vpop.f32.mrb[34].mxu0 }
 0xf60   :  { %v2997_v18 = vpack.c.bf16 %v2993_v17, %v2990_v15  ;;  %v5742_v21 = vpop.f32.mrb[35].mxu0 }
 0xf62   :  { %5744 = vmatpush3.bf16.msra.mxu1 %v2997_v18 }
 0xf63   :  { %5749 = vmatprep.subr.bf16.mxu1 %v7665_v3 }
 0xf65   :  { %5746 = vmatmul.mubr.msk.bf16.vlgmr.msra.gmra.mrb[36].mxu1 %vm1295_vm0, %v8485_v23 }
 0xf66   :  { %5750 = vmatpush3.bf16.msra.mxu1 %v6347_v22  ;;  %5765 = vmatprep.mubr.msk.bf16.mxu1 %vm7666_vm5, %v7665_v3  ;;  %v6387_v22 = vld [vmem:[#allocation50] sm:$0xff]  }
 0xf67   :  { %5751 = vmatprep.subr.bf16.mxu1 %v7665_v3 }
 0xf6a   :  { %5752 = vmatpush3.bf16.msra.mxu1 %v6348_v24  ;;  %v6388_v24 = vld [vmem:[#allocation50 + $0x8] sm:$0xff]  }
 0xf6b   :  { %5753 = vmatprep.subr.bf16.mxu1 %v7665_v3 }
 0xf6e   :  { %5754 = vmatpush3.bf16.msra.mxu1 %v6349_v25  ;;  %v6389_v25 = vld [vmem:[#allocation50 + $0x10] sm:$0xff]  }
 0xf6f   :  { %5755 = vmatprep.subr.bf16.mxu1 %v7665_v3 }
 0xf72   :  { %5756 = vmatpush3.bf16.msra.mxu1 %v6350_v26  ;;  %v6390_v26 = vld [vmem:[#allocation50 + $0x18] sm:$0xff]  }
 0xf73   :  { %5757 = vmatprep.subr.bf16.mxu1 %v7665_v3 }
 0xf76   :  { %5758 = vmatpush3.bf16.msra.mxu1 %v6351_v27  ;;  %v6391_v27 = vld [vmem:[#allocation50 + $0x20] sm:$0xff]  }
 0xf77   :  { %5759 = vmatprep.subr.bf16.mxu1 %v7665_v3 }
 0xf7a   :  { %5760 = vmatpush3.bf16.msra.mxu1 %v6352_v28  ;;  %v6392_v28 = vld [vmem:[#allocation50 + $0x28] sm:$0xff]  }
 0xf7b   :  { %5761 = vmatprep.subr.bf16.mxu1 %v7665_v3 }
 0xf7e   :  { %5762 = vmatpush3.bf16.msra.mxu1 %v6353_v29 }
 0xf7f   :  { %5763 = vmatprep.subr.bf16.mxu1 %v7665_v3 }
 0xf82   :  { %5764 = vmatpush3.bf16.msra.mxu1 %v6354_v31 }
 0xf83   :  { %5789 = vmatprep.subr.bf16.mxu1 %v7665_v3 }
 0xf85   :  { %5766 = vmatmul.mubr.bf16.vlgmr.msra.gmra.mrb[40].mxu1 %v2907_v10 }
 0xf86   :  { %5805 = vmatprep.mubr.msk.bf16.mxu1 %vm7666_vm5, %v7665_v3  ;;  %5790 = vmatpush3.bf16.msra.mxu1 %v6363_v38 }
 0xf87   :  { %5791 = vmatprep.subr.bf16.mxu1 %v7665_v3 }
 0xf8a   :  { %5792 = vmatpush3.bf16.msra.mxu1 %v6364_v39  ;;  %v6371_v39 = vld [vmem:[#allocation47] sm:$0xff]  }
 0xf8b   :  { %5793 = vmatprep.subr.bf16.mxu1 %v7665_v3 }
 0xf8e   :  { %5794 = vmatpush3.bf16.msra.mxu1 %v6365_v41  ;;  %v6372_v41 = vld [vmem:[#allocation47 + $0x8] sm:$0xff]  }
 0xf8f   :  { %5795 = vmatprep.subr.bf16.mxu1 %v7665_v3 }
 0xf92   :  { %5796 = vmatpush3.bf16.msra.mxu1 %v6366_v42  ;;  %v6373_v42 = vld [vmem:[#allocation47 + $0x10] sm:$0xff]  }
 0xf93   :  { %5797 = vmatprep.subr.bf16.mxu1 %v7665_v3 }
 0xf96   :  { %5798 = vmatpush3.bf16.msra.mxu1 %v6367_v35  ;;  %v6374_v35 = vld [vmem:[#allocation47 + $0x18] sm:$0xff]  }
 0xf97   :  { %5799 = vmatprep.subr.bf16.mxu1 %v7665_v3 }
 0xf9a   :  { %5800 = vmatpush3.bf16.msra.mxu1 %v6368_v53  ;;  %v6384_v53 = vld [vmem:[%s8813_s13 + $0x28] sm:$0xff]  }
 0xf9b   :  { %5801 = vmatprep.subr.bf16.mxu1 %v7665_v3 }
 0xf9e   :  { %5802 = vmatpush3.bf16.msra.mxu1 %v6369_v54 }
 0xf9f   :  { %5803 = vmatprep.subr.bf16.mxu1 %v7665_v3 }
 0xfa2   :  { %5804 = vmatpush3.bf16.msra.mxu1 %v6370_v55 }
 0xfa3   :  { %5835 = vmatprep.subr.bf16.mxu1 %v7665_v3 }
0x1038   :  { %v3032_v36 = vpop.f32.mrb[36].mxu1 }
0x1039   :  { %v3041_v43 = vmul.f32 0.01, %v3032_v36  ;;  %v5747_v20 = vpop.f32.mrb[37].mxu1  ;;  %vm3039_vm12 = vcmp.ge.f32.partialorder %v3032_v36, 0.0 }
0x103a   :  { %v3035_v44 = vpop.f32.mrb[38].mxu1  ;;  %v6377_v20 = vld [vmem:[#allocation47 + $0x30] sm:$0xff]  }
0x103b   :  { %vm3040_vm13 = vcmp.ge.f32.partialorder %v3035_v44, 0.0  ;;  %v3042_v45 = vmul.f32 0.01, %v3035_v44  ;;  %v5748_v19 = vpop.f32.mrb[39].mxu1  ;;  %v3043_v46 = vsel %vm3039_vm12, %v3032_v36, %v3041_v43  ;;  %v6375_v36 = vld [vmem:[#allocation47 + $0x20] sm:$0xff]   ;;  %v6376_v43 = vld [vmem:[#allocation47 + $0x28] sm:$0xff]  }
0x103c   :  { %v6380_v19 = vld [vmem:[%s8813_s13 + $0x8] sm:$0xff]  }
0x103d   :  { %v3044_v47 = vsel %vm3040_vm13, %v3035_v44, %v3042_v45  ;;  %v6378_v44 = vld [vmem:[#allocation47 + $0x38] sm:$0xff]  }
0x103e   :  { %v3148_v48 = vpack.c.bf16 %v3044_v47, %v3043_v46  ;;  %v6379_v45 = vld [vmem:[%s8813_s13] sm:$0xff]   ;;  %v3659_v46 = vpop.xlane.xlu1 %3658  ;;  %v3653_v47 = vpop.xlane.xlu0 %3652 }
0x1040   :  { %5786 = vmatmul.mubr.bf16.vlgmr.msra.gmra.mrb[36].mxu0 %v3148_v48  ;;  %v6381_v48 = vld [vmem:[%s8813_s13 + $0x10] sm:$0xff]  }
0x1041   :  { %5811 = vmatprep.mubr.msk.bf16.mxu0 %vm7666_vm5, %v7665_v3 }
0x1058   :  { %v3133_v49 = vpop.f32.mrb[40].mxu1 }
0x1059   :  { %v5767_v0 = vpop.f32.mrb[41].mxu1  ;;  %v3134_v61 = vadd.f32 %v5123_v60, %v3133_v49  ;;  %v3660_v49 = vmax.f32 %v3659_v46, 1e-24 }
0x105a   :  { %v3136_v51 = vpop.f32.mrb[42].mxu1  ;;  %v3654_v0 = vmax.f32 %v3653_v47, 1e-24 }
0x105b   :  { %v5768_v52 = vpop.f32.mrb[43].mxu1  ;;  %v3137_v50 = vadd.f32 %v5123_v60, %v3136_v51  ;;  %v3142_v62 = vmul.f32 0.01, %v3134_v61  ;;  %vm3140_vm14 = vcmp.ge.f32.partialorder %v3134_v61, 0.0  ;;  %v6382_v51 = vld [vmem:[%s8813_s13 + $0x18] sm:$0xff]   ;;  %6467 = vrsqrt.f32 %v3660_v49 }
0x105c   :  { %6469 = vrsqrt.f32 %v3654_v0  ;;  %v6383_v52 = vld [vmem:[%s8813_s13 + $0x20] sm:$0xff]   ;;  %v5159_v0 = vld [vmem:[#allocation52] ss:$0 sm:$0xff] }
0x105d   :  { %v3143_v63 = vmul.f32 0.01, %v3137_v50  ;;  %vm3141_vm15 = vcmp.ge.f32.partialorder %v3137_v50, 0.0  ;;  %v3144_v1 = vsel %vm3140_vm14, %v3134_v61, %v3142_v62  ;;  %v6386_v61 = vld [vmem:[%s8813_s13 + $0x38] sm:$0xff]  }
0x105e   :  { %v3146_v7 = vadd.f32 %v8524_v6, %v3144_v1  ;;  %v6393_v62 = vld [vmem:[#allocation50 + $0x30] sm:$0xff]  }
0x105f   :  { %v3145_v4 = vsel %vm3141_vm15, %v3137_v50, %v3143_v63 }
0x1060   :  { %v3147_v40 = vadd.f32 %v8528_v11, %v3145_v4 }
0x1065   :  { %v6468_v54 = vpop.eup %6467 }
0x1066   :  { %v6470_v55 = vpop.eup %6469  ;;  %v3662_v60 = vmul.f32 %v6468_v54, %v8514_v56 }
0x1067   :  { %v3656_v59 = vmul.f32 %v6470_v55, %v8517_v57  ;;  %v6394_v57 = vld [vmem:[#allocation50 + $0x38] sm:$0xff]  }
0x1069   :  { %v8571_v50 = vpack.c.bf16 %v3662_v60, %v3656_v59  ;;  %v2444_v59 = vmul.f32 0.01, %v8463_v30 }
0x1113   :  { %v3237_v5 = vpop.f32.mrb[36].mxu0 }
0x1114   :  { %v3238_v8 = vadd.f32 %v5132_v2, %v3237_v5  ;;  %v5787_v9 = vpop.f32.mrb[37].mxu0 }
0x1115   :  { %v3240_v10 = vpop.f32.mrb[38].mxu0 }
0x1116   :  { %v3244_v34 = vadd.f32 %v3238_v8, %v3146_v7  ;;  %v3241_v12 = vadd.f32 %v5132_v2, %v3240_v10  ;;  %v5788_v13 = vpop.f32.mrb[39].mxu0 }
0x1118   :  { %v3248_v14 = vmul.f32 0.01, %v3244_v34  ;;  %v3245_v15 = vadd.f32 %v3241_v12, %v3147_v40  ;;  %vm3246_vm1 = vcmp.ge.f32.partialorder %v3244_v34, 0.0 }
0x111a   :  { %vm3247_vm2 = vcmp.ge.f32.partialorder %v3245_v15, 0.0  ;;  %v3249_v16 = vmul.f32 0.01, %v3245_v15  ;;  %v3250_v17 = vsel %vm3246_vm1, %v3244_v34, %v3248_v14 }
0x111c   :  { %v3251_v18 = vsel %vm3247_vm2, %v3245_v15, %v3249_v16 }
0x111d   :  { %v3302_v21 = vpack.c.bf16 %v3251_v18, %v3250_v17  ;;  %v6395_v18 = vld [vmem:[#allocation53] sm:$0xff]  }
0x111f   :  { %5806 = vmatmul.mubr.bf16.vlgmr.msra.gmra.mrb[44].mxu1 %v3302_v21 }
0x1120   :  { %5851 = vmatprep.mubr.msk.bf16.mxu1 %vm7666_vm5, %v7665_v3  ;;  %5836 = vmatpush3.bf16.msra.mxu1 %v6387_v22  ;;  %v6397_v22 = vld [vmem:[#allocation53 + $0x10] sm:$0xff]  }
0x1121   :  { %5837 = vmatprep.subr.bf16.mxu1 %v7665_v3 }
0x1124   :  { %5838 = vmatpush3.bf16.msra.mxu1 %v6388_v24  ;;  %v6398_v24 = vld [vmem:[#allocation53 + $0x18] sm:$0xff]  }
0x1125   :  { %5839 = vmatprep.subr.bf16.mxu1 %v7665_v3 }
0x1128   :  { %5840 = vmatpush3.bf16.msra.mxu1 %v6389_v25  ;;  %v6399_v25 = vld [vmem:[#allocation53 + $0x20] sm:$0xff]  }
0x1129   :  { %5841 = vmatprep.subr.bf16.mxu1 %v7665_v3 }
0x112c   :  { %5842 = vmatpush3.bf16.msra.mxu1 %v6390_v26  ;;  %v6400_v26 = vld [vmem:[#allocation53 + $0x28] sm:$0xff]  }
0x112d   :  { %5843 = vmatprep.subr.bf16.mxu1 %v7665_v3 }
0x1130   :  { %5844 = vmatpush3.bf16.msra.mxu1 %v6391_v27  ;;  %v6401_v27 = vld [vmem:[#allocation53 + $0x30] sm:$0xff]  }
0x1131   :  { %5845 = vmatprep.subr.bf16.mxu1 %v7665_v3 }
0x1134   :  { %5846 = vmatpush3.bf16.msra.mxu1 %v6392_v28  ;;  %v6402_v28 = vld [vmem:[#allocation53 + $0x38] sm:$0xff]  }
0x1135   :  { %5847 = vmatprep.subr.bf16.mxu1 %v7665_v3 }
0x1138   :  { %5848 = vmatpush3.bf16.msra.mxu1 %v6393_v62 }
0x1139   :  { %5849 = vmatprep.subr.bf16.mxu1 %v7665_v3 }
0x113c   :  { %5850 = vmatpush3.bf16.msra.mxu1 %v6394_v57  ;;  %v2445_v57 = vmul.f32 0.01, %v8466_v37 }
0x113d   :  { %5875 = vmatprep.subr.bf16.mxu1 %v7665_v3 }
0x11f2   :  { %v3385_v29 = vpop.f32.mrb[44].mxu1 }
0x11f3   :  { %v5807_v31 = vpop.f32.mrb[45].mxu1 }
0x11f4   :  { %v3388_v32 = vpop.f32.mrb[46].mxu1  ;;  %v6404_v31 = vld [vmem:[#allocation55 + $0x8] sm:$0xff]  }
0x11f5   :  { %v3392_v33 = vpack.c.bf16 %v3388_v32, %v3385_v29  ;;  %v5808_v38 = vpop.f32.mrb[47].mxu1  ;;  %v6403_v29 = vld [vmem:[#allocation55] sm:$0xff]   ;;  %v6405_v32 = vld [vmem:[#allocation55 + $0x10] sm:$0xff]  }
0x11f6   :  { %v6407_v38 = vld [vmem:[#allocation55 + $0x20] sm:$0xff]  }
0x11f7   :  { %5810 = vmatpush3.bf16.msra.mxu0 %v3392_v33  ;;  %v6406_v33 = vld [vmem:[#allocation55 + $0x18] sm:$0xff]  }
0x11f8   :  { %5815 = vmatprep.subr.bf16.mxu0 %v7665_v3 }
0x11fa   :  { %5812 = vmatmul.mubr.msk.bf16.vlgmr.msra.gmra.mrb[40].mxu0 %vm1295_vm0, %v8485_v23 }
0x11fb   :  { %5816 = vmatpush3.bf16.msra.mxu0 %v6371_v39  ;;  %5831 = vmatprep.mubr.msk.bf16.mxu0 %vm7666_vm5, %v7665_v3  ;;  %v6408_v39 = vld [vmem:[#allocation55 + $0x28] sm:$0xff]  }
0x11fc   :  { %5817 = vmatprep.subr.bf16.mxu0 %v7665_v3 }
0x11ff   :  { %5818 = vmatpush3.bf16.msra.mxu0 %v6372_v41  ;;  %v6409_v41 = vld [vmem:[#allocation55 + $0x30] sm:$0xff]  }
0x1200   :  { %5819 = vmatprep.subr.bf16.mxu0 %v7665_v3 }
0x1203   :  { %5820 = vmatpush3.bf16.msra.mxu0 %v6373_v42  ;;  %v6410_v42 = vld [vmem:[#allocation55 + $0x38] sm:$0xff]  }
0x1204   :  { %5821 = vmatprep.subr.bf16.mxu0 %v7665_v3 }
0x1207   :  { %5822 = vmatpush3.bf16.msra.mxu0 %v6374_v35  ;;  %v6411_v35 = vld [vmem:[#allocation58] sm:$0xff]  }
0x1208   :  { %5823 = vmatprep.subr.bf16.mxu0 %v7665_v3 }
0x120b   :  { %5824 = vmatpush3.bf16.msra.mxu0 %v6375_v36  ;;  %v6412_v36 = vld [vmem:[#allocation58 + $0x8] sm:$0xff]  }
0x120c   :  { %5825 = vmatprep.subr.bf16.mxu0 %v7665_v3 }
0x120f   :  { %5826 = vmatpush3.bf16.msra.mxu0 %v6376_v43  ;;  %v6413_v43 = vld [vmem:[#allocation58 + $0x10] sm:$0xff]  }
0x1210   :  { %5827 = vmatprep.subr.bf16.mxu0 %v7665_v3 }
0x1213   :  { %5828 = vmatpush3.bf16.msra.mxu0 %v6377_v20  ;;  %v6414_v20 = vld [vmem:[#allocation58 + $0x18] sm:$0xff]  }
0x1214   :  { %5829 = vmatprep.subr.bf16.mxu0 %v7665_v3 }
0x1217   :  { %5830 = vmatpush3.bf16.msra.mxu0 %v6378_v44  ;;  %v5150_v44 = vld [vmem:[#allocation49] ss:$0 sm:$0xff] }
0x1218   :  { %5855 = vmatprep.subr.bf16.mxu0 %v7665_v3 }
0x121a   :  { %5832 = vmatmul.mubr.bf16.vlgmr.msra.gmra.mrb[44].mxu0 %v3302_v21  ;;  %v6396_v21 = vld [vmem:[#allocation53 + $0x8] sm:$0xff]  }
0x121b   :  { %5856 = vmatpush3.bf16.msra.mxu0 %v6379_v45  ;;  %5871 = vmatprep.mubr.msk.bf16.mxu0 %vm7666_vm5, %v7665_v3  ;;  %v6415_v45 = vld [vmem:[#allocation58 + $0x20] sm:$0xff]  }
0x121c   :  { %5857 = vmatprep.subr.bf16.mxu0 %v7665_v3 }
0x121f   :  { %5858 = vmatpush3.bf16.msra.mxu0 %v6380_v19 }
0x1220   :  { %5859 = vmatprep.subr.bf16.mxu0 %v7665_v3 }
0x1223   :  { %5860 = vmatpush3.bf16.msra.mxu0 %v6381_v48 }
0x1224   :  { %5861 = vmatprep.subr.bf16.mxu0 %v7665_v3 }
0x1227   :  { %5862 = vmatpush3.bf16.msra.mxu0 %v6382_v51 }
0x1228   :  { %5863 = vmatprep.subr.bf16.mxu0 %v7665_v3 }
0x122b   :  { %5864 = vmatpush3.bf16.msra.mxu0 %v6383_v52 }
0x122c   :  { %5865 = vmatprep.subr.bf16.mxu0 %v7665_v3 }
0x122f   :  { %5866 = vmatpush3.bf16.msra.mxu0 %v6384_v53 }
0x1230   :  { %5867 = vmatprep.subr.bf16.mxu0 %v7665_v3 }
0x1233   :  { %5868 = vmatpush3.bf16.msra.mxu0 %v6385_v58 }
0x1234   :  { %5869 = vmatprep.subr.bf16.mxu0 %v7665_v3 }
0x1237   :  { %5870 = vmatpush3.bf16.msra.mxu0 %v6386_v61 }
0x1238   :  { %5901 = vmatprep.subr.bf16.mxu0 %v7665_v3 }
0x123a   :  { %5872 = vmatmul.mubr.bf16.vlgmr.msra.gmra.mrb[48].mxu0 %v8571_v50 }
0x123b   :  { %5917 = vmatprep.mubr.msk.bf16.mxu0 %vm7666_vm5, %v7665_v3  ;;  %5902 = vmatpush3.bf16.msra.mxu0 %v6403_v29 }
0x123c   :  { %5903 = vmatprep.subr.bf16.mxu0 %v7665_v3 }
0x123f   :  { %5904 = vmatpush3.bf16.msra.mxu0 %v6404_v31 }
0x1240   :  { %5905 = vmatprep.subr.bf16.mxu0 %v7665_v3 }
0x1243   :  { %5906 = vmatpush3.bf16.msra.mxu0 %v6405_v32 }
0x1244   :  { %5907 = vmatprep.subr.bf16.mxu0 %v7665_v3 }
0x1247   :  { %5908 = vmatpush3.bf16.msra.mxu0 %v6406_v33  ;;  %v5186_v33 = vld [vmem:[#allocation56] ss:$0 sm:$0xff] }
0x1248   :  { %5909 = vmatprep.subr.bf16.mxu0 %v7665_v3 }
0x124b   :  { %5910 = vmatpush3.bf16.msra.mxu0 %v6407_v38 }
0x124c   :  { %5911 = vmatprep.subr.bf16.mxu0 %v7665_v3 }
0x124f   :  { %5912 = vmatpush3.bf16.msra.mxu0 %v6408_v39 }
0x1250   :  { %5913 = vmatprep.subr.bf16.mxu0 %v7665_v3 }
0x1253   :  { %5914 = vmatpush3.bf16.msra.mxu0 %v6409_v41 }
0x1254   :  { %5915 = vmatprep.subr.bf16.mxu0 %v7665_v3 }
0x1257   :  { %5916 = vmatpush3.bf16.msra.mxu0 %v6410_v42 }
0x1258   :  { %5941 = vmatprep.subr.bf16.mxu0 %v7665_v3 }
0x12cd   :  { %v3427_v56 = vpop.f32.mrb[40].mxu0 }
0x12ce   :  { %v3436_v63 = vmul.f32 0.01, %v3427_v56  ;;  %v5813_v1 = vpop.f32.mrb[41].mxu0  ;;  %vm3434_vm3 = vcmp.ge.f32.partialorder %v3427_v56, 0.0 }
0x12cf   :  { %v3430_v2 = vpop.f32.mrb[42].mxu0  ;;  %v2446_v1 = vsel %vm2442_vm8, %v8463_v30, %v2444_v59 }
0x12d0   :  { %vm3435_vm4 = vcmp.ge.f32.partialorder %v3430_v2, 0.0  ;;  %v3437_v4 = vmul.f32 0.01, %v3430_v2  ;;  %v5814_v5 = vpop.f32.mrb[43].mxu0  ;;  %v3438_v7 = vsel %vm3434_vm3, %v3427_v56, %v3436_v63 }
0x12d2   :  { %v3439_v8 = vsel %vm3435_vm4, %v3430_v2, %v3437_v4 }
0x12d3   :  { %v3543_v9 = vpack.c.bf16 %v3439_v8, %v3438_v7  ;;  %v2447_v7 = vsel %vm2443_vm10, %v8466_v37, %v2445_v57  ;;  %v6419_v57 = vld [vmem:[#allocation59] sm:$0xff]  }
0x12d5   :  { %5852 = vmatmul.mubr.bf16.vlgmr.msra.gmra.mrb[48].mxu1 %v3543_v9 }
0x12d6   :  { %5877 = vmatprep.mubr.msk.bf16.mxu1 %vm7666_vm5, %v7665_v3 }
0x12ed   :  { %v8581_v10 = vpop.f32.mrb[44].mxu0 }
0x12ee   :  { %v5833_v34 = vpop.f32.mrb[45].mxu0  ;;  %v3529_v19 = vadd.f32 %v5150_v44, %v8581_v10 }
0x12ef   :  { %v8583_v40 = vpop.f32.mrb[46].mxu0 }
0x12f0   :  { %v5834_v12 = vpop.f32.mrb[47].mxu0  ;;  %v3532_v46 = vadd.f32 %v5150_v44, %v8583_v40  ;;  %v3537_v47 = vmul.f32 0.01, %v3529_v19  ;;  %vm3535_vm6 = vcmp.ge.f32.partialorder %v3529_v19, 0.0 }
0x12f2   :  { %v3538_v48 = vmul.f32 0.01, %v3532_v46  ;;  %vm3536_vm7 = vcmp.ge.f32.partialorder %v3532_v46, 0.0  ;;  %v3539_v49 = vsel %vm3535_vm6, %v3529_v19, %v3537_v47 }
0x12f3   :  { %v3541_v53 = vadd.f32 %v8524_v6, %v3539_v49 }
0x12f4   :  { %v3540_v51 = vsel %vm3536_vm7, %v3532_v46, %v3538_v48 }
0x12f5   :  { %v3542_v61 = vadd.f32 %v8528_v11, %v3540_v51  ;;  %v6427_v51 = vld [vmem:[#allocation62] sm:$0xff]  }
0x130d   :  { %v3796_v13 = vpop.f32.mrb[48].mxu0 }
0x130e   :  { %v5873_v14 = vpop.f32.mrb[49].mxu0 }
0x130f   :  { %v3799_v15 = vpop.f32.mrb[50].mxu0 }
0x1310   :  { %v3803_v16 = vpack.c.bf16 %v3799_v15, %v3796_v13  ;;  %v5874_v17 = vpop.f32.mrb[51].mxu0 }
0x1312   :  { %5876 = vmatpush3.bf16.msra.mxu1 %v3803_v16 }
0x1313   :  { %5881 = vmatprep.subr.bf16.mxu1 %v7665_v3 }
0x1315   :  { %5878 = vmatmul.mubr.msk.bf16.vlgmr.msra.gmra.mrb[52].mxu1 %vm1295_vm0, %v8485_v23 }
0x1316   :  { %5882 = vmatpush3.bf16.msra.mxu1 %v6395_v18  ;;  %5897 = vmatprep.mubr.msk.bf16.mxu1 %vm7666_vm5, %v7665_v3 }
0x1317   :  { %5883 = vmatprep.subr.bf16.mxu1 %v7665_v3 }
0x131a   :  { %5884 = vmatpush3.bf16.msra.mxu1 %v6396_v21 }
0x131b   :  { %5885 = vmatprep.subr.bf16.mxu1 %v7665_v3 }
0x131e   :  { %5886 = vmatpush3.bf16.msra.mxu1 %v6397_v22  ;;  %v6416_v22 = vld [vmem:[#allocation58 + $0x28] sm:$0xff]  }
0x131f   :  { %5887 = vmatprep.subr.bf16.mxu1 %v7665_v3 }
0x1322   :  { %5888 = vmatpush3.bf16.msra.mxu1 %v6398_v24  ;;  %v6417_v24 = vld [vmem:[#allocation58 + $0x30] sm:$0xff]  }
0x1323   :  { %5889 = vmatprep.subr.bf16.mxu1 %v7665_v3 }
0x1326   :  { %5890 = vmatpush3.bf16.msra.mxu1 %v6399_v25  ;;  %v6418_v25 = vld [vmem:[#allocation58 + $0x38] sm:$0xff]  }
0x1327   :  { %5891 = vmatprep.subr.bf16.mxu1 %v7665_v3 }
0x132a   :  { %5892 = vmatpush3.bf16.msra.mxu1 %v6400_v26  ;;  %v5177_v26 = vld [vmem:[%s8814_s29] ss:$0 sm:$0xff] }
0x132b   :  { %5893 = vmatprep.subr.bf16.mxu1 %v7665_v3 }
0x132e   :  { %5894 = vmatpush3.bf16.msra.mxu1 %v6401_v27 }
0x132f   :  { %5895 = vmatprep.subr.bf16.mxu1 %v7665_v3 }
0x1332   :  { %5896 = vmatpush3.bf16.msra.mxu1 %v6402_v28 }
0x1333   :  { %5921 = vmatprep.subr.bf16.mxu1 %v7665_v3 }
0x1335   :  { %5898 = vmatmul.mubr.bf16.vlgmr.msra.gmra.mrb[56].mxu1 %v8571_v50 }
0x1336   :  { %5937 = vmatprep.mubr.msk.bf16.mxu1 %vm7666_vm5, %v7665_v3  ;;  %5922 = vmatpush3.bf16.msra.mxu1 %v6411_v35 }
0x1337   :  { %5923 = vmatprep.subr.bf16.mxu1 %v7665_v3 }
0x133a   :  { %5924 = vmatpush3.bf16.msra.mxu1 %v6412_v36 }
0x133b   :  { %5925 = vmatprep.subr.bf16.mxu1 %v7665_v3 }
0x133e   :  { %5926 = vmatpush3.bf16.msra.mxu1 %v6413_v43 }
0x133f   :  { %5927 = vmatprep.subr.bf16.mxu1 %v7665_v3 }
0x1342   :  { %5928 = vmatpush3.bf16.msra.mxu1 %v6414_v20 }
0x1343   :  { %5929 = vmatprep.subr.bf16.mxu1 %v7665_v3 }
0x1346   :  { %5930 = vmatpush3.bf16.msra.mxu1 %v6415_v45 }
0x1347   :  { %5931 = vmatprep.subr.bf16.mxu1 %v7665_v3 }
0x134a   :  { %5932 = vmatpush3.bf16.msra.mxu1 %v6416_v22 }
0x134b   :  { %5933 = vmatprep.subr.bf16.mxu1 %v7665_v3 }
0x134e   :  { %5934 = vmatpush3.bf16.msra.mxu1 %v6417_v24 }
0x134f   :  { %5935 = vmatprep.subr.bf16.mxu1 %v7665_v3 }
0x1352   :  { %5936 = vmatpush3.bf16.msra.mxu1 %v6418_v25 }
0x1353   :  { %5967 = vmatprep.subr.bf16.mxu1 %v7665_v3 }
0x13a8   :  { %v3632_v52 = vpop.f32.mrb[48].mxu1 }
0x13a9   :  { %v3633_v54 = vadd.f32 %v5159_v0, %v3632_v52  ;;  %v5853_v55 = vpop.f32.mrb[49].mxu1  ;;  %v6428_v52 = vld [vmem:[#allocation62 + $0x8] sm:$0xff]  }
0x13aa   :  { %v3635_v58 = vpop.f32.mrb[50].mxu1  ;;  %v6431_v55 = vld [vmem:[#allocation62 + $0x20] sm:$0xff]  }
0x13ab   :  { %v3639_v60 = vadd.f32 %v3633_v54, %v3541_v53  ;;  %v3636_v50 = vadd.f32 %v5159_v0, %v3635_v58  ;;  %v5854_v62 = vpop.f32.mrb[51].mxu1  ;;  %v6429_v53 = vld [vmem:[#allocation62 + $0x10] sm:$0xff]   ;;  %v6430_v54 = vld [vmem:[#allocation62 + $0x18] sm:$0xff]   ;;  %v6432_v58 = vld [vmem:[#allocation62 + $0x28] sm:$0xff]  }
0x13ad   :  { %vm3641_vm9 = vcmp.ge.f32.partialorder %v3639_v60, 0.0  ;;  %v3643_v56 = vmul.f32 0.01, %v3639_v60  ;;  %v3640_v63 = vadd.f32 %v3636_v50, %v3542_v61 }
0x13af   :  { %v3645_v2 = vsel %vm3641_vm9, %v3639_v60, %v3643_v56  ;;  %vm3642_vm11 = vcmp.ge.f32.partialorder %v3640_v63, 0.0  ;;  %v3644_v4 = vmul.f32 0.01, %v3640_v63  ;;  %v6420_v56 = vld [vmem:[#allocation59 + $0x8] sm:$0xff]  }
0x13b0   :  { %v8623_v5 = vadd.f32 %v3645_v2, %v2446_v1  ;;  %v6422_v1 = vld [vmem:[#allocation59 + $0x18] sm:$0xff]   ;;  %v6423_v2 = vld [vmem:[#allocation59 + $0x20] sm:$0xff]  }
0x13b1   :  { %v3646_v8 = vsel %vm3642_vm11, %v3640_v63, %v3644_v4  ;;  %v6421_v63 = vld [vmem:[#allocation59 + $0x10] sm:$0xff]  }
0x13b2   :  { %v8626_v9 = vadd.f32 %v3646_v8, %v2447_v7  ;;  %v6425_v4 = vld [vmem:[#allocation59 + $0x30] sm:$0xff]   ;;  %v6426_v7 = vld [vmem:[#allocation59 + $0x38] sm:$0xff]  }
0x13b3   :  { %v6433_v8 = vld [vmem:[#allocation62 + $0x30] sm:$0xff]  }
0x13e8   :  { %v3838_v10 = vpop.f32.mrb[52].mxu1 }
0x13e9   :  { %v3847_v34 = vmul.f32 0.01, %v3838_v10  ;;  %v5879_v40 = vpop.f32.mrb[53].mxu1  ;;  %vm3845_vm12 = vcmp.ge.f32.partialorder %v3838_v10, 0.0 }
0x13ea   :  { %v3841_v12 = vpop.f32.mrb[54].mxu1  ;;  %v6436_v40 = vld [vmem:[#allocation65 + $0x8] sm:$0xff]  }
0x13eb   :  { %vm3846_vm13 = vcmp.ge.f32.partialorder %v3841_v12, 0.0  ;;  %v3848_v13 = vmul.f32 0.01, %v3841_v12  ;;  %v5880_v14 = vpop.f32.mrb[55].mxu1  ;;  %v3849_v15 = vsel %vm3845_vm12, %v3838_v10, %v3847_v34  ;;  %v6434_v10 = vld [vmem:[#allocation62 + $0x38] sm:$0xff]   ;;  %v6435_v34 = vld [vmem:[#allocation65] sm:$0xff]  }
0x13ec   :  { %v6439_v14 = vld [vmem:[#allocation65 + $0x20] sm:$0xff]  }
0x13ed   :  { %v3850_v30 = vsel %vm3846_vm13, %v3841_v12, %v3848_v13  ;;  %v6437_v12 = vld [vmem:[#allocation65 + $0x10] sm:$0xff]   ;;  %v6438_v13 = vld [vmem:[#allocation65 + $0x18] sm:$0xff]  }
0x13ee   :  { %v3954_v16 = vpack.c.bf16 %v3850_v30, %v3849_v15 }
0x13f0   :  { %5918 = vmatmul.mubr.bf16.vlgmr.msra.gmra.mrb[52].mxu0 %v3954_v16 }
0x13f1   :  { %5943 = vmatprep.mubr.msk.bf16.mxu0 %vm7666_vm5, %v7665_v3 }
0x1408   :  { %v3939_v37 = vpop.f32.mrb[56].mxu1 }
0x1409   :  { %v5899_v17 = vpop.f32.mrb[57].mxu1  ;;  %v3940_v27 = vadd.f32 %v5177_v26, %v3939_v37 }
0x140a   :  { %v3942_v18 = vpop.f32.mrb[58].mxu1 }
0x140b   :  { %v5900_v21 = vpop.f32.mrb[59].mxu1  ;;  %v3943_v28 = vadd.f32 %v5177_v26, %v3942_v18  ;;  %v3948_v29 = vmul.f32 0.01, %v3940_v27  ;;  %vm3946_vm14 = vcmp.ge.f32.partialorder %v3940_v27, 0.0 }
0x140d   :  { %v3949_v31 = vmul.f32 0.01, %v3943_v28  ;;  %vm3947_vm15 = vcmp.ge.f32.partialorder %v3943_v28, 0.0  ;;  %v3950_v32 = vsel %vm3946_vm14, %v3940_v27, %v3948_v29  ;;  %v6440_v29 = vld [vmem:[#allocation65 + $0x28] sm:$0xff]  }
0x140e   :  { %v3952_v41 = vadd.f32 %v8524_v6, %v3950_v32  ;;  %v6442_v32 = vld [vmem:[#allocation65 + $0x38] sm:$0xff]  }
0x140f   :  { %v3951_v38 = vsel %vm3947_vm15, %v3943_v28, %v3949_v31  ;;  %v6441_v31 = vld [vmem:[#allocation65 + $0x30] sm:$0xff]  }
0x1410   :  { %v3953_v20 = vadd.f32 %v8528_v11, %v3951_v38 }
0x14c3   :  { %v4043_v39 = vpop.f32.mrb[52].mxu0 }
0x14c4   :  { %v4044_v42 = vadd.f32 %v5186_v33, %v4043_v39  ;;  %v5919_v35 = vpop.f32.mrb[53].mxu0 }
0x14c5   :  { %v4046_v36 = vpop.f32.mrb[54].mxu0 }
0x14c6   :  { %v4050_v43 = vadd.f32 %v4044_v42, %v3952_v41  ;;  %v4047_v44 = vadd.f32 %v5186_v33, %v4046_v36  ;;  %v5920_v45 = vpop.f32.mrb[55].mxu0  ;;  %v5204_v33 = vld [vmem:[#allocation61] ss:$0 sm:$0xff]  ;;  %v5213_v36 = vld [vmem:[#allocation64] ss:$0 sm:$0xff] }
0x14c8   :  { %v4054_v19 = vmul.f32 0.01, %v4050_v43  ;;  %v4051_v46 = vadd.f32 %v4047_v44, %v3953_v20  ;;  %vm4052_vm1 = vcmp.ge.f32.partialorder %v4050_v43, 0.0 }
0x14ca   :  { %vm4053_vm2 = vcmp.ge.f32.partialorder %v4051_v46, 0.0  ;;  %v4055_v47 = vmul.f32 0.01, %v4051_v46  ;;  %v4056_v48 = vsel %vm4052_vm1, %v4050_v43, %v4054_v19 }
0x14cc   :  { %v4057_v49 = vsel %vm4053_vm2, %v4051_v46, %v4055_v47 }
0x14cd   :  { %v4108_v0 = vpack.c.bf16 %v4057_v49, %v4056_v48 }
0x14cf   :  { %5938 = vmatmul.mubr.bf16.vlgmr.msra.gmra.mrb[60].mxu1 %v4108_v0 }
0x14d0   :  { %5983 = vmatprep.mubr.msk.bf16.mxu1 %vm7666_vm5, %v7665_v3  ;;  %5968 = vmatpush3.bf16.msra.mxu1 %v6427_v51 }
0x14d1   :  { %5969 = vmatprep.subr.bf16.mxu1 %v7665_v3 }
0x14d4   :  { %5970 = vmatpush3.bf16.msra.mxu1 %v6428_v52 }
0x14d5   :  { %5971 = vmatprep.subr.bf16.mxu1 %v7665_v3 }
0x14d8   :  { %5972 = vmatpush3.bf16.msra.mxu1 %v6429_v53 }
0x14d9   :  { %5973 = vmatprep.subr.bf16.mxu1 %v7665_v3 }
0x14dc   :  { %5974 = vmatpush3.bf16.msra.mxu1 %v6430_v54 }
0x14dd   :  { %5975 = vmatprep.subr.bf16.mxu1 %v7665_v3 }
0x14e0   :  { %5976 = vmatpush3.bf16.msra.mxu1 %v6431_v55 }
0x14e1   :  { %5977 = vmatprep.subr.bf16.mxu1 %v7665_v3 }
0x14e4   :  { %5978 = vmatpush3.bf16.msra.mxu1 %v6432_v58 }
0x14e5   :  { %5979 = vmatprep.subr.bf16.mxu1 %v7665_v3 }
0x14e8   :  { %5980 = vmatpush3.bf16.msra.mxu1 %v6433_v8  ;;  %v6444_v8 = vld [vmem:[#allocation67 + $0x8] sm:$0xff]  }
0x14e9   :  { %5981 = vmatprep.subr.bf16.mxu1 %v7665_v3 }
0x14ec   :  { %5982 = vmatpush3.bf16.msra.mxu1 %v6434_v10  ;;  %v6445_v10 = vld [vmem:[#allocation67 + $0x10] sm:$0xff]  }
0x14ed   :  { %6007 = vmatprep.subr.bf16.mxu1 %v7665_v3 }
0x15a2   :  { %v4191_v59 = vpop.f32.mrb[60].mxu1 }
0x15a3   :  { %v5939_v60 = vpop.f32.mrb[61].mxu1 }
0x15a4   :  { %v4194_v61 = vpop.f32.mrb[62].mxu1  ;;  %v6452_v60 = vld [vmem:[#allocation70 + $0x8] sm:$0xff]  }
0x15a5   :  { %v4198_v50 = vpack.c.bf16 %v4194_v61, %v4191_v59  ;;  %v5940_v62 = vpop.f32.mrb[63].mxu1  ;;  %v6451_v59 = vld [vmem:[#allocation70] sm:$0xff]   ;;  %v6453_v61 = vld [vmem:[#allocation70 + $0x10] sm:$0xff]  }
0x15a6   :  { %v6455_v62 = vld [vmem:[#allocation70 + $0x20] sm:$0xff]  }
0x15a7   :  { %5942 = vmatpush3.bf16.msra.mxu0 %v4198_v50  ;;  %v6454_v50 = vld [vmem:[#allocation70 + $0x18] sm:$0xff]  }
0x15a8   :  { %5947 = vmatprep.subr.bf16.mxu0 %v7665_v3 }
0x15aa   :  { %5944 = vmatmul.mubr.msk.bf16.vlgmr.msra.gmra.mrb[56].mxu0 %vm1295_vm0, %v8485_v23  ;;  %v6424_v23 = vld [vmem:[#allocation59 + $0x28] sm:$0xff]  }
0x15ab   :  { %5948 = vmatpush3.bf16.msra.mxu0 %v6419_v57  ;;  %5963 = vmatprep.mubr.msk.bf16.mxu0 %vm7666_vm5, %v7665_v3  ;;  %v6456_v57 = vld [vmem:[#allocation70 + $0x28] sm:$0xff]  }
0x15ac   :  { %5949 = vmatprep.subr.bf16.mxu0 %v7665_v3 }
0x15af   :  { %5950 = vmatpush3.bf16.msra.mxu0 %v6420_v56 }
0x15b0   :  { %5951 = vmatprep.subr.bf16.mxu0 %v7665_v3 }
0x15b3   :  { %5952 = vmatpush3.bf16.msra.mxu0 %v6421_v63 }
0x15b4   :  { %5953 = vmatprep.subr.bf16.mxu0 %v7665_v3 }
0x15b7   :  { %5954 = vmatpush3.bf16.msra.mxu0 %v6422_v1 }
0x15b8   :  { %5955 = vmatprep.subr.bf16.mxu0 %v7665_v3 }
0x15bb   :  { %5956 = vmatpush3.bf16.msra.mxu0 %v6423_v2 }
0x15bc   :  { %5957 = vmatprep.subr.bf16.mxu0 %v7665_v3 }
0x15bf   :  { %5958 = vmatpush3.bf16.msra.mxu0 %v6424_v23 }
0x15c0   :  { %5959 = vmatprep.subr.bf16.mxu0 %v7665_v3 }
0x15c3   :  { %5960 = vmatpush3.bf16.msra.mxu0 %v6425_v4  ;;  %v6443_v4 = vld [vmem:[#allocation67] sm:$0xff]  }
0x15c4   :  { %5961 = vmatprep.subr.bf16.mxu0 %v7665_v3 }
0x15c7   :  { %5962 = vmatpush3.bf16.msra.mxu0 %v6426_v7  ;;  %v6474_v7 = vld [vmem:[%s8807_s4] sm:$0xff]  }
0x15c8   :  { %5987 = vmatprep.subr.bf16.mxu0 %v7665_v3 }
0x15ca   :  { %5964 = vmatmul.mubr.bf16.vlgmr.msra.gmra.mrb[60].mxu0 %v4108_v0 }
0x15cb   :  { %6003 = vmatprep.mubr.msk.bf16.mxu0 %vm7666_vm5, %v7665_v3  ;;  %5988 = vmatpush3.bf16.msra.mxu0 %v6435_v34  ;;  %v6446_v34 = vld [vmem:[#allocation67 + $0x18] sm:$0xff]  }
0x15cc   :  { %5989 = vmatprep.subr.bf16.mxu0 %v7665_v3 }
0x15cf   :  { %5990 = vmatpush3.bf16.msra.mxu0 %v6436_v40  ;;  %v6447_v40 = vld [vmem:[#allocation67 + $0x20] sm:$0xff]  }
0x15d0   :  { %5991 = vmatprep.subr.bf16.mxu0 %v7665_v3 }
0x15d3   :  { %5992 = vmatpush3.bf16.msra.mxu0 %v6437_v12  ;;  %v6448_v12 = vld [vmem:[#allocation67 + $0x28] sm:$0xff]  }
0x15d4   :  { %5993 = vmatprep.subr.bf16.mxu0 %v7665_v3 }
0x15d7   :  { %5994 = vmatpush3.bf16.msra.mxu0 %v6438_v13  ;;  %v6449_v13 = vld [vmem:[#allocation67 + $0x30] sm:$0xff]  }
0x15d8   :  { %5995 = vmatprep.subr.bf16.mxu0 %v7665_v3 }
0x15db   :  { %5996 = vmatpush3.bf16.msra.mxu0 %v6439_v14  ;;  %v6450_v14 = vld [vmem:[#allocation67 + $0x38] sm:$0xff]  }
0x15dc   :  { %5997 = vmatprep.subr.bf16.mxu0 %v7665_v3 }
0x15df   :  { %5998 = vmatpush3.bf16.msra.mxu0 %v6440_v29 }
0x15e0   :  { %5999 = vmatprep.subr.bf16.mxu0 %v7665_v3 }
0x15e3   :  { %6000 = vmatpush3.bf16.msra.mxu0 %v6441_v31 }
0x15e4   :  { %6001 = vmatprep.subr.bf16.mxu0 %v7665_v3 }
0x15e7   :  { %6002 = vmatpush3.bf16.msra.mxu0 %v6442_v32  ;;  %v5231_v32 = vld [vmem:[#allocation68] ss:$0 sm:$0xff] }
0x15e8   :  { %6033 = vmatprep.subr.bf16.mxu0 %v7665_v3 }
0x167d   :  { %v4233_v15 = vpop.f32.mrb[56].mxu0 }
0x167e   :  { %v4242_v30 = vmul.f32 0.01, %v4233_v15  ;;  %v5945_v16 = vpop.f32.mrb[57].mxu0  ;;  %vm4240_vm3 = vcmp.ge.f32.partialorder %v4233_v15, 0.0 }
0x167f   :  { %v4236_v37 = vpop.f32.mrb[58].mxu0 }
0x1680   :  { %vm4241_vm4 = vcmp.ge.f32.partialorder %v4236_v37, 0.0  ;;  %v4243_v17 = vmul.f32 0.01, %v4236_v37  ;;  %v5946_v18 = vpop.f32.mrb[59].mxu0  ;;  %v4244_v21 = vsel %vm4240_vm3, %v4233_v15, %v4242_v30  ;;  %v6457_v15 = vld [vmem:[#allocation70 + $0x30] sm:$0xff]   ;;  %v6458_v30 = vld [vmem:[#allocation70 + $0x38] sm:$0xff]  }
0x1682   :  { %v4245_v22 = vsel %vm4241_vm4, %v4236_v37, %v4243_v17 }
0x1683   :  { %v4349_v24 = vpack.c.bf16 %v4245_v22, %v4244_v21 }
0x1685   :  { %5984 = vmatmul.mubr.bf16.vlgmr.msra.gmra.mrb[64].mxu1 %v4349_v24 }
0x1686   :  { %6009 = vmatprep.mubr.msk.bf16.mxu1 %vm7666_vm5, %v7665_v3 }
0x169d   :  { %v4334_v25 = vpop.f32.mrb[60].mxu0 }
0x169e   :  { %v5965_v26 = vpop.f32.mrb[61].mxu0  ;;  %v4335_v38 = vadd.f32 %v5204_v33, %v4334_v25 }
0x169f   :  { %v4337_v27 = vpop.f32.mrb[62].mxu0 }
0x16a0   :  { %v5966_v28 = vpop.f32.mrb[63].mxu0  ;;  %v4338_v39 = vadd.f32 %v5204_v33, %v4337_v27  ;;  %v4343_v41 = vmul.f32 0.01, %v4335_v38  ;;  %vm4341_vm6 = vcmp.ge.f32.partialorder %v4335_v38, 0.0 }
0x16a2   :  { %v4344_v42 = vmul.f32 0.01, %v4338_v39  ;;  %vm4342_vm7 = vcmp.ge.f32.partialorder %v4338_v39, 0.0  ;;  %v4345_v35 = vsel %vm4341_vm6, %v4335_v38, %v4343_v41 }
0x16a3   :  { %v4347_v44 = vadd.f32 %v8524_v6, %v4345_v35 }
0x16a4   :  { %v4346_v43 = vsel %vm4342_vm7, %v4338_v39, %v4344_v42  ;;  %v5240_v42 = vld [vmem:[#allocation71] ss:$0 sm:$0xff] }
0x16a5   :  { %v4348_v48 = vadd.f32 %v8528_v11, %v4346_v43 }
0x1758   :  { %v4438_v20 = vpop.f32.mrb[64].mxu1 }
0x1759   :  { %v4439_v45 = vadd.f32 %v5213_v36, %v4438_v20  ;;  %v5985_v19 = vpop.f32.mrb[65].mxu1 }
0x175a   :  { %v4441_v46 = vpop.f32.mrb[66].mxu1 }
0x175b   :  { %v4445_v47 = vadd.f32 %v4439_v45, %v4347_v44  ;;  %v4442_v49 = vadd.f32 %v5213_v36, %v4441_v46  ;;  %v5986_v0 = vpop.f32.mrb[67].mxu1 }
0x175d   :  { %v4449_v51 = vmul.f32 0.01, %v4445_v47  ;;  %v4446_v52 = vadd.f32 %v4442_v49, %v4348_v48  ;;  %vm4447_vm8 = vcmp.ge.f32.partialorder %v4445_v47, 0.0 }
0x175f   :  { %vm4448_vm9 = vcmp.ge.f32.partialorder %v4446_v52, 0.0  ;;  %v4450_v53 = vmul.f32 0.01, %v4446_v52  ;;  %v4451_v54 = vsel %vm4447_vm8, %v4445_v47, %v4449_v51 }
0x1761   :  { %v4452_v55 = vsel %vm4448_vm9, %v4446_v52, %v4450_v53 }
0x1762   :  { %v4503_v58 = vpack.c.bf16 %v4452_v55, %v4451_v54 }
0x1764   :  { %6004 = vmatmul.mubr.bf16.vlgmr.msra.gmra.mrb[64].mxu0 %v4503_v58 }
0x1765   :  { %6049 = vmatprep.mubr.msk.bf16.mxu0 %vm7666_vm5, %v7665_v3  ;;  %6034 = vmatpush3.bf16.msra.mxu0 %v6451_v59 }
0x1766   :  { %6035 = vmatprep.subr.bf16.mxu0 %v7665_v3 }
0x1769   :  { %6036 = vmatpush3.bf16.msra.mxu0 %v6452_v60 }
0x176a   :  { %6037 = vmatprep.subr.bf16.mxu0 %v7665_v3 }
0x176d   :  { %6038 = vmatpush3.bf16.msra.mxu0 %v6453_v61 }
0x176e   :  { %6039 = vmatprep.subr.bf16.mxu0 %v7665_v3 }
0x1771   :  { %6040 = vmatpush3.bf16.msra.mxu0 %v6454_v50 }
0x1772   :  { %6041 = vmatprep.subr.bf16.mxu0 %v7665_v3 }
0x1775   :  { %6042 = vmatpush3.bf16.msra.mxu0 %v6455_v62 }
0x1776   :  { %6043 = vmatprep.subr.bf16.mxu0 %v7665_v3 }
0x1779   :  { %6044 = vmatpush3.bf16.msra.mxu0 %v6456_v57 }
0x177a   :  { %6045 = vmatprep.subr.bf16.mxu0 %v7665_v3 }
0x177d   :  { %6046 = vmatpush3.bf16.msra.mxu0 %v6457_v15 }
0x177e   :  { %6047 = vmatprep.subr.bf16.mxu0 %v7665_v3 }
0x1781   :  { %6048 = vmatpush3.bf16.msra.mxu0 %v6458_v30 }
0x1837   :  { %v4586_v56 = vpop.f32.mrb[64].mxu0 }
0x1838   :  { %v6005_v63 = vpop.f32.mrb[65].mxu0 }
0x1839   :  { %v4589_v1 = vpop.f32.mrb[66].mxu0 }
0x183a   :  { %v4593_v2 = vpack.c.bf16 %v4589_v1, %v4586_v56  ;;  %v6006_v23 = vpop.f32.mrb[67].mxu0 }
0x183c   :  { %6008 = vmatpush3.bf16.msra.mxu1 %v4593_v2 }
0x183d   :  { %6013 = vmatprep.subr.bf16.mxu1 %v7665_v3 }
0x183f   :  { %6010 = vmatmul.mubr.msk.bf16.vlgmr.msra.gmra.mrb[68].mxu1 %vm1295_vm0, %v6474_v7 }
0x1840   :  { %6014 = vmatpush3.bf16.msra.mxu1 %v6443_v4  ;;  %6029 = vmatprep.mubr.msk.bf16.mxu1 %vm7666_vm5, %v7665_v3 }
0x1841   :  { %6015 = vmatprep.subr.bf16.mxu1 %v7665_v3 }
0x1844   :  { %6016 = vmatpush3.bf16.msra.mxu1 %v6444_v8 }
0x1845   :  { %6017 = vmatprep.subr.bf16.mxu1 %v7665_v3 }
0x1848   :  { %6018 = vmatpush3.bf16.msra.mxu1 %v6445_v10 }
0x1849   :  { %6019 = vmatprep.subr.bf16.mxu1 %v7665_v3 }
0x184c   :  { %6020 = vmatpush3.bf16.msra.mxu1 %v6446_v34 }
0x184d   :  { %6021 = vmatprep.subr.bf16.mxu1 %v7665_v3 }
0x1850   :  { %6022 = vmatpush3.bf16.msra.mxu1 %v6447_v40 }
0x1851   :  { %6023 = vmatprep.subr.bf16.mxu1 %v7665_v3 }
0x1854   :  { %6024 = vmatpush3.bf16.msra.mxu1 %v6448_v12 }
0x1855   :  { %6025 = vmatprep.subr.bf16.mxu1 %v7665_v3 }
0x1858   :  { %6026 = vmatpush3.bf16.msra.mxu1 %v6449_v13 }
0x1859   :  { %6027 = vmatprep.subr.bf16.mxu1 %v7665_v3 }
0x185c   :  { %6028 = vmatpush3.bf16.msra.mxu1 %v6450_v14 }
0x185f   :  { %6030 = vmatmul.mubr.bf16.vlgmr.msra.gmra.mrb[72].mxu1 %v4503_v58 }
0x1912   :  { %v4628_v16 = vpop.f32.mrb[68].mxu1 }
0x1913   :  { %v4637_v37 = vmul.f32 0.01, %v4628_v16  ;;  %v6011_v17 = vpop.f32.mrb[69].mxu1  ;;  %vm4635_vm0 = vcmp.ge.f32.partialorder %v4628_v16, 0.0 }
0x1914   :  { %v4631_v18 = vpop.f32.mrb[70].mxu1 }
0x1915   :  { %vm4636_vm5 = vcmp.ge.f32.partialorder %v4631_v18, 0.0  ;;  %v4638_v21 = vmul.f32 0.01, %v4631_v18  ;;  %v6012_v22 = vpop.f32.mrb[71].mxu1  ;;  %v4639_v24 = vsel %vm4635_vm0, %v4628_v16, %v4637_v37 }
0x1917   :  { %v4640_v25 = vsel %vm4636_vm5, %v4631_v18, %v4638_v21 }
0x1918   :  { %v4744_v26 = vpack.c.bf16 %v4640_v25, %v4639_v24 }
0x191a   :  { %6050 = vmatmul.mubr.bf16.vlgmr.msra.gmra.mrb[68].mxu0 %v4744_v26 }
0x1932   :  { %v4729_v27 = vpop.f32.mrb[72].mxu1 }
0x1933   :  { %v6031_v28 = vpop.f32.mrb[73].mxu1  ;;  %v4730_v3 = vadd.f32 %v5231_v32, %v4729_v27 }
0x1934   :  { %v4732_v29 = vpop.f32.mrb[74].mxu1 }
0x1935   :  { %v6032_v31 = vpop.f32.mrb[75].mxu1  ;;  %v4733_v33 = vadd.f32 %v5231_v32, %v4732_v29  ;;  %v4738_v38 = vmul.f32 0.01, %v4730_v3  ;;  %vm4736_vm10 = vcmp.ge.f32.partialorder %v4730_v3, 0.0 }
0x1937   :  { %v4739_v39 = vmul.f32 0.01, %v4733_v33  ;;  %vm4737_vm11 = vcmp.ge.f32.partialorder %v4733_v33, 0.0  ;;  %v4740_v41 = vsel %vm4736_vm10, %v4730_v3, %v4738_v38 }
0x1938   :  { %v4742_v43 = vadd.f32 %v8524_v6, %v4740_v41 }
0x1939   :  { %v4741_v35 = vsel %vm4737_vm11, %v4733_v33, %v4739_v39 }
0x193a   :  { %v4743_v46 = vadd.f32 %v8528_v11, %v4741_v35 }
0x19ed   :  { %v4833_v36 = vpop.f32.mrb[68].mxu0 }
0x19ee   :  { %v4834_v20 = vadd.f32 %v5240_v42, %v4833_v36  ;;  %v6051_v44 = vpop.f32.mrb[69].mxu0 }
0x19ef   :  { %v4836_v45 = vpop.f32.mrb[70].mxu0 }
0x19f0   :  { %v4840_v19 = vadd.f32 %v4834_v20, %v4742_v43  ;;  %v4837_v47 = vadd.f32 %v5240_v42, %v4836_v45  ;;  %v6052_v48 = vpop.f32.mrb[71].mxu0 }
0x19f2   :  { %vm4842_vm12 = vcmp.ge.f32.partialorder %v4840_v19, 0.0  ;;  %v4844_v49 = vmul.f32 0.01, %v4840_v19  ;;  %v4841_v0 = vadd.f32 %v4837_v47, %v4743_v46 }
0x19f4   :  { %vm4843_vm13 = vcmp.ge.f32.partialorder %v4841_v0, 0.0  ;;  %v4845_v51 = vmul.f32 0.01, %v4841_v0  ;;  %v4846_v52 = vsel %vm4842_vm12, %v4840_v19, %v4844_v49 }
0x19f5   :  { %v4848_v53 = vadd.f32 %v4846_v52, %v8623_v5 }
0x19f6   :  { %v4847_v54 = vsel %vm4843_vm13, %v4841_v0, %v4845_v51 }
0x19f7   :  { %v4849_v6 = vadd.f32 %v4847_v54, %v8626_v9  ;;  %v4850_v55 = vmul.f32 0.33333334, %v4848_v53 }
0x19f9   :  { %v4851_v58 = vmul.f32 0.33333334, %v4849_v6  ;;  %4852 = vst [vmem:[#allocation73] sm:$0xff] %v4850_v55 }
0x19fb   :  { %4853 = vst [vmem:[#allocation73 + $0x8] sm:$0xff] %v4851_v58 }
0x19fc   :  { %7498 = shalt.err (!%p7495_p8)
}
0x19fd   :  { %s7499_s26 = scalar_lea.hbm %s7951_s5, 256 }
0x19fe   :  { %p7500_p9 = scmp.ne.s32.totalorder %s7951_s5, %s7499_s26  ;;  %p7503_p10 = scmp.lt.u32.totalorder %s7499_s26, %s7951_s5 }
0x1a00   :  { %p7505_p11 = pnand %p7503_p10, %p7500_p9 }
0x1a02   :  { %7508 = shalt.err (!%p7505_p11)
}
0x1a03   :  { %4865 = dma.vmem_to_hbm [thread:$0]  %s4860_s3, 256, %s7951_s5, [#allocation4], %s7615_s28, %s7615_s28, %s7616_s1  }
0x1a04   :  { %7557 = dma.done.wait [#allocation4], 256  }
0x1a05   :  { %7558 = vsyncadd [#allocation4], 4294967040 }
0x1a06   :  { %4869 = vsyncpa [#allocation3], 1 }
0x1a07   :  { %4870 = vsyncpa [#allocation6], 1 }
0x1a08   :  { %4871 = vsyncpa [#allocation9], 1 }
0x1a09   :  { %4872 = vsyncpa [#allocation12], 1 }
0x1a0a   :  { %4873 = vsyncpa [#allocation15], 1 }
0x1a0b   :  { %4874 = vsyncpa [#allocation18], 1 }
0x1a0c   :  { %4875 = vsyncpa [#allocation21], 1 }
0x1a0d   :  { %4876 = vsyncpa [#allocation24], 1 }
0x1a0e   :  { %4877 = vsyncpa [#allocation27], 1 }
0x1a0f   :  { %4878 = vsyncpa [#allocation30], 1 }
0x1a10   :  { %4879 = vsyncpa [#allocation33], 1 }
0x1a11   :  { %4880 = vsyncpa [#allocation36], 1 }
0x1a12   :  { %4881 = vsyncpa [#allocation39], 1 }
0x1a13   :  { %4882 = vsyncpa [#allocation42], 1 }
0x1a14   :  { %4883 = vsyncpa [#allocation45], 1 }
0x1a15   :  { %4884 = vsyncpa [#allocation48], 1 }
0x1a16   :  { %4885 = vsyncpa [#allocation51], 1 }
0x1a17   :  { %4886 = vsyncpa [#allocation54], 1 }
0x1a18   :  { %4887 = vsyncpa [#allocation57], 1 }
0x1a19   :  { %4888 = vsyncpa [#allocation60], 1 }
0x1a1a   :  { %4889 = vsyncpa [#allocation63], 1 }
0x1a1b   :  { %4890 = vsyncpa [#allocation66], 1 }
0x1a1c   :  { %4891 = vsyncpa [#allocation69], 1 }
0x1a1d   :  { %4892 = vsyncpa [#allocation72], 1 }
0x1a1e   :  { %4893 = vsyncpa [#allocation4], 1 }

</bundles_post_ra>
